<compile_context>
chip_gen: v7x
topology: tpu7x:2x2x1
jax: 0.10.0
libtpu: 0.0.40
codegen_flags: <defaults>
</compile_context>

<pallas_src>
import functools

import jax
import jax.numpy as jnp
import numpy as np
from jax import lax
from jax.experimental import pallas as pl
from jax.experimental.pallas import tpu as pltpu

# ----------------------------- configuration --------------------------------
INPUT_SIZE = 16
HIDDEN = 32          # small stand-in for the default 128
NUM_LAYERS = 2
BATCH = 2
SEQ = 8


# ----------------------- fused Pallas kernel ---------------------------------
def _fused_bilstm_kernel(x_ref, wih0_ref, b0_ref, whh0f_ref, whh0b_ref,
                         wih1f_ref, wih1b_ref, b1_ref, whh1f_ref, whh1b_ref,
                         fcwf_ref, fcwb_ref, fcb_ref,
                         o_ref,
                         gx_ref, seqf_ref, seqb_ref, *, T, Bp, H):
    """Whole PureLSTM forward in one kernel invocation.

    x_ref    : (T*Bp, D)   bf16 time-major input, batch padded to Bp (sublanes)
    wih0_ref : (D, 8H)     bf16 layer-0 input->gates [fwd 4H | bwd 4H], gates [i|f|o|g]
    wih1f/b  : (H, 8H)     bf16 layer-1 input->gates rows for seq_f / seq_b halves
    whh*f/b  : (H, 4H)     bf16 per-direction hidden->gates
    b0/b1    : (1, 8H)     f32  b_ih + b_hh (both directions)
    fcwf/fcwb: (H, 1)      bf16 final Linear weight split per direction; fcb (1,1) f32
    o_ref    : (Bp, 1)     f32  model output (padded rows sliced off by wrapper)
    gx_ref   : (T*Bp, 8H)  f32 VMEM scratch - hoisted input-projection gates
    seqf/seqb: (T*Bp, H)   f32 VMEM scratch - layer-0 fwd / bwd hidden sequence
    """
    H2, H3, H4, H8 = 2 * H, 3 * H, 4 * H, 8 * H
    bf16 = jnp.bfloat16

    def recurrence(whh_f, whh_b, write_seq):
        # Forward direction consumes time s, backward consumes time T-1-s in
        # the same step; each direction has its own (H, 4H) hidden matmul.
        def step(s, carry):
            h_f, c_f, h_b, c_b, hb_last = carry            # all f32 (Bp, H)
            rf = pl.multiple_of(s * Bp, Bp)                 # fwd row offset
            rb = pl.multiple_of((T - 1 - s) * Bp, Bp)       # bwd row offset

            gh_f = jnp.dot(h_f.astype(bf16), whh_f, preferred_element_type=jnp.float32)
            gh_b = jnp.dot(h_b.astype(bf16), whh_b, preferred_element_type=jnp.float32)
            g_f = gx_ref[pl.ds(rf, Bp), 0:H4] + gh_f        # (Bp, 4H) f32
            g_b = gx_ref[pl.ds(rb, Bp), H4:H8] + gh_b

            # Gate layout [i | f | o | g]: sigmoid on the 3H slab only,
            # tanh on the trailing H slab only (halves EUP work per step).
            # TODO(synk): at the real H=128 these splits are 128-lane aligned;
            # at H=32 they are sub-vreg extracts.
            sf, gg_f = jax.nn.sigmoid(g_f[:, 0:H3]), jnp.tanh(g_f[:, H3:H4])
            sb, gg_b = jax.nn.sigmoid(g_b[:, 0:H3]), jnp.tanh(g_b[:, H3:H4])

            c_f = sf[:, H:H2] * c_f + sf[:, 0:H] * gg_f
            c_b = sb[:, H:H2] * c_b + sb[:, 0:H] * gg_b
            h_f = sf[:, H2:H3] * jnp.tanh(c_f)
            h_b = sb[:, H2:H3] * jnp.tanh(c_b)

            if write_seq:
                seqf_ref[pl.ds(rf, Bp), :] = h_f            # time-s fwd hidden
                seqb_ref[pl.ds(rb, Bp), :] = h_b            # time-(T-1-s) bwd hidden
            # Backward-direction hidden for timestep T-1 is produced at s == 0.
            hb_last = jnp.where(s == 0, h_b, hb_last)
            return h_f, c_f, h_b, c_b, hb_last

        z = jnp.zeros((Bp, H), jnp.float32)
        h_f, _, _, _, hb_last = lax.fori_loop(0, T, step, (z, z, z, z, z),
                                              unroll=True)
        return h_f, hb_last                                 # hiddens at time T-1

    # ---- layer 0: hoisted input projection (one MXU matmul for all T, both dirs) ----
    gx_ref[...] = jnp.dot(x_ref[...], wih0_ref[...],
                          preferred_element_type=jnp.float32) + b0_ref[...]
    recurrence(whh0f_ref[...], whh0b_ref[...], write_seq=True)
    # inter-layer nn.Dropout is identity in eval mode.

    # ---- layer 1: hoisted projection from the two per-direction seq buffers ----
    gx_ref[...] = (jnp.dot(seqf_ref[...].astype(bf16), wih1f_ref[...],
                           preferred_element_type=jnp.float32)
                   + jnp.dot(seqb_ref[...].astype(bf16), wih1b_ref[...],
                             preferred_element_type=jnp.float32)
                   + b1_ref[...])
    hf_last, hb_last = recurrence(whh1f_ref[...], whh1b_ref[...], write_seq=False)

    # ---- FC head on lstm_out[:, -1, :]  (pre-FC nn.Dropout is identity in eval) ----
    o_ref[...] = (jnp.dot(hf_last.astype(bf16), fcwf_ref[...],
                          preferred_element_type=jnp.float32)
                  + jnp.dot(hb_last.astype(bf16), fcwb_ref[...],
                            preferred_element_type=jnp.float32)
                  + fcb_ref[...])


# ------------------------------ wrapper --------------------------------------
def pure_lstm_forward(x, kp, *, hidden=HIDDEN):
    """x: (B, T, input_size) batch_first; returns (B, 1)."""
    B, T, D = x.shape
    H = hidden
    Bp = ((B + 7) // 8) * 8                      # pad batch to a sublane multiple

    x_tm = jnp.transpose(x, (1, 0, 2)).astype(jnp.float32)          # (T, B, D)
    x_pad = jnp.pad(x_tm, ((0, 0), (0, Bp - B), (0, 0)))            # (T, Bp, D)
    x_flat = x_pad.reshape(T * Bp, D).astype(jnp.bfloat16)          # MXU operand

    kernel = functools.partial(_fused_bilstm_kernel, T=T, Bp=Bp, H=H)

    def fs(shape):
        n = len(shape)
        return pl.BlockSpec(shape, lambda i, n=n: (0,) * n)

    args = (x_flat,
            kp["wih0"], kp["b0"], kp["whh0f"], kp["whh0b"],
            kp["wih1f"], kp["wih1b"], kp["b1"], kp["whh1f"], kp["whh1b"],
            kp["fcwf"], kp["fcwb"], kp["fcb"])

    out = pl.pallas_call(
        kernel,
        out_shape=jax.ShapeDtypeStruct((Bp, 1), jnp.float32),
        grid=(1,),
        in_specs=[fs(a.shape) for a in args],
        out_specs=fs((Bp, 1)),
        scratch_shapes=[
            pltpu.VMEM((T * Bp, 8 * H), jnp.float32),   # hoisted gates gx
            pltpu.VMEM((T * Bp, H), jnp.float32),       # layer-0 fwd hidden sequence
            pltpu.VMEM((T * Bp, H), jnp.float32),       # layer-0 bwd hidden sequence
        ],
        compiler_params=pltpu.CompilerParams(
            dimension_semantics=("arbitrary",),
        ),
    )(*args)
    return out[:B]


# ------------------------------ reference (JAX) -------------------------------
def _ref_lstm_dir(x_tm, w_ih_t, w_hh_t, b, reverse):
    T, B, _ = x_tm.shape
    H = w_hh_t.shape[0]
    xs = x_tm[::-1] if reverse else x_tm

    def step(carry, x_t):
        h, c = carry
        gates = x_t @ w_ih_t + h @ w_hh_t + b
        i = jax.nn.sigmoid(gates[:, 0 * H:1 * H])
        f = jax.nn.sigmoid(gates[:, 1 * H:2 * H])
        g = jnp.tanh(gates[:, 2 * H:3 * H])
        o = jax.nn.sigmoid(gates[:, 3 * H:4 * H])
        c = f * c + i * g
        h = o * jnp.tanh(c)
        return (h, c), h

    init = (jnp.zeros((B, H), jnp.float32), jnp.zeros((B, H), jnp.float32))
    _, hs = lax.scan(step, init, xs)
    return hs[::-1] if reverse else hs


def pure_lstm_reference(x, params):
    x_tm = jnp.transpose(x, (1, 0, 2)).astype(jnp.float32)
    inp = x_tm
    for layer in range(NUM_LAYERS):
        outs = []
        for direction in range(2):
            p = params["lstm"][layer][direction]
            outs.append(
                _ref_lstm_dir(inp, p["w_ih_t"], p["w_hh_t"], p["b"], direction == 1)
            )
        inp = jnp.concatenate(outs, axis=-1)
    last = inp[-1]
    return last @ params["fc_w_t"] + params["fc_b"].reshape(1, -1)


# ------------------------------ param init -----------------------------------
def init_params(key, input_size, hidden, num_layers):
    bound = 1.0 / np.sqrt(hidden)
    params = {"lstm": []}
    for layer in range(num_layers):
        d_in = input_size if layer == 0 else 2 * hidden
        dirs = []
        for _ in range(2):
            key, k1, k2, k3, k4 = jax.random.split(key, 5)
            w_ih = jax.random.uniform(k1, (4 * hidden, d_in), jnp.float32, -bound, bound)
            w_hh = jax.random.uniform(k2, (4 * hidden, hidden), jnp.float32, -bound, bound)
            b_ih = jax.random.uniform(k3, (4 * hidden,), jnp.float32, -bound, bound)
            b_hh = jax.random.uniform(k4, (4 * hidden,), jnp.float32, -bound, bound)
            dirs.append(
                {
                    "w_ih_t": w_ih.T,      # (d_in, 4H), PyTorch gate order [i,f,g,o]
                    "w_hh_t": w_hh.T,      # (H, 4H)
                    "b": b_ih + b_hh,      # (4H,)
                }
            )
        params["lstm"].append(dirs)
    key, k1, k2 = jax.random.split(key, 3)
    fb = 1.0 / np.sqrt(2 * hidden)
    fc_w = jax.random.uniform(k1, (1, 2 * hidden), jnp.float32, -fb, fb)
    fc_b = jax.random.uniform(k2, (1,), jnp.float32, -fb, fb)
    params["fc_w_t"] = fc_w.T  # (2H, 1)
    params["fc_b"] = fc_b      # (1,)
    return params


def pack_kernel_params(params, hidden):
    """Repack per-direction weights into the fused-kernel layout.

    Gate columns are permuted from PyTorch's [i|f|g|o] to [i|f|o|g] so the
    kernel can apply sigmoid to a contiguous 3H slab and tanh to the last H.
    W_hh is kept per direction (no block-diagonal zeros), layer-1's W_ih is
    split by source half (fwd/bwd seq) and the FC weight by direction, so the
    kernel never concatenates along lanes. MXU operands are cast to bf16.
    """
    H = hidden

    def reorder(a):  # last axis is 4H in [i,f,g,o] -> [i,f,o,g]
        i, f, g, o = jnp.split(a, 4, axis=-1)
        return jnp.concatenate([i, f, o, g], axis=-1)

    (p0f, p0b), (p1f, p1b) = params["lstm"]
    bf16 = jnp.bfloat16

    wih0 = jnp.concatenate([reorder(p0f["w_ih_t"]), reorder(p0b["w_ih_t"])],
                           axis=1).astype(bf16)                          # (D, 8H)
    b0 = jnp.concatenate([reorder(p0f["b"]), reorder(p0b["b"])]).reshape(1, 8 * H)

    wih1 = jnp.concatenate([reorder(p1f["w_ih_t"]), reorder(p1b["w_ih_t"])], axis=1)
    return {
        "wih0": wih0,
        "b0": b0,
        "whh0f": reorder(p0f["w_hh_t"]).astype(bf16),                    # (H, 4H)
        "whh0b": reorder(p0b["w_hh_t"]).astype(bf16),
        "wih1f": wih1[:H, :].astype(bf16),                               # (H, 8H)
        "wih1b": wih1[H:, :].astype(bf16),
        "b1": jnp.concatenate([reorder(p1f["b"]), reorder(p1b["b"])]).reshape(1, 8 * H),
        "whh1f": reorder(p1f["w_hh_t"]).astype(bf16),
        "whh1b": reorder(p1b["w_hh_t"]).astype(bf16),
        "fcwf": params["fc_w_t"][:H, :].astype(bf16),                    # (H, 1)
        "fcwb": params["fc_w_t"][H:, :].astype(bf16),
        "fcb": params["fc_b"].reshape(1, 1),
    }


# --------------------------------- main ---------------------------------------
if __name__ == "__main__":
    key = jax.random.PRNGKey(0)
    key, kx, kp = jax.random.split(key, 3)

    x = jax.random.normal(kx, (BATCH, SEQ, INPUT_SIZE), jnp.float32)
    params = init_params(kp, INPUT_SIZE, HIDDEN, NUM_LAYERS)
    kparams = pack_kernel_params(params, HIDDEN)

    out = jax.block_until_ready(pure_lstm_forward(x, kparams, hidden=HIDDEN))
    assert out.shape == (BATCH, 1), out.shape

    ref = jax.block_until_ready(pure_lstm_reference(x, params))
    # MXU operands are bf16 (f32 accumulate); compare against the f32 reference
    # with a tolerance that accommodates bf16 operand rounding.
    np.testing.assert_allclose(np.asarray(out), np.asarray(ref), rtol=2e-2, atol=2e-2)

    print("KERNEL_OK")
</pallas_src>

<mosaic_0001>
module attributes {stable_mosaic.version = 11 : i64} {
  func.func @_fused_bilstm_kernel(%arg0: i32, %arg1: memref<64x16xbf16, #tpu.memory_space<vmem>>, %arg2: memref<16x256xbf16, #tpu.memory_space<vmem>>, %arg3: memref<1x256xf32, #tpu.memory_space<vmem>>, %arg4: memref<32x128xbf16, #tpu.memory_space<vmem>>, %arg5: memref<32x128xbf16, #tpu.memory_space<vmem>>, %arg6: memref<32x256xbf16, #tpu.memory_space<vmem>>, %arg7: memref<32x256xbf16, #tpu.memory_space<vmem>>, %arg8: memref<1x256xf32, #tpu.memory_space<vmem>>, %arg9: memref<32x128xbf16, #tpu.memory_space<vmem>>, %arg10: memref<32x128xbf16, #tpu.memory_space<vmem>>, %arg11: memref<32x1xbf16, #tpu.memory_space<vmem>>, %arg12: memref<32x1xbf16, #tpu.memory_space<vmem>>, %arg13: memref<1x1xf32, #tpu.memory_space<vmem>>, %arg14: memref<8x1xf32, #tpu.memory_space<vmem>>, %arg15: memref<64x256xf32, #tpu.memory_space<vmem>>, %arg16: memref<64x32xf32, #tpu.memory_space<vmem>>, %arg17: memref<64x32xf32, #tpu.memory_space<vmem>>) attributes {dimension_semantics = [#tpu.dimension_semantics<arbitrary>], iteration_bounds = array<i64: 1>, scalar_prefetch = 0 : i64, scratch_operands = 3 : i64, tpu.core_type = #tpu.core_type<tc>, window_params = [{pipeline_mode = #tpu.pipeline_mode<synchronous>, transform_indices = @transform_0, window_bounds = array<i64: 64, 16>}, {pipeline_mode = #tpu.pipeline_mode<synchronous>, transform_indices = @transform_1, window_bounds = array<i64: 16, 256>}, {pipeline_mode = #tpu.pipeline_mode<synchronous>, transform_indices = @transform_2, window_bounds = array<i64: 1, 256>}, {pipeline_mode = #tpu.pipeline_mode<synchronous>, transform_indices = @transform_3, window_bounds = array<i64: 32, 128>}, {pipeline_mode = #tpu.pipeline_mode<synchronous>, transform_indices = @transform_4, window_bounds = array<i64: 32, 128>}, {pipeline_mode = #tpu.pipeline_mode<synchronous>, transform_indices = @transform_5, window_bounds = array<i64: 32, 256>}, {pipeline_mode = #tpu.pipeline_mode<synchronous>, transform_indices = @transform_6, window_bounds = array<i64: 32, 256>}, {pipeline_mode = #tpu.pipeline_mode<synchronous>, transform_indices = @transform_7, window_bounds = array<i64: 1, 256>}, {pipeline_mode = #tpu.pipeline_mode<synchronous>, transform_indices = @transform_8, window_bounds = array<i64: 32, 128>}, {pipeline_mode = #tpu.pipeline_mode<synchronous>, transform_indices = @transform_9, window_bounds = array<i64: 32, 128>}, {pipeline_mode = #tpu.pipeline_mode<synchronous>, transform_indices = @transform_10, window_bounds = array<i64: 32, 1>}, {pipeline_mode = #tpu.pipeline_mode<synchronous>, transform_indices = @transform_11, window_bounds = array<i64: 32, 1>}, {pipeline_mode = #tpu.pipeline_mode<synchronous>, transform_indices = @transform_12, window_bounds = array<i64: 1, 1>}, {pipeline_mode = #tpu.pipeline_mode<synchronous>, transform_indices = @transform_13, window_bounds = array<i64: 8, 1>}]} {
    %c0 = arith.constant 0 : index
    %c0_0 = arith.constant 0 : index
    %0 = vector.load %arg1[%c0, %c0_0] : memref<64x16xbf16, #tpu.memory_space<vmem>>, vector<64x16xbf16>
    %c0_1 = arith.constant 0 : index
    %c0_2 = arith.constant 0 : index
    %1 = vector.load %arg2[%c0_1, %c0_2] : memref<16x256xbf16, #tpu.memory_space<vmem>>, vector<16x256xbf16>
    %cst = arith.constant dense<0.000000e+00> : vector<64x256xf32>
    %2 = tpu.matmul %0, %1, %cst {dimension_numbers = #tpu.dot_dimension_numbers<[1], [0], [0], [1], [0, 0, 1, 1], [], []>} : vector<64x16xbf16>, vector<16x256xbf16>, vector<64x256xf32> -> vector<64x256xf32>
    %c0_3 = arith.constant 0 : index
    %c0_4 = arith.constant 0 : index
    %3 = vector.load %arg3[%c0_3, %c0_4] : memref<1x256xf32, #tpu.memory_space<vmem>>, vector<1x256xf32>
    %4 = vector.broadcast %3 : vector<1x256xf32> to vector<64x256xf32>
    %5 = arith.addf %2, %4 : vector<64x256xf32>
    %c0_5 = arith.constant 0 : index
    %c0_6 = arith.constant 0 : index
    %6 = vector.load %arg15[%c0_5, %c0_6] : memref<64x256xf32, #tpu.memory_space<vmem>>, vector<64x256xf32>
    tpu.vector_store %arg15[%c0_5, %c0_6], %5 {strides = array<i32>} : memref<64x256xf32, #tpu.memory_space<vmem>>, vector<64x256xf32>,
    %c0_7 = arith.constant 0 : index
    %c0_8 = arith.constant 0 : index
    %7 = vector.load %arg4[%c0_7, %c0_8] : memref<32x128xbf16, #tpu.memory_space<vmem>>, vector<32x128xbf16>
    %c0_9 = arith.constant 0 : index
    %c0_10 = arith.constant 0 : index
    %8 = vector.load %arg5[%c0_9, %c0_10] : memref<32x128xbf16, #tpu.memory_space<vmem>>, vector<32x128xbf16>
    %cst_11 = arith.constant 0.000000e+00 : f32
    %9 = vector.broadcast %cst_11 : f32 to vector<8x32xf32>
    %c0_i32 = arith.constant 0 : i32
    %c8_i32 = arith.constant 8 : i32
    %10 = arith.muli %c0_i32, %c8_i32 : i32
    %11 = tpu.assume_multiple %10, 8 : i32
    %c7_i32 = arith.constant 7 : i32
    %12 = arith.subi %c7_i32, %c0_i32 : i32
    %c8_i32_12 = arith.constant 8 : i32
    %13 = arith.muli %12, %c8_i32_12 : i32
    %14 = tpu.assume_multiple %13, 8 : i32
    %15 = arith.truncf %9 : vector<8x32xf32> to vector<8x32xbf16>
    %cst_13 = arith.constant dense<0.000000e+00> : vector<8x128xf32>
    %16 = tpu.matmul %15, %7, %cst_13 {dimension_numbers = #tpu.dot_dimension_numbers<[1], [0], [0], [1], [0, 0, 1, 1], [], []>} : vector<8x32xbf16>, vector<32x128xbf16>, vector<8x128xf32> -> vector<8x128xf32>
    %17 = arith.truncf %9 : vector<8x32xf32> to vector<8x32xbf16>
    %cst_14 = arith.constant dense<0.000000e+00> : vector<8x128xf32>
    %18 = tpu.matmul %17, %8, %cst_14 {dimension_numbers = #tpu.dot_dimension_numbers<[1], [0], [0], [1], [0, 0, 1, 1], [], []>} : vector<8x32xbf16>, vector<32x128xbf16>, vector<8x128xf32> -> vector<8x128xf32>
    %19 = arith.index_cast %11 : i32 to index
    %c0_15 = arith.constant 0 : index
    %20 = vector.load %arg15[%19, %c0_15] : memref<64x256xf32, #tpu.memory_space<vmem>>, vector<8x128xf32>
    %21 = arith.addf %20, %16 : vector<8x128xf32>
    %22 = arith.index_cast %14 : i32 to index
    %c128 = arith.constant 128 : index
    %23 = vector.load %arg15[%22, %c128] : memref<64x256xf32, #tpu.memory_space<vmem>>, vector<8x128xf32>
    %24 = arith.addf %23, %18 : vector<8x128xf32>
    %25 = vector.extract_strided_slice %21 {offsets = [0, 0], sizes = [8, 96], strides = [1, 1]} : vector<8x128xf32> to vector<8x96xf32>
    %26 = arith.negf %25 : vector<8x96xf32>
    %27 = math.exp %26 : vector<8x96xf32>
    %cst_16 = arith.constant 1.000000e+00 : f32
    %28 = vector.broadcast %cst_16 : f32 to vector<8x96xf32>
    %29 = arith.addf %28, %27 : vector<8x96xf32>
    %30 = arith.divf %28, %29 : vector<8x96xf32>
    %31 = vector.extract_strided_slice %21 {offsets = [0, 96], sizes = [8, 32], strides = [1, 1]} : vector<8x128xf32> to vector<8x32xf32>
    %32 = math.tanh %31 : vector<8x32xf32>
    %33 = vector.extract_strided_slice %24 {offsets = [0, 0], sizes = [8, 96], strides = [1, 1]} : vector<8x128xf32> to vector<8x96xf32>
    %34 = arith.negf %33 : vector<8x96xf32>
    %35 = math.exp %34 : vector<8x96xf32>
    %cst_17 = arith.constant 1.000000e+00 : f32
    %36 = vector.broadcast %cst_17 : f32 to vector<8x96xf32>
    %37 = arith.addf %36, %35 : vector<8x96xf32>
    %38 = arith.divf %36, %37 : vector<8x96xf32>
    %39 = vector.extract_strided_slice %24 {offsets = [0, 96], sizes = [8, 32], strides = [1, 1]} : vector<8x128xf32> to vector<8x32xf32>
    %40 = math.tanh %39 : vector<8x32xf32>
    %41 = vector.extract_strided_slice %30 {offsets = [0, 32], sizes = [8, 32], strides = [1, 1]} : vector<8x96xf32> to vector<8x32xf32>
    %42 = arith.mulf %41, %9 : vector<8x32xf32>
    %43 = vector.extract_strided_slice %30 {offsets = [0, 0], sizes = [8, 32], strides = [1, 1]} : vector<8x96xf32> to vector<8x32xf32>
    %44 = arith.mulf %43, %32 : vector<8x32xf32>
    %45 = arith.addf %42, %44 : vector<8x32xf32>
    %46 = vector.extract_strided_slice %38 {offsets = [0, 32], sizes = [8, 32], strides = [1, 1]} : vector<8x96xf32> to vector<8x32xf32>
    %47 = arith.mulf %46, %9 : vector<8x32xf32>
    %48 = vector.extract_strided_slice %38 {offsets = [0, 0], sizes = [8, 32], strides = [1, 1]} : vector<8x96xf32> to vector<8x32xf32>
    %49 = arith.mulf %48, %40 : vector<8x32xf32>
    %50 = arith.addf %47, %49 : vector<8x32xf32>
    %51 = vector.extract_strided_slice %30 {offsets = [0, 64], sizes = [8, 32], strides = [1, 1]} : vector<8x96xf32> to vector<8x32xf32>
    %52 = math.tanh %45 : vector<8x32xf32>
    %53 = arith.mulf %51, %52 : vector<8x32xf32>
    %54 = vector.extract_strided_slice %38 {offsets = [0, 64], sizes = [8, 32], strides = [1, 1]} : vector<8x96xf32> to vector<8x32xf32>
    %55 = math.tanh %50 : vector<8x32xf32>
    %56 = arith.mulf %54, %55 : vector<8x32xf32>
    %57 = arith.index_cast %11 : i32 to index
    %c0_18 = arith.constant 0 : index
    %58 = vector.load %arg16[%57, %c0_18] : memref<64x32xf32, #tpu.memory_space<vmem>>, vector<8x32xf32>
    tpu.vector_store %arg16[%57, %c0_18], %53 {strides = array<i32>} : memref<64x32xf32, #tpu.memory_space<vmem>>, vector<8x32xf32>,
    %59 = arith.index_cast %14 : i32 to index
    %c0_19 = arith.constant 0 : index
    %60 = vector.load %arg17[%59, %c0_19] : memref<64x32xf32, #tpu.memory_space<vmem>>, vector<8x32xf32>
    tpu.vector_store %arg17[%59, %c0_19], %56 {strides = array<i32>} : memref<64x32xf32, #tpu.memory_space<vmem>>, vector<8x32xf32>,
    %c1_i32 = arith.constant 1 : i32
    %c8_i32_20 = arith.constant 8 : i32
    %61 = arith.muli %c1_i32, %c8_i32_20 : i32
    %62 = tpu.assume_multiple %61, 8 : i32
    %c7_i32_21 = arith.constant 7 : i32
    %63 = arith.subi %c7_i32_21, %c1_i32 : i32
    %c8_i32_22 = arith.constant 8 : i32
    %64 = arith.muli %63, %c8_i32_22 : i32
    %65 = tpu.assume_multiple %64, 8 : i32
    %66 = arith.truncf %53 : vector<8x32xf32> to vector<8x32xbf16>
    %cst_23 = arith.constant dense<0.000000e+00> : vector<8x128xf32>
    %67 = tpu.matmul %66, %7, %cst_23 {dimension_numbers = #tpu.dot_dimension_numbers<[1], [0], [0], [1], [0, 0, 1, 1], [], []>} : vector<8x32xbf16>, vector<32x128xbf16>, vector<8x128xf32> -> vector<8x128xf32>
    %68 = arith.truncf %56 : vector<8x32xf32> to vector<8x32xbf16>
    %cst_24 = arith.constant dense<0.000000e+00> : vector<8x128xf32>
    %69 = tpu.matmul %68, %8, %cst_24 {dimension_numbers = #tpu.dot_dimension_numbers<[1], [0], [0], [1], [0, 0, 1, 1], [], []>} : vector<8x32xbf16>, vector<32x128xbf16>, vector<8x128xf32> -> vector<8x128xf32>
    %70 = arith.index_cast %62 : i32 to index
    %c0_25 = arith.constant 0 : index
    %71 = vector.load %arg15[%70, %c0_25] : memref<64x256xf32, #tpu.memory_space<vmem>>, vector<8x128xf32>
    %72 = arith.addf %71, %67 : vector<8x128xf32>
    %73 = arith.index_cast %65 : i32 to index
    %c128_26 = arith.constant 128 : index
    %74 = vector.load %arg15[%73, %c128_26] : memref<64x256xf32, #tpu.memory_space<vmem>>, vector<8x128xf32>
    %75 = arith.addf %74, %69 : vector<8x128xf32>
    %76 = vector.extract_strided_slice %72 {offsets = [0, 0], sizes = [8, 96], strides = [1, 1]} : vector<8x128xf32> to vector<8x96xf32>
    %77 = arith.negf %76 : vector<8x96xf32>
    %78 = math.exp %77 : vector<8x96xf32>
    %cst_27 = arith.constant 1.000000e+00 : f32
    %79 = vector.broadcast %cst_27 : f32 to vector<8x96xf32>
    %80 = arith.addf %79, %78 : vector<8x96xf32>
    %81 = arith.divf %79, %80 : vector<8x96xf32>
    %82 = vector.extract_strided_slice %72 {offsets = [0, 96], sizes = [8, 32], strides = [1, 1]} : vector<8x128xf32> to vector<8x32xf32>
    %83 = math.tanh %82 : vector<8x32xf32>
    %84 = vector.extract_strided_slice %75 {offsets = [0, 0], sizes = [8, 96], strides = [1, 1]} : vector<8x128xf32> to vector<8x96xf32>
    %85 = arith.negf %84 : vector<8x96xf32>
    %86 = math.exp %85 : vector<8x96xf32>
    %cst_28 = arith.constant 1.000000e+00 : f32
    %87 = vector.broadcast %cst_28 : f32 to vector<8x96xf32>
    %88 = arith.addf %87, %86 : vector<8x96xf32>
    %89 = arith.divf %87, %88 : vector<8x96xf32>
    %90 = vector.extract_strided_slice %75 {offsets = [0, 96], sizes = [8, 32], strides = [1, 1]} : vector<8x128xf32> to vector<8x32xf32>
    %91 = math.tanh %90 : vector<8x32xf32>
    %92 = vector.extract_strided_slice %81 {offsets = [0, 32], sizes = [8, 32], strides = [1, 1]} : vector<8x96xf32> to vector<8x32xf32>
    %93 = arith.mulf %92, %45 : vector<8x32xf32>
    %94 = vector.extract_strided_slice %81 {offsets = [0, 0], sizes = [8, 32], strides = [1, 1]} : vector<8x96xf32> to vector<8x32xf32>
    %95 = arith.mulf %94, %83 : vector<8x32xf32>
    %96 = arith.addf %93, %95 : vector<8x32xf32>
    %97 = vector.extract_strided_slice %89 {offsets = [0, 32], sizes = [8, 32], strides = [1, 1]} : vector<8x96xf32> to vector<8x32xf32>
    %98 = arith.mulf %97, %50 : vector<8x32xf32>
    %99 = vector.extract_strided_slice %89 {offsets = [0, 0], sizes = [8, 32], strides = [1, 1]} : vector<8x96xf32> to vector<8x32xf32>
    %100 = arith.mulf %99, %91 : vector<8x32xf32>
    %101 = arith.addf %98, %100 : vector<8x32xf32>
    %102 = vector.extract_strided_slice %81 {offsets = [0, 64], sizes = [8, 32], strides = [1, 1]} : vector<8x96xf32> to vector<8x32xf32>
    %103 = math.tanh %96 : vector<8x32xf32>
    %104 = arith.mulf %102, %103 : vector<8x32xf32>
    %105 = vector.extract_strided_slice %89 {offsets = [0, 64], sizes = [8, 32], strides = [1, 1]} : vector<8x96xf32> to vector<8x32xf32>
    %106 = math.tanh %101 : vector<8x32xf32>
    %107 = arith.mulf %105, %106 : vector<8x32xf32>
    %108 = arith.index_cast %62 : i32 to index
    %c0_29 = arith.constant 0 : index
    %109 = vector.load %arg16[%108, %c0_29] : memref<64x32xf32, #tpu.memory_space<vmem>>, vector<8x32xf32>
    tpu.vector_store %arg16[%108, %c0_29], %104 {strides = array<i32>} : memref<64x32xf32, #tpu.memory_space<vmem>>, vector<8x32xf32>,
    %110 = arith.index_cast %65 : i32 to index
    %c0_30 = arith.constant 0 : index
    %111 = vector.load %arg17[%110, %c0_30] : memref<64x32xf32, #tpu.memory_space<vmem>>, vector<8x32xf32>
    tpu.vector_store %arg17[%110, %c0_30], %107 {strides = array<i32>} : memref<64x32xf32, #tpu.memory_space<vmem>>, vector<8x32xf32>,
    %c2_i32 = arith.constant 2 : i32
    %c8_i32_31 = arith.constant 8 : i32
    %112 = arith.muli %c2_i32, %c8_i32_31 : i32
    %113 = tpu.assume_multiple %112, 8 : i32
    %c7_i32_32 = arith.constant 7 : i32
    %114 = arith.subi %c7_i32_32, %c2_i32 : i32
    %c8_i32_33 = arith.constant 8 : i32
    %115 = arith.muli %114, %c8_i32_33 : i32
    %116 = tpu.assume_multiple %115, 8 : i32
    %117 = arith.truncf %104 : vector<8x32xf32> to vector<8x32xbf16>
    %cst_34 = arith.constant dense<0.000000e+00> : vector<8x128xf32>
    %118 = tpu.matmul %117, %7, %cst_34 {dimension_numbers = #tpu.dot_dimension_numbers<[1], [0], [0], [1], [0, 0, 1, 1], [], []>} : vector<8x32xbf16>, vector<32x128xbf16>, vector<8x128xf32> -> vector<8x128xf32>
    %119 = arith.truncf %107 : vector<8x32xf32> to vector<8x32xbf16>
    %cst_35 = arith.constant dense<0.000000e+00> : vector<8x128xf32>
    %120 = tpu.matmul %119, %8, %cst_35 {dimension_numbers = #tpu.dot_dimension_numbers<[1], [0], [0], [1], [0, 0, 1, 1], [], []>} : vector<8x32xbf16>, vector<32x128xbf16>, vector<8x128xf32> -> vector<8x128xf32>
    %121 = arith.index_cast %113 : i32 to index
    %c0_36 = arith.constant 0 : index
    %122 = vector.load %arg15[%121, %c0_36] : memref<64x256xf32, #tpu.memory_space<vmem>>, vector<8x128xf32>
    %123 = arith.addf %122, %118 : vector<8x128xf32>
    %124 = arith.index_cast %116 : i32 to index
    %c128_37 = arith.constant 128 : index
    %125 = vector.load %arg15[%124, %c128_37] : memref<64x256xf32, #tpu.memory_space<vmem>>, vector<8x128xf32>
    %126 = arith.addf %125, %120 : vector<8x128xf32>
    %127 = vector.extract_strided_slice %123 {offsets = [0, 0], sizes = [8, 96], strides = [1, 1]} : vector<8x128xf32> to vector<8x96xf32>
    %128 = arith.negf %127 : vector<8x96xf32>
    %129 = math.exp %128 : vector<8x96xf32>
    %cst_38 = arith.constant 1.000000e+00 : f32
    %130 = vector.broadcast %cst_38 : f32 to vector<8x96xf32>
    %131 = arith.addf %130, %129 : vector<8x96xf32>
    %132 = arith.divf %130, %131 : vector<8x96xf32>
    %133 = vector.extract_strided_slice %123 {offsets = [0, 96], sizes = [8, 32], strides = [1, 1]} : vector<8x128xf32> to vector<8x32xf32>
    %134 = math.tanh %133 : vector<8x32xf32>
    %135 = vector.extract_strided_slice %126 {offsets = [0, 0], sizes = [8, 96], strides = [1, 1]} : vector<8x128xf32> to vector<8x96xf32>
    %136 = arith.negf %135 : vector<8x96xf32>
    %137 = math.exp %136 : vector<8x96xf32>
    %cst_39 = arith.constant 1.000000e+00 : f32
    %138 = vector.broadcast %cst_39 : f32 to vector<8x96xf32>
    %139 = arith.addf %138, %137 : vector<8x96xf32>
    %140 = arith.divf %138, %139 : vector<8x96xf32>
    %141 = vector.extract_strided_slice %126 {offsets = [0, 96], sizes = [8, 32], strides = [1, 1]} : vector<8x128xf32> to vector<8x32xf32>
    %142 = math.tanh %141 : vector<8x32xf32>
    %143 = vector.extract_strided_slice %132 {offsets = [0, 32], sizes = [8, 32], strides = [1, 1]} : vector<8x96xf32> to vector<8x32xf32>
    %144 = arith.mulf %143, %96 : vector<8x32xf32>
    %145 = vector.extract_strided_slice %132 {offsets = [0, 0], sizes = [8, 32], strides = [1, 1]} : vector<8x96xf32> to vector<8x32xf32>
    %146 = arith.mulf %145, %134 : vector<8x32xf32>
    %147 = arith.addf %144, %146 : vector<8x32xf32>
    %148 = vector.extract_strided_slice %140 {offsets = [0, 32], sizes = [8, 32], strides = [1, 1]} : vector<8x96xf32> to vector<8x32xf32>
    %149 = arith.mulf %148, %101 : vector<8x32xf32>
    %150 = vector.extract_strided_slice %140 {offsets = [0, 0], sizes = [8, 32], strides = [1, 1]} : vector<8x96xf32> to vector<8x32xf32>
    %151 = arith.mulf %150, %142 : vector<8x32xf32>
    %152 = arith.addf %149, %151 : vector<8x32xf32>
    %153 = vector.extract_strided_slice %132 {offsets = [0, 64], sizes = [8, 32], strides = [1, 1]} : vector<8x96xf32> to vector<8x32xf32>
    %154 = math.tanh %147 : vector<8x32xf32>
    %155 = arith.mulf %153, %154 : vector<8x32xf32>
    %156 = vector.extract_strided_slice %140 {offsets = [0, 64], sizes = [8, 32], strides = [1, 1]} : vector<8x96xf32> to vector<8x32xf32>
    %157 = math.tanh %152 : vector<8x32xf32>
    %158 = arith.mulf %156, %157 : vector<8x32xf32>
    %159 = arith.index_cast %113 : i32 to index
    %c0_40 = arith.constant 0 : index
    %160 = vector.load %arg16[%159, %c0_40] : memref<64x32xf32, #tpu.memory_space<vmem>>, vector<8x32xf32>
    tpu.vector_store %arg16[%159, %c0_40], %155 {strides = array<i32>} : memref<64x32xf32, #tpu.memory_space<vmem>>, vector<8x32xf32>,
    %161 = arith.index_cast %116 : i32 to index
    %c0_41 = arith.constant 0 : index
    %162 = vector.load %arg17[%161, %c0_41] : memref<64x32xf32, #tpu.memory_space<vmem>>, vector<8x32xf32>
    tpu.vector_store %arg17[%161, %c0_41], %158 {strides = array<i32>} : memref<64x32xf32, #tpu.memory_space<vmem>>, vector<8x32xf32>,
    %c3_i32 = arith.constant 3 : i32
    %c8_i32_42 = arith.constant 8 : i32
    %163 = arith.muli %c3_i32, %c8_i32_42 : i32
    %164 = tpu.assume_multiple %163, 8 : i32
    %c7_i32_43 = arith.constant 7 : i32
    %165 = arith.subi %c7_i32_43, %c3_i32 : i32
    %c8_i32_44 = arith.constant 8 : i32
    %166 = arith.muli %165, %c8_i32_44 : i32
    %167 = tpu.assume_multiple %166, 8 : i32
    %168 = arith.truncf %155 : vector<8x32xf32> to vector<8x32xbf16>
    %cst_45 = arith.constant dense<0.000000e+00> : vector<8x128xf32>
    %169 = tpu.matmul %168, %7, %cst_45 {dimension_numbers = #tpu.dot_dimension_numbers<[1], [0], [0], [1], [0, 0, 1, 1], [], []>} : vector<8x32xbf16>, vector<32x128xbf16>, vector<8x128xf32> -> vector<8x128xf32>
    %170 = arith.truncf %158 : vector<8x32xf32> to vector<8x32xbf16>
    %cst_46 = arith.constant dense<0.000000e+00> : vector<8x128xf32>
    %171 = tpu.matmul %170, %8, %cst_46 {dimension_numbers = #tpu.dot_dimension_numbers<[1], [0], [0], [1], [0, 0, 1, 1], [], []>} : vector<8x32xbf16>, vector<32x128xbf16>, vector<8x128xf32> -> vector<8x128xf32>
    %172 = arith.index_cast %164 : i32 to index
    %c0_47 = arith.constant 0 : index
    %173 = vector.load %arg15[%172, %c0_47] : memref<64x256xf32, #tpu.memory_space<vmem>>, vector<8x128xf32>
    %174 = arith.addf %173, %169 : vector<8x128xf32>
    %175 = arith.index_cast %167 : i32 to index
    %c128_48 = arith.constant 128 : index
    %176 = vector.load %arg15[%175, %c128_48] : memref<64x256xf32, #tpu.memory_space<vmem>>, vector<8x128xf32>
    %177 = arith.addf %176, %171 : vector<8x128xf32>
    %178 = vector.extract_strided_slice %174 {offsets = [0, 0], sizes = [8, 96], strides = [1, 1]} : vector<8x128xf32> to vector<8x96xf32>
    %179 = arith.negf %178 : vector<8x96xf32>
    %180 = math.exp %179 : vector<8x96xf32>
    %cst_49 = arith.constant 1.000000e+00 : f32
    %181 = vector.broadcast %cst_49 : f32 to vector<8x96xf32>
    %182 = arith.addf %181, %180 : vector<8x96xf32>
    %183 = arith.divf %181, %182 : vector<8x96xf32>
    %184 = vector.extract_strided_slice %174 {offsets = [0, 96], sizes = [8, 32], strides = [1, 1]} : vector<8x128xf32> to vector<8x32xf32>
    %185 = math.tanh %184 : vector<8x32xf32>
    %186 = vector.extract_strided_slice %177 {offsets = [0, 0], sizes = [8, 96], strides = [1, 1]} : vector<8x128xf32> to vector<8x96xf32>
    %187 = arith.negf %186 : vector<8x96xf32>
    %188 = math.exp %187 : vector<8x96xf32>
    %cst_50 = arith.constant 1.000000e+00 : f32
    %189 = vector.broadcast %cst_50 : f32 to vector<8x96xf32>
    %190 = arith.addf %189, %188 : vector<8x96xf32>
    %191 = arith.divf %189, %190 : vector<8x96xf32>
    %192 = vector.extract_strided_slice %177 {offsets = [0, 96], sizes = [8, 32], strides = [1, 1]} : vector<8x128xf32> to vector<8x32xf32>
    %193 = math.tanh %192 : vector<8x32xf32>
    %194 = vector.extract_strided_slice %183 {offsets = [0, 32], sizes = [8, 32], strides = [1, 1]} : vector<8x96xf32> to vector<8x32xf32>
    %195 = arith.mulf %194, %147 : vector<8x32xf32>
    %196 = vector.extract_strided_slice %183 {offsets = [0, 0], sizes = [8, 32], strides = [1, 1]} : vector<8x96xf32> to vector<8x32xf32>
    %197 = arith.mulf %196, %185 : vector<8x32xf32>
    %198 = arith.addf %195, %197 : vector<8x32xf32>
    %199 = vector.extract_strided_slice %191 {offsets = [0, 32], sizes = [8, 32], strides = [1, 1]} : vector<8x96xf32> to vector<8x32xf32>
    %200 = arith.mulf %199, %152 : vector<8x32xf32>
    %201 = vector.extract_strided_slice %191 {offsets = [0, 0], sizes = [8, 32], strides = [1, 1]} : vector<8x96xf32> to vector<8x32xf32>
    %202 = arith.mulf %201, %193 : vector<8x32xf32>
    %203 = arith.addf %200, %202 : vector<8x32xf32>
    %204 = vector.extract_strided_slice %183 {offsets = [0, 64], sizes = [8, 32], strides = [1, 1]} : vector<8x96xf32> to vector<8x32xf32>
    %205 = math.tanh %198 : vector<8x32xf32>
    %206 = arith.mulf %204, %205 : vector<8x32xf32>
    %207 = vector.extract_strided_slice %191 {offsets = [0, 64], sizes = [8, 32], strides = [1, 1]} : vector<8x96xf32> to vector<8x32xf32>
    %208 = math.tanh %203 : vector<8x32xf32>
    %209 = arith.mulf %207, %208 : vector<8x32xf32>
    %210 = arith.index_cast %164 : i32 to index
    %c0_51 = arith.constant 0 : index
    %211 = vector.load %arg16[%210, %c0_51] : memref<64x32xf32, #tpu.memory_space<vmem>>, vector<8x32xf32>
    tpu.vector_store %arg16[%210, %c0_51], %206 {strides = array<i32>} : memref<64x32xf32, #tpu.memory_space<vmem>>, vector<8x32xf32>,
    %212 = arith.index_cast %167 : i32 to index
    %c0_52 = arith.constant 0 : index
    %213 = vector.load %arg17[%212, %c0_52] : memref<64x32xf32, #tpu.memory_space<vmem>>, vector<8x32xf32>
    tpu.vector_store %arg17[%212, %c0_52], %209 {strides = array<i32>} : memref<64x32xf32, #tpu.memory_space<vmem>>, vector<8x32xf32>,
    %c4_i32 = arith.constant 4 : i32
    %c8_i32_53 = arith.constant 8 : i32
    %214 = arith.muli %c4_i32, %c8_i32_53 : i32
    %215 = tpu.assume_multiple %214, 8 : i32
    %c7_i32_54 = arith.constant 7 : i32
    %216 = arith.subi %c7_i32_54, %c4_i32 : i32
    %c8_i32_55 = arith.constant 8 : i32
    %217 = arith.muli %216, %c8_i32_55 : i32
    %218 = tpu.assume_multiple %217, 8 : i32
    %219 = arith.truncf %206 : vector<8x32xf32> to vector<8x32xbf16>
    %cst_56 = arith.constant dense<0.000000e+00> : vector<8x128xf32>
    %220 = tpu.matmul %219, %7, %cst_56 {dimension_numbers = #tpu.dot_dimension_numbers<[1], [0], [0], [1], [0, 0, 1, 1], [], []>} : vector<8x32xbf16>, vector<32x128xbf16>, vector<8x128xf32> -> vector<8x128xf32>
    %221 = arith.truncf %209 : vector<8x32xf32> to vector<8x32xbf16>
    %cst_57 = arith.constant dense<0.000000e+00> : vector<8x128xf32>
    %222 = tpu.matmul %221, %8, %cst_57 {dimension_numbers = #tpu.dot_dimension_numbers<[1], [0], [0], [1], [0, 0, 1, 1], [], []>} : vector<8x32xbf16>, vector<32x128xbf16>, vector<8x128xf32> -> vector<8x128xf32>
    %223 = arith.index_cast %215 : i32 to index
    %c0_58 = arith.constant 0 : index
    %224 = vector.load %arg15[%223, %c0_58] : memref<64x256xf32, #tpu.memory_space<vmem>>, vector<8x128xf32>
    %225 = arith.addf %224, %220 : vector<8x128xf32>
    %226 = arith.index_cast %218 : i32 to index
    %c128_59 = arith.constant 128 : index
    %227 = vector.load %arg15[%226, %c128_59] : memref<64x256xf32, #tpu.memory_space<vmem>>, vector<8x128xf32>
    %228 = arith.addf %227, %222 : vector<8x128xf32>
    %229 = vector.extract_strided_slice %225 {offsets = [0, 0], sizes = [8, 96], strides = [1, 1]} : vector<8x128xf32> to vector<8x96xf32>
    %230 = arith.negf %229 : vector<8x96xf32>
    %231 = math.exp %230 : vector<8x96xf32>
    %cst_60 = arith.constant 1.000000e+00 : f32
    %232 = vector.broadcast %cst_60 : f32 to vector<8x96xf32>
    %233 = arith.addf %232, %231 : vector<8x96xf32>
    %234 = arith.divf %232, %233 : vector<8x96xf32>
    %235 = vector.extract_strided_slice %225 {offsets = [0, 96], sizes = [8, 32], strides = [1, 1]} : vector<8x128xf32> to vector<8x32xf32>
    %236 = math.tanh %235 : vector<8x32xf32>
    %237 = vector.extract_strided_slice %228 {offsets = [0, 0], sizes = [8, 96], strides = [1, 1]} : vector<8x128xf32> to vector<8x96xf32>
    %238 = arith.negf %237 : vector<8x96xf32>
    %239 = math.exp %238 : vector<8x96xf32>
    %cst_61 = arith.constant 1.000000e+00 : f32
    %240 = vector.broadcast %cst_61 : f32 to vector<8x96xf32>
    %241 = arith.addf %240, %239 : vector<8x96xf32>
    %242 = arith.divf %240, %241 : vector<8x96xf32>
    %243 = vector.extract_strided_slice %228 {offsets = [0, 96], sizes = [8, 32], strides = [1, 1]} : vector<8x128xf32> to vector<8x32xf32>
    %244 = math.tanh %243 : vector<8x32xf32>
    %245 = vector.extract_strided_slice %234 {offsets = [0, 32], sizes = [8, 32], strides = [1, 1]} : vector<8x96xf32> to vector<8x32xf32>
    %246 = arith.mulf %245, %198 : vector<8x32xf32>
    %247 = vector.extract_strided_slice %234 {offsets = [0, 0], sizes = [8, 32], strides = [1, 1]} : vector<8x96xf32> to vector<8x32xf32>
    %248 = arith.mulf %247, %236 : vector<8x32xf32>
    %249 = arith.addf %246, %248 : vector<8x32xf32>
    %250 = vector.extract_strided_slice %242 {offsets = [0, 32], sizes = [8, 32], strides = [1, 1]} : vector<8x96xf32> to vector<8x32xf32>
    %251 = arith.mulf %250, %203 : vector<8x32xf32>
    %252 = vector.extract_strided_slice %242 {offsets = [0, 0], sizes = [8, 32], strides = [1, 1]} : vector<8x96xf32> to vector<8x32xf32>
    %253 = arith.mulf %252, %244 : vector<8x32xf32>
    %254 = arith.addf %251, %253 : vector<8x32xf32>
    %255 = vector.extract_strided_slice %234 {offsets = [0, 64], sizes = [8, 32], strides = [1, 1]} : vector<8x96xf32> to vector<8x32xf32>
    %256 = math.tanh %249 : vector<8x32xf32>
    %257 = arith.mulf %255, %256 : vector<8x32xf32>
    %258 = vector.extract_strided_slice %242 {offsets = [0, 64], sizes = [8, 32], strides = [1, 1]} : vector<8x96xf32> to vector<8x32xf32>
    %259 = math.tanh %254 : vector<8x32xf32>
    %260 = arith.mulf %258, %259 : vector<8x32xf32>
    %261 = arith.index_cast %215 : i32 to index
    %c0_62 = arith.constant 0 : index
    %262 = vector.load %arg16[%261, %c0_62] : memref<64x32xf32, #tpu.memory_space<vmem>>, vector<8x32xf32>
    tpu.vector_store %arg16[%261, %c0_62], %257 {strides = array<i32>} : memref<64x32xf32, #tpu.memory_space<vmem>>, vector<8x32xf32>,
    %263 = arith.index_cast %218 : i32 to index
    %c0_63 = arith.constant 0 : index
    %264 = vector.load %arg17[%263, %c0_63] : memref<64x32xf32, #tpu.memory_space<vmem>>, vector<8x32xf32>
    tpu.vector_store %arg17[%263, %c0_63], %260 {strides = array<i32>} : memref<64x32xf32, #tpu.memory_space<vmem>>, vector<8x32xf32>,
    %c5_i32 = arith.constant 5 : i32
    %c8_i32_64 = arith.constant 8 : i32
    %265 = arith.muli %c5_i32, %c8_i32_64 : i32
    %266 = tpu.assume_multiple %265, 8 : i32
    %c7_i32_65 = arith.constant 7 : i32
    %267 = arith.subi %c7_i32_65, %c5_i32 : i32
    %c8_i32_66 = arith.constant 8 : i32
    %268 = arith.muli %267, %c8_i32_66 : i32
    %269 = tpu.assume_multiple %268, 8 : i32
    %270 = arith.truncf %257 : vector<8x32xf32> to vector<8x32xbf16>
    %cst_67 = arith.constant dense<0.000000e+00> : vector<8x128xf32>
    %271 = tpu.matmul %270, %7, %cst_67 {dimension_numbers = #tpu.dot_dimension_numbers<[1], [0], [0], [1], [0, 0, 1, 1], [], []>} : vector<8x32xbf16>, vector<32x128xbf16>, vector<8x128xf32> -> vector<8x128xf32>
    %272 = arith.truncf %260 : vector<8x32xf32> to vector<8x32xbf16>
    %cst_68 = arith.constant dense<0.000000e+00> : vector<8x128xf32>
    %273 = tpu.matmul %272, %8, %cst_68 {dimension_numbers = #tpu.dot_dimension_numbers<[1], [0], [0], [1], [0, 0, 1, 1], [], []>} : vector<8x32xbf16>, vector<32x128xbf16>, vector<8x128xf32> -> vector<8x128xf32>
    %274 = arith.index_cast %266 : i32 to index
    %c0_69 = arith.constant 0 : index
    %275 = vector.load %arg15[%274, %c0_69] : memref<64x256xf32, #tpu.memory_space<vmem>>, vector<8x128xf32>
    %276 = arith.addf %275, %271 : vector<8x128xf32>
    %277 = arith.index_cast %269 : i32 to index
    %c128_70 = arith.constant 128 : index
    %278 = vector.load %arg15[%277, %c128_70] : memref<64x256xf32, #tpu.memory_space<vmem>>, vector<8x128xf32>
    %279 = arith.addf %278, %273 : vector<8x128xf32>
    %280 = vector.extract_strided_slice %276 {offsets = [0, 0], sizes = [8, 96], strides = [1, 1]} : vector<8x128xf32> to vector<8x96xf32>
    %281 = arith.negf %280 : vector<8x96xf32>
    %282 = math.exp %281 : vector<8x96xf32>
    %cst_71 = arith.constant 1.000000e+00 : f32
    %283 = vector.broadcast %cst_71 : f32 to vector<8x96xf32>
    %284 = arith.addf %283, %282 : vector<8x96xf32>
    %285 = arith.divf %283, %284 : vector<8x96xf32>
    %286 = vector.extract_strided_slice %276 {offsets = [0, 96], sizes = [8, 32], strides = [1, 1]} : vector<8x128xf32> to vector<8x32xf32>
    %287 = math.tanh %286 : vector<8x32xf32>
    %288 = vector.extract_strided_slice %279 {offsets = [0, 0], sizes = [8, 96], strides = [1, 1]} : vector<8x128xf32> to vector<8x96xf32>
    %289 = arith.negf %288 : vector<8x96xf32>
    %290 = math.exp %289 : vector<8x96xf32>
    %cst_72 = arith.constant 1.000000e+00 : f32
    %291 = vector.broadcast %cst_72 : f32 to vector<8x96xf32>
    %292 = arith.addf %291, %290 : vector<8x96xf32>
    %293 = arith.divf %291, %292 : vector<8x96xf32>
    %294 = vector.extract_strided_slice %279 {offsets = [0, 96], sizes = [8, 32], strides = [1, 1]} : vector<8x128xf32> to vector<8x32xf32>
    %295 = math.tanh %294 : vector<8x32xf32>
    %296 = vector.extract_strided_slice %285 {offsets = [0, 32], sizes = [8, 32], strides = [1, 1]} : vector<8x96xf32> to vector<8x32xf32>
    %297 = arith.mulf %296, %249 : vector<8x32xf32>
    %298 = vector.extract_strided_slice %285 {offsets = [0, 0], sizes = [8, 32], strides = [1, 1]} : vector<8x96xf32> to vector<8x32xf32>
    %299 = arith.mulf %298, %287 : vector<8x32xf32>
    %300 = arith.addf %297, %299 : vector<8x32xf32>
    %301 = vector.extract_strided_slice %293 {offsets = [0, 32], sizes = [8, 32], strides = [1, 1]} : vector<8x96xf32> to vector<8x32xf32>
    %302 = arith.mulf %301, %254 : vector<8x32xf32>
    %303 = vector.extract_strided_slice %293 {offsets = [0, 0], sizes = [8, 32], strides = [1, 1]} : vector<8x96xf32> to vector<8x32xf32>
    %304 = arith.mulf %303, %295 : vector<8x32xf32>
    %305 = arith.addf %302, %304 : vector<8x32xf32>
    %306 = vector.extract_strided_slice %285 {offsets = [0, 64], sizes = [8, 32], strides = [1, 1]} : vector<8x96xf32> to vector<8x32xf32>
    %307 = math.tanh %300 : vector<8x32xf32>
    %308 = arith.mulf %306, %307 : vector<8x32xf32>
    %309 = vector.extract_strided_slice %293 {offsets = [0, 64], sizes = [8, 32], strides = [1, 1]} : vector<8x96xf32> to vector<8x32xf32>
    %310 = math.tanh %305 : vector<8x32xf32>
    %311 = arith.mulf %309, %310 : vector<8x32xf32>
    %312 = arith.index_cast %266 : i32 to index
    %c0_73 = arith.constant 0 : index
    %313 = vector.load %arg16[%312, %c0_73] : memref<64x32xf32, #tpu.memory_space<vmem>>, vector<8x32xf32>
    tpu.vector_store %arg16[%312, %c0_73], %308 {strides = array<i32>} : memref<64x32xf32, #tpu.memory_space<vmem>>, vector<8x32xf32>,
    %314 = arith.index_cast %269 : i32 to index
    %c0_74 = arith.constant 0 : index
    %315 = vector.load %arg17[%314, %c0_74] : memref<64x32xf32, #tpu.memory_space<vmem>>, vector<8x32xf32>
    tpu.vector_store %arg17[%314, %c0_74], %311 {strides = array<i32>} : memref<64x32xf32, #tpu.memory_space<vmem>>, vector<8x32xf32>,
    %c6_i32 = arith.constant 6 : i32
    %c8_i32_75 = arith.constant 8 : i32
    %316 = arith.muli %c6_i32, %c8_i32_75 : i32
    %317 = tpu.assume_multiple %316, 8 : i32
    %c7_i32_76 = arith.constant 7 : i32
    %318 = arith.subi %c7_i32_76, %c6_i32 : i32
    %c8_i32_77 = arith.constant 8 : i32
    %319 = arith.muli %318, %c8_i32_77 : i32
    %320 = tpu.assume_multiple %319, 8 : i32
    %321 = arith.truncf %308 : vector<8x32xf32> to vector<8x32xbf16>
    %cst_78 = arith.constant dense<0.000000e+00> : vector<8x128xf32>
    %322 = tpu.matmul %321, %7, %cst_78 {dimension_numbers = #tpu.dot_dimension_numbers<[1], [0], [0], [1], [0, 0, 1, 1], [], []>} : vector<8x32xbf16>, vector<32x128xbf16>, vector<8x128xf32> -> vector<8x128xf32>
    %323 = arith.truncf %311 : vector<8x32xf32> to vector<8x32xbf16>
    %cst_79 = arith.constant dense<0.000000e+00> : vector<8x128xf32>
    %324 = tpu.matmul %323, %8, %cst_79 {dimension_numbers = #tpu.dot_dimension_numbers<[1], [0], [0], [1], [0, 0, 1, 1], [], []>} : vector<8x32xbf16>, vector<32x128xbf16>, vector<8x128xf32> -> vector<8x128xf32>
    %325 = arith.index_cast %317 : i32 to index
    %c0_80 = arith.constant 0 : index
    %326 = vector.load %arg15[%325, %c0_80] : memref<64x256xf32, #tpu.memory_space<vmem>>, vector<8x128xf32>
    %327 = arith.addf %326, %322 : vector<8x128xf32>
    %328 = arith.index_cast %320 : i32 to index
    %c128_81 = arith.constant 128 : index
    %329 = vector.load %arg15[%328, %c128_81] : memref<64x256xf32, #tpu.memory_space<vmem>>, vector<8x128xf32>
    %330 = arith.addf %329, %324 : vector<8x128xf32>
    %331 = vector.extract_strided_slice %327 {offsets = [0, 0], sizes = [8, 96], strides = [1, 1]} : vector<8x128xf32> to vector<8x96xf32>
    %332 = arith.negf %331 : vector<8x96xf32>
    %333 = math.exp %332 : vector<8x96xf32>
    %cst_82 = arith.constant 1.000000e+00 : f32
    %334 = vector.broadcast %cst_82 : f32 to vector<8x96xf32>
    %335 = arith.addf %334, %333 : vector<8x96xf32>
    %336 = arith.divf %334, %335 : vector<8x96xf32>
    %337 = vector.extract_strided_slice %327 {offsets = [0, 96], sizes = [8, 32], strides = [1, 1]} : vector<8x128xf32> to vector<8x32xf32>
    %338 = math.tanh %337 : vector<8x32xf32>
    %339 = vector.extract_strided_slice %330 {offsets = [0, 0], sizes = [8, 96], strides = [1, 1]} : vector<8x128xf32> to vector<8x96xf32>
    %340 = arith.negf %339 : vector<8x96xf32>
    %341 = math.exp %340 : vector<8x96xf32>
    %cst_83 = arith.constant 1.000000e+00 : f32
    %342 = vector.broadcast %cst_83 : f32 to vector<8x96xf32>
    %343 = arith.addf %342, %341 : vector<8x96xf32>
    %344 = arith.divf %342, %343 : vector<8x96xf32>
    %345 = vector.extract_strided_slice %330 {offsets = [0, 96], sizes = [8, 32], strides = [1, 1]} : vector<8x128xf32> to vector<8x32xf32>
    %346 = math.tanh %345 : vector<8x32xf32>
    %347 = vector.extract_strided_slice %336 {offsets = [0, 32], sizes = [8, 32], strides = [1, 1]} : vector<8x96xf32> to vector<8x32xf32>
    %348 = arith.mulf %347, %300 : vector<8x32xf32>
    %349 = vector.extract_strided_slice %336 {offsets = [0, 0], sizes = [8, 32], strides = [1, 1]} : vector<8x96xf32> to vector<8x32xf32>
    %350 = arith.mulf %349, %338 : vector<8x32xf32>
    %351 = arith.addf %348, %350 : vector<8x32xf32>
    %352 = vector.extract_strided_slice %344 {offsets = [0, 32], sizes = [8, 32], strides = [1, 1]} : vector<8x96xf32> to vector<8x32xf32>
    %353 = arith.mulf %352, %305 : vector<8x32xf32>
    %354 = vector.extract_strided_slice %344 {offsets = [0, 0], sizes = [8, 32], strides = [1, 1]} : vector<8x96xf32> to vector<8x32xf32>
    %355 = arith.mulf %354, %346 : vector<8x32xf32>
    %356 = arith.addf %353, %355 : vector<8x32xf32>
    %357 = vector.extract_strided_slice %336 {offsets = [0, 64], sizes = [8, 32], strides = [1, 1]} : vector<8x96xf32> to vector<8x32xf32>
    %358 = math.tanh %351 : vector<8x32xf32>
    %359 = arith.mulf %357, %358 : vector<8x32xf32>
    %360 = vector.extract_strided_slice %344 {offsets = [0, 64], sizes = [8, 32], strides = [1, 1]} : vector<8x96xf32> to vector<8x32xf32>
    %361 = math.tanh %356 : vector<8x32xf32>
    %362 = arith.mulf %360, %361 : vector<8x32xf32>
    %363 = arith.index_cast %317 : i32 to index
    %c0_84 = arith.constant 0 : index
    %364 = vector.load %arg16[%363, %c0_84] : memref<64x32xf32, #tpu.memory_space<vmem>>, vector<8x32xf32>
    tpu.vector_store %arg16[%363, %c0_84], %359 {strides = array<i32>} : memref<64x32xf32, #tpu.memory_space<vmem>>, vector<8x32xf32>,
    %365 = arith.index_cast %320 : i32 to index
    %c0_85 = arith.constant 0 : index
    %366 = vector.load %arg17[%365, %c0_85] : memref<64x32xf32, #tpu.memory_space<vmem>>, vector<8x32xf32>
    tpu.vector_store %arg17[%365, %c0_85], %362 {strides = array<i32>} : memref<64x32xf32, #tpu.memory_space<vmem>>, vector<8x32xf32>,
    %c7_i32_86 = arith.constant 7 : i32
    %c8_i32_87 = arith.constant 8 : i32
    %367 = arith.muli %c7_i32_86, %c8_i32_87 : i32
    %368 = tpu.assume_multiple %367, 8 : i32
    %c7_i32_88 = arith.constant 7 : i32
    %369 = arith.subi %c7_i32_88, %c7_i32_86 : i32
    %c8_i32_89 = arith.constant 8 : i32
    %370 = arith.muli %369, %c8_i32_89 : i32
    %371 = tpu.assume_multiple %370, 8 : i32
    %372 = arith.truncf %359 : vector<8x32xf32> to vector<8x32xbf16>
    %cst_90 = arith.constant dense<0.000000e+00> : vector<8x128xf32>
    %373 = tpu.matmul %372, %7, %cst_90 {dimension_numbers = #tpu.dot_dimension_numbers<[1], [0], [0], [1], [0, 0, 1, 1], [], []>} : vector<8x32xbf16>, vector<32x128xbf16>, vector<8x128xf32> -> vector<8x128xf32>
    %374 = arith.truncf %362 : vector<8x32xf32> to vector<8x32xbf16>
    %cst_91 = arith.constant dense<0.000000e+00> : vector<8x128xf32>
    %375 = tpu.matmul %374, %8, %cst_91 {dimension_numbers = #tpu.dot_dimension_numbers<[1], [0], [0], [1], [0, 0, 1, 1], [], []>} : vector<8x32xbf16>, vector<32x128xbf16>, vector<8x128xf32> -> vector<8x128xf32>
    %376 = arith.index_cast %368 : i32 to index
    %c0_92 = arith.constant 0 : index
    %377 = vector.load %arg15[%376, %c0_92] : memref<64x256xf32, #tpu.memory_space<vmem>>, vector<8x128xf32>
    %378 = arith.addf %377, %373 : vector<8x128xf32>
    %379 = arith.index_cast %371 : i32 to index
    %c128_93 = arith.constant 128 : index
    %380 = vector.load %arg15[%379, %c128_93] : memref<64x256xf32, #tpu.memory_space<vmem>>, vector<8x128xf32>
    %381 = arith.addf %380, %375 : vector<8x128xf32>
    %382 = vector.extract_strided_slice %378 {offsets = [0, 0], sizes = [8, 96], strides = [1, 1]} : vector<8x128xf32> to vector<8x96xf32>
    %383 = arith.negf %382 : vector<8x96xf32>
    %384 = math.exp %383 : vector<8x96xf32>
    %cst_94 = arith.constant 1.000000e+00 : f32
    %385 = vector.broadcast %cst_94 : f32 to vector<8x96xf32>
    %386 = arith.addf %385, %384 : vector<8x96xf32>
    %387 = arith.divf %385, %386 : vector<8x96xf32>
    %388 = vector.extract_strided_slice %378 {offsets = [0, 96], sizes = [8, 32], strides = [1, 1]} : vector<8x128xf32> to vector<8x32xf32>
    %389 = math.tanh %388 : vector<8x32xf32>
    %390 = vector.extract_strided_slice %381 {offsets = [0, 0], sizes = [8, 96], strides = [1, 1]} : vector<8x128xf32> to vector<8x96xf32>
    %391 = arith.negf %390 : vector<8x96xf32>
    %392 = math.exp %391 : vector<8x96xf32>
    %cst_95 = arith.constant 1.000000e+00 : f32
    %393 = vector.broadcast %cst_95 : f32 to vector<8x96xf32>
    %394 = arith.addf %393, %392 : vector<8x96xf32>
    %395 = arith.divf %393, %394 : vector<8x96xf32>
    %396 = vector.extract_strided_slice %381 {offsets = [0, 96], sizes = [8, 32], strides = [1, 1]} : vector<8x128xf32> to vector<8x32xf32>
    %397 = math.tanh %396 : vector<8x32xf32>
    %398 = vector.extract_strided_slice %387 {offsets = [0, 32], sizes = [8, 32], strides = [1, 1]} : vector<8x96xf32> to vector<8x32xf32>
    %399 = arith.mulf %398, %351 : vector<8x32xf32>
    %400 = vector.extract_strided_slice %387 {offsets = [0, 0], sizes = [8, 32], strides = [1, 1]} : vector<8x96xf32> to vector<8x32xf32>
    %401 = arith.mulf %400, %389 : vector<8x32xf32>
    %402 = arith.addf %399, %401 : vector<8x32xf32>
    %403 = vector.extract_strided_slice %395 {offsets = [0, 32], sizes = [8, 32], strides = [1, 1]} : vector<8x96xf32> to vector<8x32xf32>
    %404 = arith.mulf %403, %356 : vector<8x32xf32>
    %405 = vector.extract_strided_slice %395 {offsets = [0, 0], sizes = [8, 32], strides = [1, 1]} : vector<8x96xf32> to vector<8x32xf32>
    %406 = arith.mulf %405, %397 : vector<8x32xf32>
    %407 = arith.addf %404, %406 : vector<8x32xf32>
    %408 = vector.extract_strided_slice %387 {offsets = [0, 64], sizes = [8, 32], strides = [1, 1]} : vector<8x96xf32> to vector<8x32xf32>
    %409 = math.tanh %402 : vector<8x32xf32>
    %410 = arith.mulf %408, %409 : vector<8x32xf32>
    %411 = vector.extract_strided_slice %395 {offsets = [0, 64], sizes = [8, 32], strides = [1, 1]} : vector<8x96xf32> to vector<8x32xf32>
    %412 = math.tanh %407 : vector<8x32xf32>
    %413 = arith.mulf %411, %412 : vector<8x32xf32>
    %414 = arith.index_cast %368 : i32 to index
    %c0_96 = arith.constant 0 : index
    %415 = vector.load %arg16[%414, %c0_96] : memref<64x32xf32, #tpu.memory_space<vmem>>, vector<8x32xf32>
    tpu.vector_store %arg16[%414, %c0_96], %410 {strides = array<i32>} : memref<64x32xf32, #tpu.memory_space<vmem>>, vector<8x32xf32>,
    %416 = arith.index_cast %371 : i32 to index
    %c0_97 = arith.constant 0 : index
    %417 = vector.load %arg17[%416, %c0_97] : memref<64x32xf32, #tpu.memory_space<vmem>>, vector<8x32xf32>
    tpu.vector_store %arg17[%416, %c0_97], %413 {strides = array<i32>} : memref<64x32xf32, #tpu.memory_space<vmem>>, vector<8x32xf32>,
    %c8_i32_98 = arith.constant 8 : i32
    %c0_99 = arith.constant 0 : index
    %c0_100 = arith.constant 0 : index
    %418 = vector.load %arg16[%c0_99, %c0_100] : memref<64x32xf32, #tpu.memory_space<vmem>>, vector<64x32xf32>
    %419 = arith.truncf %418 : vector<64x32xf32> to vector<64x32xbf16>
    %c0_101 = arith.constant 0 : index
    %c0_102 = arith.constant 0 : index
    %420 = vector.load %arg6[%c0_101, %c0_102] : memref<32x256xbf16, #tpu.memory_space<vmem>>, vector<32x256xbf16>
    %cst_103 = arith.constant dense<0.000000e+00> : vector<64x256xf32>
    %421 = tpu.matmul %419, %420, %cst_103 {dimension_numbers = #tpu.dot_dimension_numbers<[1], [0], [0], [1], [0, 0, 1, 1], [], []>} : vector<64x32xbf16>, vector<32x256xbf16>, vector<64x256xf32> -> vector<64x256xf32>
    %c0_104 = arith.constant 0 : index
    %c0_105 = arith.constant 0 : index
    %422 = vector.load %arg17[%c0_104, %c0_105] : memref<64x32xf32, #tpu.memory_space<vmem>>, vector<64x32xf32>
    %423 = arith.truncf %422 : vector<64x32xf32> to vector<64x32xbf16>
    %c0_106 = arith.constant 0 : index
    %c0_107 = arith.constant 0 : index
    %424 = vector.load %arg7[%c0_106, %c0_107] : memref<32x256xbf16, #tpu.memory_space<vmem>>, vector<32x256xbf16>
    %cst_108 = arith.constant dense<0.000000e+00> : vector<64x256xf32>
    %425 = tpu.matmul %423, %424, %cst_108 {dimension_numbers = #tpu.dot_dimension_numbers<[1], [0], [0], [1], [0, 0, 1, 1], [], []>} : vector<64x32xbf16>, vector<32x256xbf16>, vector<64x256xf32> -> vector<64x256xf32>
    %426 = arith.addf %421, %425 : vector<64x256xf32>
    %c0_109 = arith.constant 0 : index
    %c0_110 = arith.constant 0 : index
    %427 = vector.load %arg8[%c0_109, %c0_110] : memref<1x256xf32, #tpu.memory_space<vmem>>, vector<1x256xf32>
    %428 = vector.broadcast %427 : vector<1x256xf32> to vector<64x256xf32>
    %429 = arith.addf %426, %428 : vector<64x256xf32>
    %c0_111 = arith.constant 0 : index
    %c0_112 = arith.constant 0 : index
    %430 = vector.load %arg15[%c0_111, %c0_112] : memref<64x256xf32, #tpu.memory_space<vmem>>, vector<64x256xf32>
    tpu.vector_store %arg15[%c0_111, %c0_112], %429 {strides = array<i32>} : memref<64x256xf32, #tpu.memory_space<vmem>>, vector<64x256xf32>,
    %c0_113 = arith.constant 0 : index
    %c0_114 = arith.constant 0 : index
    %431 = vector.load %arg9[%c0_113, %c0_114] : memref<32x128xbf16, #tpu.memory_space<vmem>>, vector<32x128xbf16>
    %c0_115 = arith.constant 0 : index
    %c0_116 = arith.constant 0 : index
    %432 = vector.load %arg10[%c0_115, %c0_116] : memref<32x128xbf16, #tpu.memory_space<vmem>>, vector<32x128xbf16>
    %cst_117 = arith.constant 0.000000e+00 : f32
    %433 = vector.broadcast %cst_117 : f32 to vector<8x32xf32>
    %c0_i32_118 = arith.constant 0 : i32
    %c8_i32_119 = arith.constant 8 : i32
    %434 = arith.muli %c0_i32_118, %c8_i32_119 : i32
    %435 = tpu.assume_multiple %434, 8 : i32
    %c7_i32_120 = arith.constant 7 : i32
    %436 = arith.subi %c7_i32_120, %c0_i32_118 : i32
    %c8_i32_121 = arith.constant 8 : i32
    %437 = arith.muli %436, %c8_i32_121 : i32
    %438 = tpu.assume_multiple %437, 8 : i32
    %439 = arith.truncf %433 : vector<8x32xf32> to vector<8x32xbf16>
    %cst_122 = arith.constant dense<0.000000e+00> : vector<8x128xf32>
    %440 = tpu.matmul %439, %431, %cst_122 {dimension_numbers = #tpu.dot_dimension_numbers<[1], [0], [0], [1], [0, 0, 1, 1], [], []>} : vector<8x32xbf16>, vector<32x128xbf16>, vector<8x128xf32> -> vector<8x128xf32>
    %441 = arith.truncf %433 : vector<8x32xf32> to vector<8x32xbf16>
    %cst_123 = arith.constant dense<0.000000e+00> : vector<8x128xf32>
    %442 = tpu.matmul %441, %432, %cst_123 {dimension_numbers = #tpu.dot_dimension_numbers<[1], [0], [0], [1], [0, 0, 1, 1], [], []>} : vector<8x32xbf16>, vector<32x128xbf16>, vector<8x128xf32> -> vector<8x128xf32>
    %443 = arith.index_cast %435 : i32 to index
    %c0_124 = arith.constant 0 : index
    %444 = vector.load %arg15[%443, %c0_124] : memref<64x256xf32, #tpu.memory_space<vmem>>, vector<8x128xf32>
    %445 = arith.addf %444, %440 : vector<8x128xf32>
    %446 = arith.index_cast %438 : i32 to index
    %c128_125 = arith.constant 128 : index
    %447 = vector.load %arg15[%446, %c128_125] : memref<64x256xf32, #tpu.memory_space<vmem>>, vector<8x128xf32>
    %448 = arith.addf %447, %442 : vector<8x128xf32>
    %449 = vector.extract_strided_slice %445 {offsets = [0, 0], sizes = [8, 96], strides = [1, 1]} : vector<8x128xf32> to vector<8x96xf32>
    %450 = arith.negf %449 : vector<8x96xf32>
    %451 = math.exp %450 : vector<8x96xf32>
    %cst_126 = arith.constant 1.000000e+00 : f32
    %452 = vector.broadcast %cst_126 : f32 to vector<8x96xf32>
    %453 = arith.addf %452, %451 : vector<8x96xf32>
    %454 = arith.divf %452, %453 : vector<8x96xf32>
    %455 = vector.extract_strided_slice %445 {offsets = [0, 96], sizes = [8, 32], strides = [1, 1]} : vector<8x128xf32> to vector<8x32xf32>
    %456 = math.tanh %455 : vector<8x32xf32>
    %457 = vector.extract_strided_slice %448 {offsets = [0, 0], sizes = [8, 96], strides = [1, 1]} : vector<8x128xf32> to vector<8x96xf32>
    %458 = arith.negf %457 : vector<8x96xf32>
    %459 = math.exp %458 : vector<8x96xf32>
    %cst_127 = arith.constant 1.000000e+00 : f32
    %460 = vector.broadcast %cst_127 : f32 to vector<8x96xf32>
    %461 = arith.addf %460, %459 : vector<8x96xf32>
    %462 = arith.divf %460, %461 : vector<8x96xf32>
    %463 = vector.extract_strided_slice %448 {offsets = [0, 96], sizes = [8, 32], strides = [1, 1]} : vector<8x128xf32> to vector<8x32xf32>
    %464 = math.tanh %463 : vector<8x32xf32>
    %465 = vector.extract_strided_slice %454 {offsets = [0, 32], sizes = [8, 32], strides = [1, 1]} : vector<8x96xf32> to vector<8x32xf32>
    %466 = arith.mulf %465, %433 : vector<8x32xf32>
    %467 = vector.extract_strided_slice %454 {offsets = [0, 0], sizes = [8, 32], strides = [1, 1]} : vector<8x96xf32> to vector<8x32xf32>
    %468 = arith.mulf %467, %456 : vector<8x32xf32>
    %469 = arith.addf %466, %468 : vector<8x32xf32>
    %470 = vector.extract_strided_slice %462 {offsets = [0, 32], sizes = [8, 32], strides = [1, 1]} : vector<8x96xf32> to vector<8x32xf32>
    %471 = arith.mulf %470, %433 : vector<8x32xf32>
    %472 = vector.extract_strided_slice %462 {offsets = [0, 0], sizes = [8, 32], strides = [1, 1]} : vector<8x96xf32> to vector<8x32xf32>
    %473 = arith.mulf %472, %464 : vector<8x32xf32>
    %474 = arith.addf %471, %473 : vector<8x32xf32>
    %475 = vector.extract_strided_slice %454 {offsets = [0, 64], sizes = [8, 32], strides = [1, 1]} : vector<8x96xf32> to vector<8x32xf32>
    %476 = math.tanh %469 : vector<8x32xf32>
    %477 = arith.mulf %475, %476 : vector<8x32xf32>
    %478 = vector.extract_strided_slice %462 {offsets = [0, 64], sizes = [8, 32], strides = [1, 1]} : vector<8x96xf32> to vector<8x32xf32>
    %479 = math.tanh %474 : vector<8x32xf32>
    %480 = arith.mulf %478, %479 : vector<8x32xf32>
    %c0_i32_128 = arith.constant 0 : i32
    %481 = arith.cmpi eq, %c0_i32_118, %c0_i32_128 : i32
    %482 = arith.select %481, %480, %433 : vector<8x32xf32>
    %c1_i32_129 = arith.constant 1 : i32
    %c8_i32_130 = arith.constant 8 : i32
    %483 = arith.muli %c1_i32_129, %c8_i32_130 : i32
    %484 = tpu.assume_multiple %483, 8 : i32
    %c7_i32_131 = arith.constant 7 : i32
    %485 = arith.subi %c7_i32_131, %c1_i32_129 : i32
    %c8_i32_132 = arith.constant 8 : i32
    %486 = arith.muli %485, %c8_i32_132 : i32
    %487 = tpu.assume_multiple %486, 8 : i32
    %488 = arith.truncf %477 : vector<8x32xf32> to vector<8x32xbf16>
    %cst_133 = arith.constant dense<0.000000e+00> : vector<8x128xf32>
    %489 = tpu.matmul %488, %431, %cst_133 {dimension_numbers = #tpu.dot_dimension_numbers<[1], [0], [0], [1], [0, 0, 1, 1], [], []>} : vector<8x32xbf16>, vector<32x128xbf16>, vector<8x128xf32> -> vector<8x128xf32>
    %490 = arith.truncf %480 : vector<8x32xf32> to vector<8x32xbf16>
    %cst_134 = arith.constant dense<0.000000e+00> : vector<8x128xf32>
    %491 = tpu.matmul %490, %432, %cst_134 {dimension_numbers = #tpu.dot_dimension_numbers<[1], [0], [0], [1], [0, 0, 1, 1], [], []>} : vector<8x32xbf16>, vector<32x128xbf16>, vector<8x128xf32> -> vector<8x128xf32>
    %492 = arith.index_cast %484 : i32 to index
    %c0_135 = arith.constant 0 : index
    %493 = vector.load %arg15[%492, %c0_135] : memref<64x256xf32, #tpu.memory_space<vmem>>, vector<8x128xf32>
    %494 = arith.addf %493, %489 : vector<8x128xf32>
    %495 = arith.index_cast %487 : i32 to index
    %c128_136 = arith.constant 128 : index
    %496 = vector.load %arg15[%495, %c128_136] : memref<64x256xf32, #tpu.memory_space<vmem>>, vector<8x128xf32>
    %497 = arith.addf %496, %491 : vector<8x128xf32>
    %498 = vector.extract_strided_slice %494 {offsets = [0, 0], sizes = [8, 96], strides = [1, 1]} : vector<8x128xf32> to vector<8x96xf32>
    %499 = arith.negf %498 : vector<8x96xf32>
    %500 = math.exp %499 : vector<8x96xf32>
    %cst_137 = arith.constant 1.000000e+00 : f32
    %501 = vector.broadcast %cst_137 : f32 to vector<8x96xf32>
    %502 = arith.addf %501, %500 : vector<8x96xf32>
    %503 = arith.divf %501, %502 : vector<8x96xf32>
    %504 = vector.extract_strided_slice %494 {offsets = [0, 96], sizes = [8, 32], strides = [1, 1]} : vector<8x128xf32> to vector<8x32xf32>
    %505 = math.tanh %504 : vector<8x32xf32>
    %506 = vector.extract_strided_slice %497 {offsets = [0, 0], sizes = [8, 96], strides = [1, 1]} : vector<8x128xf32> to vector<8x96xf32>
    %507 = arith.negf %506 : vector<8x96xf32>
    %508 = math.exp %507 : vector<8x96xf32>
    %cst_138 = arith.constant 1.000000e+00 : f32
    %509 = vector.broadcast %cst_138 : f32 to vector<8x96xf32>
    %510 = arith.addf %509, %508 : vector<8x96xf32>
    %511 = arith.divf %509, %510 : vector<8x96xf32>
    %512 = vector.extract_strided_slice %497 {offsets = [0, 96], sizes = [8, 32], strides = [1, 1]} : vector<8x128xf32> to vector<8x32xf32>
    %513 = math.tanh %512 : vector<8x32xf32>
    %514 = vector.extract_strided_slice %503 {offsets = [0, 32], sizes = [8, 32], strides = [1, 1]} : vector<8x96xf32> to vector<8x32xf32>
    %515 = arith.mulf %514, %469 : vector<8x32xf32>
    %516 = vector.extract_strided_slice %503 {offsets = [0, 0], sizes = [8, 32], strides = [1, 1]} : vector<8x96xf32> to vector<8x32xf32>
    %517 = arith.mulf %516, %505 : vector<8x32xf32>
    %518 = arith.addf %515, %517 : vector<8x32xf32>
    %519 = vector.extract_strided_slice %511 {offsets = [0, 32], sizes = [8, 32], strides = [1, 1]} : vector<8x96xf32> to vector<8x32xf32>
    %520 = arith.mulf %519, %474 : vector<8x32xf32>
    %521 = vector.extract_strided_slice %511 {offsets = [0, 0], sizes = [8, 32], strides = [1, 1]} : vector<8x96xf32> to vector<8x32xf32>
    %522 = arith.mulf %521, %513 : vector<8x32xf32>
    %523 = arith.addf %520, %522 : vector<8x32xf32>
    %524 = vector.extract_strided_slice %503 {offsets = [0, 64], sizes = [8, 32], strides = [1, 1]} : vector<8x96xf32> to vector<8x32xf32>
    %525 = math.tanh %518 : vector<8x32xf32>
    %526 = arith.mulf %524, %525 : vector<8x32xf32>
    %527 = vector.extract_strided_slice %511 {offsets = [0, 64], sizes = [8, 32], strides = [1, 1]} : vector<8x96xf32> to vector<8x32xf32>
    %528 = math.tanh %523 : vector<8x32xf32>
    %529 = arith.mulf %527, %528 : vector<8x32xf32>
    %c0_i32_139 = arith.constant 0 : i32
    %530 = arith.cmpi eq, %c1_i32_129, %c0_i32_139 : i32
    %531 = arith.select %530, %529, %482 : vector<8x32xf32>
    %c2_i32_140 = arith.constant 2 : i32
    %c8_i32_141 = arith.constant 8 : i32
    %532 = arith.muli %c2_i32_140, %c8_i32_141 : i32
    %533 = tpu.assume_multiple %532, 8 : i32
    %c7_i32_142 = arith.constant 7 : i32
    %534 = arith.subi %c7_i32_142, %c2_i32_140 : i32
    %c8_i32_143 = arith.constant 8 : i32
    %535 = arith.muli %534, %c8_i32_143 : i32
    %536 = tpu.assume_multiple %535, 8 : i32
    %537 = arith.truncf %526 : vector<8x32xf32> to vector<8x32xbf16>
    %cst_144 = arith.constant dense<0.000000e+00> : vector<8x128xf32>
    %538 = tpu.matmul %537, %431, %cst_144 {dimension_numbers = #tpu.dot_dimension_numbers<[1], [0], [0], [1], [0, 0, 1, 1], [], []>} : vector<8x32xbf16>, vector<32x128xbf16>, vector<8x128xf32> -> vector<8x128xf32>
    %539 = arith.truncf %529 : vector<8x32xf32> to vector<8x32xbf16>
    %cst_145 = arith.constant dense<0.000000e+00> : vector<8x128xf32>
    %540 = tpu.matmul %539, %432, %cst_145 {dimension_numbers = #tpu.dot_dimension_numbers<[1], [0], [0], [1], [0, 0, 1, 1], [], []>} : vector<8x32xbf16>, vector<32x128xbf16>, vector<8x128xf32> -> vector<8x128xf32>
    %541 = arith.index_cast %533 : i32 to index
    %c0_146 = arith.constant 0 : index
    %542 = vector.load %arg15[%541, %c0_146] : memref<64x256xf32, #tpu.memory_space<vmem>>, vector<8x128xf32>
    %543 = arith.addf %542, %538 : vector<8x128xf32>
    %544 = arith.index_cast %536 : i32 to index
    %c128_147 = arith.constant 128 : index
    %545 = vector.load %arg15[%544, %c128_147] : memref<64x256xf32, #tpu.memory_space<vmem>>, vector<8x128xf32>
    %546 = arith.addf %545, %540 : vector<8x128xf32>
    %547 = vector.extract_strided_slice %543 {offsets = [0, 0], sizes = [8, 96], strides = [1, 1]} : vector<8x128xf32> to vector<8x96xf32>
    %548 = arith.negf %547 : vector<8x96xf32>
    %549 = math.exp %548 : vector<8x96xf32>
    %cst_148 = arith.constant 1.000000e+00 : f32
    %550 = vector.broadcast %cst_148 : f32 to vector<8x96xf32>
    %551 = arith.addf %550, %549 : vector<8x96xf32>
    %552 = arith.divf %550, %551 : vector<8x96xf32>
    %553 = vector.extract_strided_slice %543 {offsets = [0, 96], sizes = [8, 32], strides = [1, 1]} : vector<8x128xf32> to vector<8x32xf32>
    %554 = math.tanh %553 : vector<8x32xf32>
    %555 = vector.extract_strided_slice %546 {offsets = [0, 0], sizes = [8, 96], strides = [1, 1]} : vector<8x128xf32> to vector<8x96xf32>
    %556 = arith.negf %555 : vector<8x96xf32>
    %557 = math.exp %556 : vector<8x96xf32>
    %cst_149 = arith.constant 1.000000e+00 : f32
    %558 = vector.broadcast %cst_149 : f32 to vector<8x96xf32>
    %559 = arith.addf %558, %557 : vector<8x96xf32>
    %560 = arith.divf %558, %559 : vector<8x96xf32>
    %561 = vector.extract_strided_slice %546 {offsets = [0, 96], sizes = [8, 32], strides = [1, 1]} : vector<8x128xf32> to vector<8x32xf32>
    %562 = math.tanh %561 : vector<8x32xf32>
    %563 = vector.extract_strided_slice %552 {offsets = [0, 32], sizes = [8, 32], strides = [1, 1]} : vector<8x96xf32> to vector<8x32xf32>
    %564 = arith.mulf %563, %518 : vector<8x32xf32>
    %565 = vector.extract_strided_slice %552 {offsets = [0, 0], sizes = [8, 32], strides = [1, 1]} : vector<8x96xf32> to vector<8x32xf32>
    %566 = arith.mulf %565, %554 : vector<8x32xf32>
    %567 = arith.addf %564, %566 : vector<8x32xf32>
    %568 = vector.extract_strided_slice %560 {offsets = [0, 32], sizes = [8, 32], strides = [1, 1]} : vector<8x96xf32> to vector<8x32xf32>
    %569 = arith.mulf %568, %523 : vector<8x32xf32>
    %570 = vector.extract_strided_slice %560 {offsets = [0, 0], sizes = [8, 32], strides = [1, 1]} : vector<8x96xf32> to vector<8x32xf32>
    %571 = arith.mulf %570, %562 : vector<8x32xf32>
    %572 = arith.addf %569, %571 : vector<8x32xf32>
    %573 = vector.extract_strided_slice %552 {offsets = [0, 64], sizes = [8, 32], strides = [1, 1]} : vector<8x96xf32> to vector<8x32xf32>
    %574 = math.tanh %567 : vector<8x32xf32>
    %575 = arith.mulf %573, %574 : vector<8x32xf32>
    %576 = vector.extract_strided_slice %560 {offsets = [0, 64], sizes = [8, 32], strides = [1, 1]} : vector<8x96xf32> to vector<8x32xf32>
    %577 = math.tanh %572 : vector<8x32xf32>
    %578 = arith.mulf %576, %577 : vector<8x32xf32>
    %c0_i32_150 = arith.constant 0 : i32
    %579 = arith.cmpi eq, %c2_i32_140, %c0_i32_150 : i32
    %580 = arith.select %579, %578, %531 : vector<8x32xf32>
    %c3_i32_151 = arith.constant 3 : i32
    %c8_i32_152 = arith.constant 8 : i32
    %581 = arith.muli %c3_i32_151, %c8_i32_152 : i32
    %582 = tpu.assume_multiple %581, 8 : i32
    %c7_i32_153 = arith.constant 7 : i32
    %583 = arith.subi %c7_i32_153, %c3_i32_151 : i32
    %c8_i32_154 = arith.constant 8 : i32
    %584 = arith.muli %583, %c8_i32_154 : i32
    %585 = tpu.assume_multiple %584, 8 : i32
    %586 = arith.truncf %575 : vector<8x32xf32> to vector<8x32xbf16>
    %cst_155 = arith.constant dense<0.000000e+00> : vector<8x128xf32>
    %587 = tpu.matmul %586, %431, %cst_155 {dimension_numbers = #tpu.dot_dimension_numbers<[1], [0], [0], [1], [0, 0, 1, 1], [], []>} : vector<8x32xbf16>, vector<32x128xbf16>, vector<8x128xf32> -> vector<8x128xf32>
    %588 = arith.truncf %578 : vector<8x32xf32> to vector<8x32xbf16>
    %cst_156 = arith.constant dense<0.000000e+00> : vector<8x128xf32>
    %589 = tpu.matmul %588, %432, %cst_156 {dimension_numbers = #tpu.dot_dimension_numbers<[1], [0], [0], [1], [0, 0, 1, 1], [], []>} : vector<8x32xbf16>, vector<32x128xbf16>, vector<8x128xf32> -> vector<8x128xf32>
    %590 = arith.index_cast %582 : i32 to index
    %c0_157 = arith.constant 0 : index
    %591 = vector.load %arg15[%590, %c0_157] : memref<64x256xf32, #tpu.memory_space<vmem>>, vector<8x128xf32>
    %592 = arith.addf %591, %587 : vector<8x128xf32>
    %593 = arith.index_cast %585 : i32 to index
    %c128_158 = arith.constant 128 : index
    %594 = vector.load %arg15[%593, %c128_158] : memref<64x256xf32, #tpu.memory_space<vmem>>, vector<8x128xf32>
    %595 = arith.addf %594, %589 : vector<8x128xf32>
    %596 = vector.extract_strided_slice %592 {offsets = [0, 0], sizes = [8, 96], strides = [1, 1]} : vector<8x128xf32> to vector<8x96xf32>
    %597 = arith.negf %596 : vector<8x96xf32>
    %598 = math.exp %597 : vector<8x96xf32>
    %cst_159 = arith.constant 1.000000e+00 : f32
    %599 = vector.broadcast %cst_159 : f32 to vector<8x96xf32>
    %600 = arith.addf %599, %598 : vector<8x96xf32>
    %601 = arith.divf %599, %600 : vector<8x96xf32>
    %602 = vector.extract_strided_slice %592 {offsets = [0, 96], sizes = [8, 32], strides = [1, 1]} : vector<8x128xf32> to vector<8x32xf32>
    %603 = math.tanh %602 : vector<8x32xf32>
    %604 = vector.extract_strided_slice %595 {offsets = [0, 0], sizes = [8, 96], strides = [1, 1]} : vector<8x128xf32> to vector<8x96xf32>
    %605 = arith.negf %604 : vector<8x96xf32>
    %606 = math.exp %605 : vector<8x96xf32>
    %cst_160 = arith.constant 1.000000e+00 : f32
    %607 = vector.broadcast %cst_160 : f32 to vector<8x96xf32>
    %608 = arith.addf %607, %606 : vector<8x96xf32>
    %609 = arith.divf %607, %608 : vector<8x96xf32>
    %610 = vector.extract_strided_slice %595 {offsets = [0, 96], sizes = [8, 32], strides = [1, 1]} : vector<8x128xf32> to vector<8x32xf32>
    %611 = math.tanh %610 : vector<8x32xf32>
    %612 = vector.extract_strided_slice %601 {offsets = [0, 32], sizes = [8, 32], strides = [1, 1]} : vector<8x96xf32> to vector<8x32xf32>
    %613 = arith.mulf %612, %567 : vector<8x32xf32>
    %614 = vector.extract_strided_slice %601 {offsets = [0, 0], sizes = [8, 32], strides = [1, 1]} : vector<8x96xf32> to vector<8x32xf32>
    %615 = arith.mulf %614, %603 : vector<8x32xf32>
    %616 = arith.addf %613, %615 : vector<8x32xf32>
    %617 = vector.extract_strided_slice %609 {offsets = [0, 32], sizes = [8, 32], strides = [1, 1]} : vector<8x96xf32> to vector<8x32xf32>
    %618 = arith.mulf %617, %572 : vector<8x32xf32>
    %619 = vector.extract_strided_slice %609 {offsets = [0, 0], sizes = [8, 32], strides = [1, 1]} : vector<8x96xf32> to vector<8x32xf32>
    %620 = arith.mulf %619, %611 : vector<8x32xf32>
    %621 = arith.addf %618, %620 : vector<8x32xf32>
    %622 = vector.extract_strided_slice %601 {offsets = [0, 64], sizes = [8, 32], strides = [1, 1]} : vector<8x96xf32> to vector<8x32xf32>
    %623 = math.tanh %616 : vector<8x32xf32>
    %624 = arith.mulf %622, %623 : vector<8x32xf32>
    %625 = vector.extract_strided_slice %609 {offsets = [0, 64], sizes = [8, 32], strides = [1, 1]} : vector<8x96xf32> to vector<8x32xf32>
    %626 = math.tanh %621 : vector<8x32xf32>
    %627 = arith.mulf %625, %626 : vector<8x32xf32>
    %c0_i32_161 = arith.constant 0 : i32
    %628 = arith.cmpi eq, %c3_i32_151, %c0_i32_161 : i32
    %629 = arith.select %628, %627, %580 : vector<8x32xf32>
    %c4_i32_162 = arith.constant 4 : i32
    %c8_i32_163 = arith.constant 8 : i32
    %630 = arith.muli %c4_i32_162, %c8_i32_163 : i32
    %631 = tpu.assume_multiple %630, 8 : i32
    %c7_i32_164 = arith.constant 7 : i32
    %632 = arith.subi %c7_i32_164, %c4_i32_162 : i32
    %c8_i32_165 = arith.constant 8 : i32
    %633 = arith.muli %632, %c8_i32_165 : i32
    %634 = tpu.assume_multiple %633, 8 : i32
    %635 = arith.truncf %624 : vector<8x32xf32> to vector<8x32xbf16>
    %cst_166 = arith.constant dense<0.000000e+00> : vector<8x128xf32>
    %636 = tpu.matmul %635, %431, %cst_166 {dimension_numbers = #tpu.dot_dimension_numbers<[1], [0], [0], [1], [0, 0, 1, 1], [], []>} : vector<8x32xbf16>, vector<32x128xbf16>, vector<8x128xf32> -> vector<8x128xf32>
    %637 = arith.truncf %627 : vector<8x32xf32> to vector<8x32xbf16>
    %cst_167 = arith.constant dense<0.000000e+00> : vector<8x128xf32>
    %638 = tpu.matmul %637, %432, %cst_167 {dimension_numbers = #tpu.dot_dimension_numbers<[1], [0], [0], [1], [0, 0, 1, 1], [], []>} : vector<8x32xbf16>, vector<32x128xbf16>, vector<8x128xf32> -> vector<8x128xf32>
    %639 = arith.index_cast %631 : i32 to index
    %c0_168 = arith.constant 0 : index
    %640 = vector.load %arg15[%639, %c0_168] : memref<64x256xf32, #tpu.memory_space<vmem>>, vector<8x128xf32>
    %641 = arith.addf %640, %636 : vector<8x128xf32>
    %642 = arith.index_cast %634 : i32 to index
    %c128_169 = arith.constant 128 : index
    %643 = vector.load %arg15[%642, %c128_169] : memref<64x256xf32, #tpu.memory_space<vmem>>, vector<8x128xf32>
    %644 = arith.addf %643, %638 : vector<8x128xf32>
    %645 = vector.extract_strided_slice %641 {offsets = [0, 0], sizes = [8, 96], strides = [1, 1]} : vector<8x128xf32> to vector<8x96xf32>
    %646 = arith.negf %645 : vector<8x96xf32>
    %647 = math.exp %646 : vector<8x96xf32>
    %cst_170 = arith.constant 1.000000e+00 : f32
    %648 = vector.broadcast %cst_170 : f32 to vector<8x96xf32>
    %649 = arith.addf %648, %647 : vector<8x96xf32>
    %650 = arith.divf %648, %649 : vector<8x96xf32>
    %651 = vector.extract_strided_slice %641 {offsets = [0, 96], sizes = [8, 32], strides = [1, 1]} : vector<8x128xf32> to vector<8x32xf32>
    %652 = math.tanh %651 : vector<8x32xf32>
    %653 = vector.extract_strided_slice %644 {offsets = [0, 0], sizes = [8, 96], strides = [1, 1]} : vector<8x128xf32> to vector<8x96xf32>
    %654 = arith.negf %653 : vector<8x96xf32>
    %655 = math.exp %654 : vector<8x96xf32>
    %cst_171 = arith.constant 1.000000e+00 : f32
    %656 = vector.broadcast %cst_171 : f32 to vector<8x96xf32>
    %657 = arith.addf %656, %655 : vector<8x96xf32>
    %658 = arith.divf %656, %657 : vector<8x96xf32>
    %659 = vector.extract_strided_slice %644 {offsets = [0, 96], sizes = [8, 32], strides = [1, 1]} : vector<8x128xf32> to vector<8x32xf32>
    %660 = math.tanh %659 : vector<8x32xf32>
    %661 = vector.extract_strided_slice %650 {offsets = [0, 32], sizes = [8, 32], strides = [1, 1]} : vector<8x96xf32> to vector<8x32xf32>
    %662 = arith.mulf %661, %616 : vector<8x32xf32>
    %663 = vector.extract_strided_slice %650 {offsets = [0, 0], sizes = [8, 32], strides = [1, 1]} : vector<8x96xf32> to vector<8x32xf32>
    %664 = arith.mulf %663, %652 : vector<8x32xf32>
    %665 = arith.addf %662, %664 : vector<8x32xf32>
    %666 = vector.extract_strided_slice %658 {offsets = [0, 32], sizes = [8, 32], strides = [1, 1]} : vector<8x96xf32> to vector<8x32xf32>
    %667 = arith.mulf %666, %621 : vector<8x32xf32>
    %668 = vector.extract_strided_slice %658 {offsets = [0, 0], sizes = [8, 32], strides = [1, 1]} : vector<8x96xf32> to vector<8x32xf32>
    %669 = arith.mulf %668, %660 : vector<8x32xf32>
    %670 = arith.addf %667, %669 : vector<8x32xf32>
    %671 = vector.extract_strided_slice %650 {offsets = [0, 64], sizes = [8, 32], strides = [1, 1]} : vector<8x96xf32> to vector<8x32xf32>
    %672 = math.tanh %665 : vector<8x32xf32>
    %673 = arith.mulf %671, %672 : vector<8x32xf32>
    %674 = vector.extract_strided_slice %658 {offsets = [0, 64], sizes = [8, 32], strides = [1, 1]} : vector<8x96xf32> to vector<8x32xf32>
    %675 = math.tanh %670 : vector<8x32xf32>
    %676 = arith.mulf %674, %675 : vector<8x32xf32>
    %c0_i32_172 = arith.constant 0 : i32
    %677 = arith.cmpi eq, %c4_i32_162, %c0_i32_172 : i32
    %678 = arith.select %677, %676, %629 : vector<8x32xf32>
    %c5_i32_173 = arith.constant 5 : i32
    %c8_i32_174 = arith.constant 8 : i32
    %679 = arith.muli %c5_i32_173, %c8_i32_174 : i32
    %680 = tpu.assume_multiple %679, 8 : i32
    %c7_i32_175 = arith.constant 7 : i32
    %681 = arith.subi %c7_i32_175, %c5_i32_173 : i32
    %c8_i32_176 = arith.constant 8 : i32
    %682 = arith.muli %681, %c8_i32_176 : i32
    %683 = tpu.assume_multiple %682, 8 : i32
    %684 = arith.truncf %673 : vector<8x32xf32> to vector<8x32xbf16>
    %cst_177 = arith.constant dense<0.000000e+00> : vector<8x128xf32>
    %685 = tpu.matmul %684, %431, %cst_177 {dimension_numbers = #tpu.dot_dimension_numbers<[1], [0], [0], [1], [0, 0, 1, 1], [], []>} : vector<8x32xbf16>, vector<32x128xbf16>, vector<8x128xf32> -> vector<8x128xf32>
    %686 = arith.truncf %676 : vector<8x32xf32> to vector<8x32xbf16>
    %cst_178 = arith.constant dense<0.000000e+00> : vector<8x128xf32>
    %687 = tpu.matmul %686, %432, %cst_178 {dimension_numbers = #tpu.dot_dimension_numbers<[1], [0], [0], [1], [0, 0, 1, 1], [], []>} : vector<8x32xbf16>, vector<32x128xbf16>, vector<8x128xf32> -> vector<8x128xf32>
    %688 = arith.index_cast %680 : i32 to index
    %c0_179 = arith.constant 0 : index
    %689 = vector.load %arg15[%688, %c0_179] : memref<64x256xf32, #tpu.memory_space<vmem>>, vector<8x128xf32>
    %690 = arith.addf %689, %685 : vector<8x128xf32>
    %691 = arith.index_cast %683 : i32 to index
    %c128_180 = arith.constant 128 : index
    %692 = vector.load %arg15[%691, %c128_180] : memref<64x256xf32, #tpu.memory_space<vmem>>, vector<8x128xf32>
    %693 = arith.addf %692, %687 : vector<8x128xf32>
    %694 = vector.extract_strided_slice %690 {offsets = [0, 0], sizes = [8, 96], strides = [1, 1]} : vector<8x128xf32> to vector<8x96xf32>
    %695 = arith.negf %694 : vector<8x96xf32>
    %696 = math.exp %695 : vector<8x96xf32>
    %cst_181 = arith.constant 1.000000e+00 : f32
    %697 = vector.broadcast %cst_181 : f32 to vector<8x96xf32>
    %698 = arith.addf %697, %696 : vector<8x96xf32>
    %699 = arith.divf %697, %698 : vector<8x96xf32>
    %700 = vector.extract_strided_slice %690 {offsets = [0, 96], sizes = [8, 32], strides = [1, 1]} : vector<8x128xf32> to vector<8x32xf32>
    %701 = math.tanh %700 : vector<8x32xf32>
    %702 = vector.extract_strided_slice %693 {offsets = [0, 0], sizes = [8, 96], strides = [1, 1]} : vector<8x128xf32> to vector<8x96xf32>
    %703 = arith.negf %702 : vector<8x96xf32>
    %704 = math.exp %703 : vector<8x96xf32>
    %cst_182 = arith.constant 1.000000e+00 : f32
    %705 = vector.broadcast %cst_182 : f32 to vector<8x96xf32>
    %706 = arith.addf %705, %704 : vector<8x96xf32>
    %707 = arith.divf %705, %706 : vector<8x96xf32>
    %708 = vector.extract_strided_slice %693 {offsets = [0, 96], sizes = [8, 32], strides = [1, 1]} : vector<8x128xf32> to vector<8x32xf32>
    %709 = math.tanh %708 : vector<8x32xf32>
    %710 = vector.extract_strided_slice %699 {offsets = [0, 32], sizes = [8, 32], strides = [1, 1]} : vector<8x96xf32> to vector<8x32xf32>
    %711 = arith.mulf %710, %665 : vector<8x32xf32>
    %712 = vector.extract_strided_slice %699 {offsets = [0, 0], sizes = [8, 32], strides = [1, 1]} : vector<8x96xf32> to vector<8x32xf32>
    %713 = arith.mulf %712, %701 : vector<8x32xf32>
    %714 = arith.addf %711, %713 : vector<8x32xf32>
    %715 = vector.extract_strided_slice %707 {offsets = [0, 32], sizes = [8, 32], strides = [1, 1]} : vector<8x96xf32> to vector<8x32xf32>
    %716 = arith.mulf %715, %670 : vector<8x32xf32>
    %717 = vector.extract_strided_slice %707 {offsets = [0, 0], sizes = [8, 32], strides = [1, 1]} : vector<8x96xf32> to vector<8x32xf32>
    %718 = arith.mulf %717, %709 : vector<8x32xf32>
    %719 = arith.addf %716, %718 : vector<8x32xf32>
    %720 = vector.extract_strided_slice %699 {offsets = [0, 64], sizes = [8, 32], strides = [1, 1]} : vector<8x96xf32> to vector<8x32xf32>
    %721 = math.tanh %714 : vector<8x32xf32>
    %722 = arith.mulf %720, %721 : vector<8x32xf32>
    %723 = vector.extract_strided_slice %707 {offsets = [0, 64], sizes = [8, 32], strides = [1, 1]} : vector<8x96xf32> to vector<8x32xf32>
    %724 = math.tanh %719 : vector<8x32xf32>
    %725 = arith.mulf %723, %724 : vector<8x32xf32>
    %c0_i32_183 = arith.constant 0 : i32
    %726 = arith.cmpi eq, %c5_i32_173, %c0_i32_183 : i32
    %727 = arith.select %726, %725, %678 : vector<8x32xf32>
    %c6_i32_184 = arith.constant 6 : i32
    %c8_i32_185 = arith.constant 8 : i32
    %728 = arith.muli %c6_i32_184, %c8_i32_185 : i32
    %729 = tpu.assume_multiple %728, 8 : i32
    %c7_i32_186 = arith.constant 7 : i32
    %730 = arith.subi %c7_i32_186, %c6_i32_184 : i32
    %c8_i32_187 = arith.constant 8 : i32
    %731 = arith.muli %730, %c8_i32_187 : i32
    %732 = tpu.assume_multiple %731, 8 : i32
    %733 = arith.truncf %722 : vector<8x32xf32> to vector<8x32xbf16>
    %cst_188 = arith.constant dense<0.000000e+00> : vector<8x128xf32>
    %734 = tpu.matmul %733, %431, %cst_188 {dimension_numbers = #tpu.dot_dimension_numbers<[1], [0], [0], [1], [0, 0, 1, 1], [], []>} : vector<8x32xbf16>, vector<32x128xbf16>, vector<8x128xf32> -> vector<8x128xf32>
    %735 = arith.truncf %725 : vector<8x32xf32> to vector<8x32xbf16>
    %cst_189 = arith.constant dense<0.000000e+00> : vector<8x128xf32>
    %736 = tpu.matmul %735, %432, %cst_189 {dimension_numbers = #tpu.dot_dimension_numbers<[1], [0], [0], [1], [0, 0, 1, 1], [], []>} : vector<8x32xbf16>, vector<32x128xbf16>, vector<8x128xf32> -> vector<8x128xf32>
    %737 = arith.index_cast %729 : i32 to index
    %c0_190 = arith.constant 0 : index
    %738 = vector.load %arg15[%737, %c0_190] : memref<64x256xf32, #tpu.memory_space<vmem>>, vector<8x128xf32>
    %739 = arith.addf %738, %734 : vector<8x128xf32>
    %740 = arith.index_cast %732 : i32 to index
    %c128_191 = arith.constant 128 : index
    %741 = vector.load %arg15[%740, %c128_191] : memref<64x256xf32, #tpu.memory_space<vmem>>, vector<8x128xf32>
    %742 = arith.addf %741, %736 : vector<8x128xf32>
    %743 = vector.extract_strided_slice %739 {offsets = [0, 0], sizes = [8, 96], strides = [1, 1]} : vector<8x128xf32> to vector<8x96xf32>
    %744 = arith.negf %743 : vector<8x96xf32>
    %745 = math.exp %744 : vector<8x96xf32>
    %cst_192 = arith.constant 1.000000e+00 : f32
    %746 = vector.broadcast %cst_192 : f32 to vector<8x96xf32>
    %747 = arith.addf %746, %745 : vector<8x96xf32>
    %748 = arith.divf %746, %747 : vector<8x96xf32>
    %749 = vector.extract_strided_slice %739 {offsets = [0, 96], sizes = [8, 32], strides = [1, 1]} : vector<8x128xf32> to vector<8x32xf32>
    %750 = math.tanh %749 : vector<8x32xf32>
    %751 = vector.extract_strided_slice %742 {offsets = [0, 0], sizes = [8, 96], strides = [1, 1]} : vector<8x128xf32> to vector<8x96xf32>
    %752 = arith.negf %751 : vector<8x96xf32>
    %753 = math.exp %752 : vector<8x96xf32>
    %cst_193 = arith.constant 1.000000e+00 : f32
    %754 = vector.broadcast %cst_193 : f32 to vector<8x96xf32>
    %755 = arith.addf %754, %753 : vector<8x96xf32>
    %756 = arith.divf %754, %755 : vector<8x96xf32>
    %757 = vector.extract_strided_slice %742 {offsets = [0, 96], sizes = [8, 32], strides = [1, 1]} : vector<8x128xf32> to vector<8x32xf32>
    %758 = math.tanh %757 : vector<8x32xf32>
    %759 = vector.extract_strided_slice %748 {offsets = [0, 32], sizes = [8, 32], strides = [1, 1]} : vector<8x96xf32> to vector<8x32xf32>
    %760 = arith.mulf %759, %714 : vector<8x32xf32>
    %761 = vector.extract_strided_slice %748 {offsets = [0, 0], sizes = [8, 32], strides = [1, 1]} : vector<8x96xf32> to vector<8x32xf32>
    %762 = arith.mulf %761, %750 : vector<8x32xf32>
    %763 = arith.addf %760, %762 : vector<8x32xf32>
    %764 = vector.extract_strided_slice %756 {offsets = [0, 32], sizes = [8, 32], strides = [1, 1]} : vector<8x96xf32> to vector<8x32xf32>
    %765 = arith.mulf %764, %719 : vector<8x32xf32>
    %766 = vector.extract_strided_slice %756 {offsets = [0, 0], sizes = [8, 32], strides = [1, 1]} : vector<8x96xf32> to vector<8x32xf32>
    %767 = arith.mulf %766, %758 : vector<8x32xf32>
    %768 = arith.addf %765, %767 : vector<8x32xf32>
    %769 = vector.extract_strided_slice %748 {offsets = [0, 64], sizes = [8, 32], strides = [1, 1]} : vector<8x96xf32> to vector<8x32xf32>
    %770 = math.tanh %763 : vector<8x32xf32>
    %771 = arith.mulf %769, %770 : vector<8x32xf32>
    %772 = vector.extract_strided_slice %756 {offsets = [0, 64], sizes = [8, 32], strides = [1, 1]} : vector<8x96xf32> to vector<8x32xf32>
    %773 = math.tanh %768 : vector<8x32xf32>
    %774 = arith.mulf %772, %773 : vector<8x32xf32>
    %c0_i32_194 = arith.constant 0 : i32
    %775 = arith.cmpi eq, %c6_i32_184, %c0_i32_194 : i32
    %776 = arith.select %775, %774, %727 : vector<8x32xf32>
    %c7_i32_195 = arith.constant 7 : i32
    %c8_i32_196 = arith.constant 8 : i32
    %777 = arith.muli %c7_i32_195, %c8_i32_196 : i32
    %778 = tpu.assume_multiple %777, 8 : i32
    %c7_i32_197 = arith.constant 7 : i32
    %779 = arith.subi %c7_i32_197, %c7_i32_195 : i32
    %c8_i32_198 = arith.constant 8 : i32
    %780 = arith.muli %779, %c8_i32_198 : i32
    %781 = tpu.assume_multiple %780, 8 : i32
    %782 = arith.truncf %771 : vector<8x32xf32> to vector<8x32xbf16>
    %cst_199 = arith.constant dense<0.000000e+00> : vector<8x128xf32>
    %783 = tpu.matmul %782, %431, %cst_199 {dimension_numbers = #tpu.dot_dimension_numbers<[1], [0], [0], [1], [0, 0, 1, 1], [], []>} : vector<8x32xbf16>, vector<32x128xbf16>, vector<8x128xf32> -> vector<8x128xf32>
    %784 = arith.truncf %774 : vector<8x32xf32> to vector<8x32xbf16>
    %cst_200 = arith.constant dense<0.000000e+00> : vector<8x128xf32>
    %785 = tpu.matmul %784, %432, %cst_200 {dimension_numbers = #tpu.dot_dimension_numbers<[1], [0], [0], [1], [0, 0, 1, 1], [], []>} : vector<8x32xbf16>, vector<32x128xbf16>, vector<8x128xf32> -> vector<8x128xf32>
    %786 = arith.index_cast %778 : i32 to index
    %c0_201 = arith.constant 0 : index
    %787 = vector.load %arg15[%786, %c0_201] : memref<64x256xf32, #tpu.memory_space<vmem>>, vector<8x128xf32>
    %788 = arith.addf %787, %783 : vector<8x128xf32>
    %789 = arith.index_cast %781 : i32 to index
    %c128_202 = arith.constant 128 : index
    %790 = vector.load %arg15[%789, %c128_202] : memref<64x256xf32, #tpu.memory_space<vmem>>, vector<8x128xf32>
    %791 = arith.addf %790, %785 : vector<8x128xf32>
    %792 = vector.extract_strided_slice %788 {offsets = [0, 0], sizes = [8, 96], strides = [1, 1]} : vector<8x128xf32> to vector<8x96xf32>
    %793 = arith.negf %792 : vector<8x96xf32>
    %794 = math.exp %793 : vector<8x96xf32>
    %cst_203 = arith.constant 1.000000e+00 : f32
    %795 = vector.broadcast %cst_203 : f32 to vector<8x96xf32>
    %796 = arith.addf %795, %794 : vector<8x96xf32>
    %797 = arith.divf %795, %796 : vector<8x96xf32>
    %798 = vector.extract_strided_slice %788 {offsets = [0, 96], sizes = [8, 32], strides = [1, 1]} : vector<8x128xf32> to vector<8x32xf32>
    %799 = math.tanh %798 : vector<8x32xf32>
    %800 = vector.extract_strided_slice %791 {offsets = [0, 0], sizes = [8, 96], strides = [1, 1]} : vector<8x128xf32> to vector<8x96xf32>
    %801 = arith.negf %800 : vector<8x96xf32>
    %802 = math.exp %801 : vector<8x96xf32>
    %cst_204 = arith.constant 1.000000e+00 : f32
    %803 = vector.broadcast %cst_204 : f32 to vector<8x96xf32>
    %804 = arith.addf %803, %802 : vector<8x96xf32>
    %805 = arith.divf %803, %804 : vector<8x96xf32>
    %806 = vector.extract_strided_slice %791 {offsets = [0, 96], sizes = [8, 32], strides = [1, 1]} : vector<8x128xf32> to vector<8x32xf32>
    %807 = math.tanh %806 : vector<8x32xf32>
    %808 = vector.extract_strided_slice %797 {offsets = [0, 32], sizes = [8, 32], strides = [1, 1]} : vector<8x96xf32> to vector<8x32xf32>
    %809 = arith.mulf %808, %763 : vector<8x32xf32>
    %810 = vector.extract_strided_slice %797 {offsets = [0, 0], sizes = [8, 32], strides = [1, 1]} : vector<8x96xf32> to vector<8x32xf32>
    %811 = arith.mulf %810, %799 : vector<8x32xf32>
    %812 = arith.addf %809, %811 : vector<8x32xf32>
    %813 = vector.extract_strided_slice %805 {offsets = [0, 32], sizes = [8, 32], strides = [1, 1]} : vector<8x96xf32> to vector<8x32xf32>
    %814 = arith.mulf %813, %768 : vector<8x32xf32>
    %815 = vector.extract_strided_slice %805 {offsets = [0, 0], sizes = [8, 32], strides = [1, 1]} : vector<8x96xf32> to vector<8x32xf32>
    %816 = arith.mulf %815, %807 : vector<8x32xf32>
    %817 = arith.addf %814, %816 : vector<8x32xf32>
    %818 = vector.extract_strided_slice %797 {offsets = [0, 64], sizes = [8, 32], strides = [1, 1]} : vector<8x96xf32> to vector<8x32xf32>
    %819 = math.tanh %812 : vector<8x32xf32>
    %820 = arith.mulf %818, %819 : vector<8x32xf32>
    %821 = vector.extract_strided_slice %805 {offsets = [0, 64], sizes = [8, 32], strides = [1, 1]} : vector<8x96xf32> to vector<8x32xf32>
    %822 = math.tanh %817 : vector<8x32xf32>
    %823 = arith.mulf %821, %822 : vector<8x32xf32>
    %c0_i32_205 = arith.constant 0 : i32
    %824 = arith.cmpi eq, %c7_i32_195, %c0_i32_205 : i32
    %825 = arith.select %824, %823, %776 : vector<8x32xf32>
    %c8_i32_206 = arith.constant 8 : i32
    %826 = arith.truncf %820 : vector<8x32xf32> to vector<8x32xbf16>
    %c0_207 = arith.constant 0 : index
    %c0_208 = arith.constant 0 : index
    %827 = vector.load %arg11[%c0_207, %c0_208] : memref<32x1xbf16, #tpu.memory_space<vmem>>, vector<32x1xbf16>
    %cst_209 = arith.constant dense<0.000000e+00> : vector<8x1xf32>
    %828 = tpu.matmul %826, %827, %cst_209 {dimension_numbers = #tpu.dot_dimension_numbers<[1], [0], [0], [1], [0, 0, 1, 1], [], []>} : vector<8x32xbf16>, vector<32x1xbf16>, vector<8x1xf32> -> vector<8x1xf32>
    %829 = arith.truncf %825 : vector<8x32xf32> to vector<8x32xbf16>
    %c0_210 = arith.constant 0 : index
    %c0_211 = arith.constant 0 : index
    %830 = vector.load %arg12[%c0_210, %c0_211] : memref<32x1xbf16, #tpu.memory_space<vmem>>, vector<32x1xbf16>
    %cst_212 = arith.constant dense<0.000000e+00> : vector<8x1xf32>
    %831 = tpu.matmul %829, %830, %cst_212 {dimension_numbers = #tpu.dot_dimension_numbers<[1], [0], [0], [1], [0, 0, 1, 1], [], []>} : vector<8x32xbf16>, vector<32x1xbf16>, vector<8x1xf32> -> vector<8x1xf32>
    %832 = arith.addf %828, %831 : vector<8x1xf32>
    %c0_213 = arith.constant 0 : index
    %c0_214 = arith.constant 0 : index
    %833 = vector.load %arg13[%c0_213, %c0_214] : memref<1x1xf32, #tpu.memory_space<vmem>>, vector<1x1xf32>
    %834 = vector.broadcast %833 : vector<1x1xf32> to vector<8x1xf32>
    %835 = arith.addf %832, %834 : vector<8x1xf32>
    %c0_215 = arith.constant 0 : index
    %c0_216 = arith.constant 0 : index
    %836 = vector.load %arg14[%c0_215, %c0_216] : memref<8x1xf32, #tpu.memory_space<vmem>>, vector<8x1xf32>
    tpu.vector_store %arg14[%c0_215, %c0_216], %835 {strides = array<i32>} : memref<8x1xf32, #tpu.memory_space<vmem>>, vector<8x1xf32>,
    return
  }
  func.func @transform_0(%arg0: i32) -> (i32, i32) {
    %c0_i32 = arith.constant 0 : i32
    %c0_i32_0 = arith.constant 0 : i32
    %c0_i32_1 = arith.constant 0 : i32
    return %c0_i32, %c0_i32_0 : i32, i32
  }
  func.func @transform_1(%arg0: i32) -> (i32, i32) {
    %c0_i32 = arith.constant 0 : i32
    %c0_i32_0 = arith.constant 0 : i32
    %c0_i32_1 = arith.constant 0 : i32
    return %c0_i32, %c0_i32_0 : i32, i32
  }
  func.func @transform_2(%arg0: i32) -> (i32, i32) {
    %c0_i32 = arith.constant 0 : i32
    %c0_i32_0 = arith.constant 0 : i32
    %c0_i32_1 = arith.constant 0 : i32
    return %c0_i32, %c0_i32_0 : i32, i32
  }
  func.func @transform_3(%arg0: i32) -> (i32, i32) {
    %c0_i32 = arith.constant 0 : i32
    %c0_i32_0 = arith.constant 0 : i32
    %c0_i32_1 = arith.constant 0 : i32
    return %c0_i32, %c0_i32_0 : i32, i32
  }
  func.func @transform_4(%arg0: i32) -> (i32, i32) {
    %c0_i32 = arith.constant 0 : i32
    %c0_i32_0 = arith.constant 0 : i32
    %c0_i32_1 = arith.constant 0 : i32
    return %c0_i32, %c0_i32_0 : i32, i32
  }
  func.func @transform_5(%arg0: i32) -> (i32, i32) {
    %c0_i32 = arith.constant 0 : i32
    %c0_i32_0 = arith.constant 0 : i32
    %c0_i32_1 = arith.constant 0 : i32
    return %c0_i32, %c0_i32_0 : i32, i32
  }
  func.func @transform_6(%arg0: i32) -> (i32, i32) {
    %c0_i32 = arith.constant 0 : i32
    %c0_i32_0 = arith.constant 0 : i32
    %c0_i32_1 = arith.constant 0 : i32
    return %c0_i32, %c0_i32_0 : i32, i32
  }
  func.func @transform_7(%arg0: i32) -> (i32, i32) {
    %c0_i32 = arith.constant 0 : i32
    %c0_i32_0 = arith.constant 0 : i32
    %c0_i32_1 = arith.constant 0 : i32
    return %c0_i32, %c0_i32_0 : i32, i32
  }
  func.func @transform_8(%arg0: i32) -> (i32, i32) {
    %c0_i32 = arith.constant 0 : i32
    %c0_i32_0 = arith.constant 0 : i32
    %c0_i32_1 = arith.constant 0 : i32
    return %c0_i32, %c0_i32_0 : i32, i32
  }
  func.func @transform_9(%arg0: i32) -> (i32, i32) {
    %c0_i32 = arith.constant 0 : i32
    %c0_i32_0 = arith.constant 0 : i32
    %c0_i32_1 = arith.constant 0 : i32
    return %c0_i32, %c0_i32_0 : i32, i32
  }
  func.func @transform_10(%arg0: i32) -> (i32, i32) {
    %c0_i32 = arith.constant 0 : i32
    %c0_i32_0 = arith.constant 0 : i32
    %c0_i32_1 = arith.constant 0 : i32
    return %c0_i32, %c0_i32_0 : i32, i32
  }
  func.func @transform_11(%arg0: i32) -> (i32, i32) {
    %c0_i32 = arith.constant 0 : i32
    %c0_i32_0 = arith.constant 0 : i32
    %c0_i32_1 = arith.constant 0 : i32
    return %c0_i32, %c0_i32_0 : i32, i32
  }
  func.func @transform_12(%arg0: i32) -> (i32, i32) {
    %c0_i32 = arith.constant 0 : i32
    %c0_i32_0 = arith.constant 0 : i32
    %c0_i32_1 = arith.constant 0 : i32
    return %c0_i32, %c0_i32_0 : i32, i32
  }
  func.func @transform_13(%arg0: i32) -> (i32, i32) {
    %c0_i32 = arith.constant 0 : i32
    %c0_i32_0 = arith.constant 0 : i32
    %c0_i32_1 = arith.constant 0 : i32
    return %c0_i32, %c0_i32_0 : i32, i32
  }
}

</mosaic_0001>

<bundles_post_ra>
// kernel: tpu_custom_call.1
= control target key start
LH: loop header
LB: loop body
LE: loop exit
PB: predicated region body
PF: predicated region fallthrough
CT: control target
= control target key end

     0   :  { %s4176_s0 = inlined_call_operand.vmem [shape: bf16[64,16], index: 0, kind: input, shape index: {}]   ;;  %s4177_s1 = inlined_call_operand.vmem [shape: bf16[16,256], index: 1, kind: input, shape index: {}]   ;;  %s4178_s2 = inlined_call_operand.hbm [shape: f32[1,256], index: 2, kind: input, shape index: {}]   ;;  %s4179_s3 = inlined_call_operand.hbm [shape: bf16[32,128], index: 3, kind: input, shape index: {}]   ;;  %s4180_s4 = inlined_call_operand.hbm [shape: bf16[32,128], index: 4, kind: input, shape index: {}]   ;;  %s4181_s5 = inlined_call_operand.vmem [shape: bf16[32,256], index: 5, kind: input, shape index: {}]   ;;  %s4182_s6 = inlined_call_operand.vmem [shape: bf16[32,256], index: 6, kind: input, shape index: {}]   ;;  %s4183_s7 = inlined_call_operand.vmem [shape: f32[1,256], index: 7, kind: input, shape index: {}]   ;;  %s4184_s8 = inlined_call_operand.vmem [shape: bf16[32,128], index: 8, kind: input, shape index: {}]   ;;  %s4185_s9 = inlined_call_operand.hbm [shape: bf16[32,128], index: 9, kind: input, shape index: {}]   ;;  %s4186_s10 = inlined_call_operand.vmem [shape: bf16[32,1], index: 10, kind: input, shape index: {}]   ;;  %s4187_s11 = inlined_call_operand.vmem [shape: bf16[32,1], index: 11, kind: input, shape index: {}]   ;;  %s4188_s12 = inlined_call_operand.<no memory space> [shape: f32[1,1], index: 12, kind: input, shape index: {}]   ;;  %s4189_s13 = inlined_call_operand.vmem [shape: f32[8,1], index: 13, kind: output, shape index: {}]  }
   0x1   :  { %v18_v0 = vstv %s4188_s12 }
   0x2   :  { %19 = vst [vmem:[#allocation5] sm:$0x1] %v18_v0 }
   0x3   :  { %20 = vsyncpa [#allocation7], 0 }
   0x4   :  { %21 = vsyncpa [#allocation9], 0 }
   0x5   :  { %22 = vsyncpa [#allocation12], 0  ;;  %s3394_s27 = smov [#allocation8]   ;;  %s3300_s14 = scalar_lea.hbm %s4179_s3, 256 }
   0x6   :  { %s42_s28 = sshll.u32 %s3394_s27, 4  ;;  %p3301_p0 = scmp.ne.s32.totalorder %s4179_s3, %s3300_s14  ;;  %s43_s28 = int_to_ptr.vmem [resolvable:$true] %s42_s28 }
   0x7   :  { %p3304_p1 = scmp.lt.u32.totalorder %s3300_s14, %s4179_s3 }
   0x9   :  { %p3306_p2 = pnand %p3304_p1, %p3301_p0 }
   0xb   :  { %3309 = shalt.err (!%p3306_p2)
}
   0xc   :  { %s3310_s12 = scalar_lea.vmem %s43_s28, 256  ;;  %p3315_p4 = scmp.lt.s32.totalorder %s43_s28, %s43_s28 }
   0xd   :  { %p3311_p3 = scmp.ne.s32.totalorder %s43_s28, %s3310_s12  ;;  %p3316_p5 = scmp.lt.s32.totalorder %s3310_s12, %s3310_s12 }
   0xf   :  { %p3317_p6 = por %p3316_p5, %p3315_p4 }
  0x11   :  { %p3318_p7 = pnand %p3317_p6, %p3311_p3 }
  0x13   :  { %3321 = shalt.err (!%p3318_p7)
}
  0x14   :  { %s3395_s19 = smov 64   ;;  %s3396_s20 = smov 4  }
  0x15   :  { %48 = dma.hbm_to_vmem [thread:$0]  %s4179_s3, 256, %s43_s28, [#allocation9], %s3395_s19, %s3395_s19, %s3396_s20  }
  0x16   :  { %s3397_s23 = smov [#allocation6]   ;;  %s3398_s25 = smov [#allocation10]  }
  0x17   :  { %s33_s24 = sshll.u32 %s3397_s23, 4  ;;  %s54_s26 = sshll.u32 %s3398_s25, 4  ;;  %s34_s24 = int_to_ptr.vmem [resolvable:$true] %s33_s24  ;;  %s55_s26 = int_to_ptr.vmem [resolvable:$true] %s54_s26 }
  0x18   :  { %s3322_s30 = scalar_lea.hbm %s4178_s2, 32 }
  0x19   :  { %p3323_p8 = scmp.ne.s32.totalorder %s4178_s2, %s3322_s30  ;;  %p3326_p9 = scmp.lt.u32.totalorder %s3322_s30, %s4178_s2 }
  0x1b   :  { %p3328_p10 = pnand %p3326_p9, %p3323_p8 }
  0x1d   :  { %3331 = shalt.err (!%p3328_p10)
}
  0x1e   :  { %s3332_s3 = scalar_lea.vmem %s34_s24, 32  ;;  %p3337_p12 = scmp.lt.s32.totalorder %s34_s24, %s34_s24 }
  0x1f   :  { %p3333_p11 = scmp.ne.s32.totalorder %s34_s24, %s3332_s3  ;;  %p3338_p13 = scmp.lt.s32.totalorder %s3332_s3, %s3332_s3 }
  0x21   :  { %p3339_p0 = por %p3338_p13, %p3337_p12 }
  0x23   :  { %p3340_p1 = pnand %p3339_p0, %p3333_p11 }
  0x25   :  { %3343 = shalt.err (!%p3340_p1)
}
  0x26   :  { %36 = dma.hbm_to_vmem [thread:$0]  %s4178_s2, 32, %s34_s24, [#allocation7]  }
  0x27   :  { %s3344_s22 = scalar_lea.hbm %s4180_s4, 256 }
  0x28   :  { %p3345_p2 = scmp.ne.s32.totalorder %s4180_s4, %s3344_s22  ;;  %p3348_p3 = scmp.lt.u32.totalorder %s3344_s22, %s4180_s4 }
  0x2a   :  { %p3350_p4 = pnand %p3348_p3, %p3345_p2 }
  0x2c   :  { %3353 = shalt.err (!%p3350_p4)
}
  0x2d   :  { %s3354_s30 = scalar_lea.vmem %s55_s26, 256  ;;  %p3359_p6 = scmp.lt.s32.totalorder %s55_s26, %s55_s26 }
  0x2e   :  { %p3355_p5 = scmp.ne.s32.totalorder %s55_s26, %s3354_s30  ;;  %p3360_p7 = scmp.lt.s32.totalorder %s3354_s30, %s3354_s30 }
  0x30   :  { %p3361_p8 = por %p3360_p7, %p3359_p6 }
  0x32   :  { %p3362_p9 = pnand %p3361_p8, %p3355_p5 }
  0x34   :  { %3365 = shalt.err (!%p3362_p9)
}
  0x35   :  { %60 = dma.hbm_to_vmem [thread:$0]  %s4180_s4, 256, %s55_s26, [#allocation9], %s3395_s19, %s3395_s19, %s3396_s20  }
  0x36   :  { %s3399_s14 = smov [#allocation11]   ;;  %s3366_s3 = scalar_lea.hbm %s4185_s9, 256 }
  0x37   :  { %s74_s15 = sshll.u32 %s3399_s14, 4  ;;  %p3367_p10 = scmp.ne.s32.totalorder %s4185_s9, %s3366_s3  ;;  %s75_s15 = int_to_ptr.vmem [resolvable:$true] %s74_s15 }
  0x38   :  { %p3370_p11 = scmp.lt.u32.totalorder %s3366_s3, %s4185_s9 }
  0x3a   :  { %p3372_p12 = pnand %p3370_p11, %p3367_p10 }
  0x3c   :  { %3375 = shalt.err (!%p3372_p12)
}
  0x3d   :  { %s3376_s22 = scalar_lea.vmem %s75_s15, 256  ;;  %p3381_p0 = scmp.lt.s32.totalorder %s75_s15, %s75_s15 }
  0x3e   :  { %p3377_p13 = scmp.ne.s32.totalorder %s75_s15, %s3376_s22  ;;  %p3382_p1 = scmp.lt.s32.totalorder %s3376_s22, %s3376_s22 }
  0x40   :  { %p3383_p2 = por %p3382_p1, %p3381_p0 }
  0x42   :  { %p3384_p3 = pnand %p3383_p2, %p3377_p13 }
  0x44   :  { %3387 = shalt.err (!%p3384_p3)
}
  0x45   :  { %80 = dma.hbm_to_vmem [thread:$0]  %s4185_s9, 256, %s75_s15, [#allocation12], %s3395_s19, %s3395_s19, %s3396_s20  }
  0x46   :  { %3388 = dma.done.wait [#allocation7], 32  }
  0x47   :  { %3389 = vsyncadd [#allocation7], 4294967264 }
  0x48   :  { %3390 = dma.done.wait [#allocation9], 512  }
  0x49   :  { %3391 = vsyncadd [#allocation9], 4294966784 }
  0x4a   :  { %3392 = dma.done.wait [#allocation12], 256  }
  0x4b   :  { %3393 = vsyncadd [#allocation12], 4294967040  ;;  %v3400_v1 = vmov 0.0   ;;  %v3401_v2 = vmov 0   ;;  %vm3402_vm0 = vmmov 0   ;;  %v3541_v4 = vld [vmem:[#allocation8] sm:$0xff]   ;;  %v112_v13 = vlaneseq }
  0x4c   :  { %2841 = vmatprep.subr.bf16.mxu1 %v3400_v1  ;;  %197 = vmatprep.mubr.bf16.mxu0 %v3401_v2  ;;  %v3067_v3 = vld [vmem:[%s4177_s1 + $0x4] ss:$8 sps:$4 sm:$0xff]   ;;  %v3070_v5 = vld [vmem:[%s4177_s1] ss:$8 sps:$4 sm:$0xff]   ;;  %vm152_vm1 = vcmask 130048   ;;  %v3556_v8 = vld [vmem:[#allocation10] sm:$0xff]  }
  0x4d   :  { %2845 = vmatprep.mubr.msk.bf16.mxu1 %vm3402_vm0, %v3400_v1  ;;  %165 = vmatprep.subr.bf16.mxu0 %v3067_v3  ;;  %v3071_v6 = vld [vmem:[%s4176_s0] sm:$0xff]   ;;  %v3551_v7 = vld [vmem:[#allocation8 + $0x8] sm:$0xff]   ;;  %v3077_v12 = vld [vmem:[%s4176_s0 + $0x18] sm:$0xff]   ;;  %v3596_v14 = vshrl.u32 %v112_v13, 7  ;;  %vm274_vm2 = vcmask 261120   ;;  %vm2657_vm3 = vcmask 7168  }
  0x4e   :  { %2842 = vmatpush3.bf16.msra.mxu1 %v3541_v4  ;;  %166 = vmatpush1.bf16.msra.mxu0 %v3070_v5  ;;  %v3073_v9 = vld [vmem:[%s4176_s0 + $0x8] sm:$0xff]   ;;  %v3563_v10 = vld [vmem:[#allocation10 + $0x8] sm:$0xff]   ;;  %v3074_v11 = vld [vmem:[%s4176_s0 + $0x10] sm:$0xff]   ;;  %s3403_s0 = smov 32  }
  0x4f   :  { %2843 = vmatprep.subr.bf16.mxu1 %v3400_v1  ;;  %2873 = vmatprep.subr.bf16.mxu0 %v3400_v1  ;;  %v114_v15 = vsub.s32 0, %v3596_v14  ;;  %v110_v16 = vld [vmem:[#allocation6] sm:$0x3]  ;;  %v118_v17 = vsub.s32 1, %v3596_v14 }
  0x51   :  { %2679 = vmatmul.mubr.msk.bf16.vlgmr.msra.gmra.mrb[0].mxu0 %vm152_vm1, %v3071_v6  ;;  %v115_v18 = vrot.slane %v110_v16, %v114_v15  ;;  %v119_v19 = vrot.slane %v110_v16, %v118_v17 }
  0x52   :  { %2844 = vmatpush3.bf16.msra.mxu1 %v3551_v7  ;;  %207 = vmatprep.mubr.bf16.mxu0 %v3401_v2 }
  0x53   :  { %2849 = vmatprep.subr.bf16.mxu1 %v3400_v1  ;;  %2874 = vmatpush3.bf16.msra.mxu0 %v3541_v4 }
  0x54   :  { %2875 = vmatprep.subr.bf16.mxu0 %v3400_v1 }
  0x55   :  { %2846 = vmatmul.mubr.bf16.vlgmr.msra.gmra.mrb[0].mxu1 %v3401_v2 }
  0x56   :  { %2850 = vmatpush3.bf16.msra.mxu1 %v3556_v8  ;;  %2853 = vmatprep.mubr.msk.bf16.mxu1 %vm3402_vm0, %v3400_v1 }
  0x57   :  { %2851 = vmatprep.subr.bf16.mxu1 %v3400_v1  ;;  %2876 = vmatpush3.bf16.msra.mxu0 %v3551_v7 }
  0x58   :  { %2889 = vmatprep.subr.bf16.mxu0 %v3400_v1 }
  0x59   :  { %2680 = vmatmul.mubr.msk.bf16.gmra.mrb[4].mxu0 %vm152_vm1, %v3073_v9 }
  0x5a   :  { %2852 = vmatpush3.bf16.msra.mxu1 %v3563_v10  ;;  %217 = vmatprep.mubr.bf16.mxu0 %v3401_v2 }
  0x5b   :  { %2857 = vmatprep.subr.bf16.mxu1 %v3400_v1 }
  0x5d   :  { %2854 = vmatmul.mubr.bf16.vlgmr.msra.gmra.mrb[4].mxu1 %v3401_v2 }
  0x5e   :  { %2858 = vmatpush3.bf16.msra.mxu1 %v3541_v4  ;;  %2861 = vmatprep.mubr.msk.bf16.mxu1 %vm3402_vm0, %v3400_v1 }
  0x5f   :  { %2859 = vmatprep.subr.bf16.mxu1 %v3400_v1 }
  0x61   :  { %2681 = vmatmul.mubr.msk.bf16.gmra.mrb[8].mxu0 %vm152_vm1, %v3074_v11 }
  0x62   :  { %2860 = vmatpush3.bf16.msra.mxu1 %v3551_v7  ;;  %227 = vmatprep.mubr.bf16.mxu0 %v3401_v2 }
  0x63   :  { %2865 = vmatprep.subr.bf16.mxu1 %v3400_v1 }
  0x69   :  { %2682 = vmatmul.mubr.msk.bf16.gmra.mrb[12].mxu0 %vm152_vm1, %v3077_v12 }
  0x6a   :  { %2877 = vmatprep.mubr.msk.bf16.mxu0 %vm3402_vm0, %v3400_v1 }
 0x124   :  { %v199_v20 = vpop.f32.mrb[0].mxu0 }
 0x125   :  { %v200_v21 = vadd.f32 %v199_v20, %v115_v18  ;;  %v201_v22 = vpop.f32.mrb[1].mxu0 }
 0x126   :  { %v3604_v23 = vadd.f32 %v201_v22, %v119_v19  ;;  %v203_v24 = vpop.f32.mrb[2].mxu0 }
 0x127   :  { %v3606_v25 = vadd.f32 %v203_v24, %v115_v18  ;;  %v205_v26 = vpop.f32.mrb[3].mxu0 }
 0x128   :  { %v312_v27 = vpop.f32.mrb[0].mxu1  ;;  %v3608_v28 = vadd.f32 %v205_v26, %v119_v19 }
 0x129   :  { %v374_v29 = vadd.f32 %v312_v27, %v200_v21  ;;  %v2847_v30 = vpop.f32.mrb[1].mxu1 }
 0x12a   :  { %v315_v31 = vpop.f32.mrb[2].mxu1 }
 0x12b   :  { %3098 = vtanh.f32 %v374_v29  ;;  %v2848_v32 = vpop.f32.mrb[3].mxu1  ;;  %v2687_v0 = vmul.f32 -1.442695, %v374_v29 }
 0x12c   :  { %v209_v33 = vpop.f32.mrb[4].mxu0 }
 0x12d   :  { %v3610_v34 = vadd.f32 %v209_v33, %v115_v18  ;;  %v211_v35 = vpop.f32.mrb[5].mxu0 }
 0x12e   :  { %v3612_v36 = vadd.f32 %v211_v35, %v119_v19  ;;  %v213_v37 = vpop.f32.mrb[6].mxu0 }
 0x12f   :  { %v3614_v38 = vadd.f32 %v213_v37, %v115_v18  ;;  %v215_v39 = vpop.f32.mrb[7].mxu0 }
 0x130   :  { %v364_v40 = vpop.f32.mrb[4].mxu1  ;;  %v3616_v41 = vadd.f32 %v215_v39, %v119_v19 }
 0x131   :  { %v2855_v42 = vpop.f32.mrb[5].mxu1 }
 0x132   :  { %v367_v43 = vpop.f32.mrb[6].mxu1 }
 0x133   :  { %v2856_v44 = vpop.f32.mrb[7].mxu1 }
 0x134   :  { %v219_v46 = vpop.f32.mrb[8].mxu0 }
 0x135   :  { %v3099_v45 = vpop.eup %3098  ;;  %v3618_v47 = vadd.f32 %v219_v46, %v115_v18  ;;  %v221_v48 = vpop.f32.mrb[9].mxu0 }
 0x136   :  { %396 = vrot.lane.b32.xlu0 %v3099_v45, %s3403_s0  ;;  %v3621_v49 = vadd.f32 %v221_v48, %v119_v19  ;;  %v223_v50 = vpop.f32.mrb[10].mxu0 }
 0x137   :  { %v3623_v51 = vadd.f32 %v223_v50, %v115_v18  ;;  %v225_v52 = vpop.f32.mrb[11].mxu0 }
 0x138   :  { %v3625_v53 = vadd.f32 %v225_v52, %v119_v19 }
 0x13c   :  { %v229_v54 = vpop.f32.mrb[12].mxu0 }
 0x13d   :  { %v3627_v55 = vadd.f32 %v229_v54, %v115_v18  ;;  %v231_v56 = vpop.f32.mrb[13].mxu0 }
 0x13e   :  { %v3629_v57 = vadd.f32 %v231_v56, %v119_v19  ;;  %v233_v58 = vpop.f32.mrb[14].mxu0 }
 0x13f   :  { %v3631_v59 = vadd.f32 %v233_v58, %v115_v18  ;;  %v235_v60 = vpop.f32.mrb[15].mxu0 }
 0x140   :  { %v236_v61 = vadd.f32 %v235_v60, %v119_v19 }
 0x142   :  { %v379_v62 = vadd.f32 %v364_v40, %v236_v61 }
 0x144   :  { %3100 = vtanh.f32 %v379_v62  ;;  %v2688_v6 = vmul.f32 -1.442695, %v379_v62 }
 0x145   :  { %3102 = vpow2.f32 %v2687_v0 }
 0x14e   :  { %v3101_v63 = vpop.eup %3100 }
 0x14f   :  { %407 = vrot.lane.b32.xlu0 %v3101_v63, %s3403_s0  ;;  %v3103_v3 = vpop.eup %3102 }
 0x150   :  { %v383_v5 = vadd.f32 1.0, %v3103_v3 }
 0x152   :  { %3104 = vrcp.f32 %v383_v5 }
 0x153   :  { %3106 = vpow2.f32 %v2688_v6 }
 0x15c   :  { %v3105_v9 = vpop.eup %3104 }
 0x15d   :  { %v3107_v13 = vpop.eup %3106  ;;  %v394_v21 = vmul.f32 0.0, %v3105_v9 }
 0x15e   :  { %v390_v16 = vadd.f32 1.0, %v3107_v13 }
 0x160   :  { %3108 = vrcp.f32 %v390_v16 }
 0x16a   :  { %v3109_v18 = vpop.eup %3108 }
 0x16b   :  { %v405_v27 = vmul.f32 0.0, %v3109_v18 }
 0x1a8   :  { %v397_v11 = vpop.permute.xlu0 %396 }
 0x1a9   :  { %v399_v12 = vmul.f32 %v3105_v9, %v397_v11 }
 0x1ab   :  { %401 = vrot.lane.b32.xlu1 %v399_v12, %s3403_s0 }
 0x1c1   :  { %v408_v19 = vpop.permute.xlu0 %407 }
 0x1c2   :  { %v410_v20 = vmul.f32 %v3109_v18, %v408_v19 }
 0x1c4   :  { %412 = vrot.lane.b32.xlu1 %v410_v20, %s3403_s0 }
 0x21d   :  { %v402_v22 = vpop.permute.xlu1 %401 }
 0x21e   :  { %v3636_v24 = vadd.f32 %v402_v22, %v394_v21 }
 0x220   :  { %3110 = vtanh.f32 %v3636_v24 }
 0x22a   :  { %v3111_v26 = vpop.eup %3110 }
 0x22b   :  { %418 = vrot.lane.b32.xlu0 %v3111_v26, %s3403_s0 }
 0x236   :  { %v413_v29 = vpop.permute.xlu1 %412 }
 0x237   :  { %v415_v30 = vadd.f32 %v413_v29, %v405_v27 }
 0x239   :  { %3112 = vtanh.f32 %v415_v30 }
 0x243   :  { %v3113_v31 = vpop.eup %3112 }
 0x244   :  { %424 = vrot.lane.b32.xlu1 %v3113_v31, %s3403_s0 }
 0x29d   :  { %v419_v32 = vpop.permute.xlu0 %418 }
 0x29e   :  { %v3641_v33 = vmul.f32 %v3105_v9, %v419_v32 }
 0x2a0   :  { %v439_v35 = vpack.c.bf16 %v3641_v33, %v3641_v33 }
 0x2a2   :  { %441 = vrot.lane.b32.xlu0 %v439_v35, %s3395_s19 }
 0x2b6   :  { %v425_v37 = vpop.permute.xlu1 %424 }
 0x2b7   :  { %v3646_v39 = vmul.f32 %v3109_v18, %v425_v37 }
 0x2b9   :  { %v486_v40 = vpack.c.bf16 %v3646_v39, %v3646_v39 }
 0x2bb   :  { %488 = vrot.lane.b32.xlu1 %v486_v40, %s3395_s19 }
 0x314   :  { %v442_v42 = vpop.permute.xlu0 %441 }
 0x315   :  { %2862 = vmatmul.mubr.msk.bf16.vlgmr.msra.gmra.mrb[8].mxu1 %vm274_vm2, %v442_v42 }
 0x316   :  { %2866 = vmatpush3.bf16.msra.mxu1 %v3556_v8  ;;  %2869 = vmatprep.mubr.msk.bf16.mxu1 %vm3402_vm0, %v3400_v1 }
 0x317   :  { %2867 = vmatprep.subr.bf16.mxu1 %v3400_v1 }
 0x31a   :  { %2868 = vmatpush3.bf16.msra.mxu1 %v3563_v10 }
 0x31b   :  { %2881 = vmatprep.subr.bf16.mxu1 %v3400_v1 }
 0x32d   :  { %v489_v43 = vpop.permute.xlu1 %488 }
 0x32e   :  { %2870 = vmatmul.mubr.msk.bf16.vlgmr.msra.gmra.mrb[12].mxu1 %vm274_vm2, %v489_v43 }
 0x32f   :  { %2882 = vmatpush3.bf16.msra.mxu1 %v3556_v8  ;;  %2885 = vmatprep.mubr.msk.bf16.mxu1 %vm3402_vm0, %v3400_v1 }
 0x330   :  { %2883 = vmatprep.subr.bf16.mxu1 %v3400_v1 }
 0x333   :  { %2884 = vmatpush3.bf16.msra.mxu1 %v3563_v10 }
 0x334   :  { %2897 = vmatprep.subr.bf16.mxu1 %v3400_v1 }
 0x3e8   :  { %v480_v44 = vpop.f32.mrb[8].mxu1 }
 0x3e9   :  { %v537_v45 = vadd.f32 %v480_v44, %v3606_v25  ;;  %v2863_v46 = vpop.f32.mrb[9].mxu1 }
 0x3ea   :  { %v483_v48 = vpop.f32.mrb[10].mxu1 }
 0x3eb   :  { %v2864_v50 = vpop.f32.mrb[11].mxu1  ;;  %v2691_v13 = vmul.f32 -1.442695, %v537_v45 }
 0x401   :  { %v527_v52 = vpop.f32.mrb[12].mxu1 }
 0x402   :  { %v542_v54 = vadd.f32 %v527_v52, %v3629_v57  ;;  %v2871_v56 = vpop.f32.mrb[13].mxu1 }
 0x403   :  { %v530_v58 = vpop.f32.mrb[14].mxu1 }
 0x404   :  { %3114 = vtanh.f32 %v542_v54  ;;  %v2872_v60 = vpop.f32.mrb[15].mxu1  ;;  %v2692_v62 = vmul.f32 -1.442695, %v542_v54 }
 0x406   :  { %3116 = vpow2.f32 %v2692_v62 }
 0x40e   :  { %v3115_v61 = vpop.eup %3114 }
 0x40f   :  { %570 = vrot.lane.b32.xlu0 %v3115_v61, %s3403_s0 }
 0x410   :  { %v3117_v63 = vpop.eup %3116 }
 0x411   :  { %v553_v0 = vadd.f32 1.0, %v3117_v63 }
 0x413   :  { %3118 = vrcp.f32 %v553_v0 }
 0x41d   :  { %v3119_v3 = vpop.eup %3118 }
 0x41e   :  { %v568_v6 = vmul.f32 %v3119_v3, %v415_v30 }
 0x481   :  { %v571_v25 = vpop.permute.xlu0 %570 }
 0x482   :  { %v573_v5 = vmul.f32 %v3119_v3, %v571_v25 }
 0x484   :  { %575 = vrot.lane.b32.xlu1 %v573_v5, %s3403_s0 }
 0x4f6   :  { %v576_v9 = vpop.permute.xlu1 %575 }
 0x4f7   :  { %v578_v57 = vadd.f32 %v576_v9, %v568_v6 }
 0x4f9   :  { %3120 = vtanh.f32 %v578_v57 }
 0x4fa   :  { %3122 = vtanh.f32 %v537_v45 }
 0x4fb   :  { %3124 = vpow2.f32 %v2691_v13 }
 0x503   :  { %v3121_v11 = vpop.eup %3120 }
 0x504   :  { %587 = vrot.lane.b32.xlu0 %v3121_v11, %s3403_s0  ;;  %v3123_v12 = vpop.eup %3122 }
 0x505   :  { %v3125_v16 = vpop.eup %3124 }
 0x506   :  { %v546_v18 = vadd.f32 1.0, %v3125_v16 }
 0x508   :  { %559 = vrot.lane.b32.xlu0 %v3123_v12, %s3403_s0  ;;  %3126 = vrcp.f32 %v546_v18 }
 0x512   :  { %v3127_v22 = vpop.eup %3126 }
 0x513   :  { %v557_v30 = vmul.f32 %v3127_v22, %v3636_v24 }
 0x576   :  { %v588_v19 = vpop.permute.xlu0 %587 }
 0x577   :  { %v3671_v20 = vmul.f32 %v3119_v3, %v588_v19 }
 0x579   :  { %v650_v21 = vpack.c.bf16 %v3671_v20, %v3671_v20 }
 0x57a   :  { %v560_v26 = vpop.permute.xlu0 %559 }
 0x57b   :  { %v562_v27 = vmul.f32 %v3127_v22, %v560_v26  ;;  %652 = vrot.lane.b32.xlu1 %v650_v21, %s3395_s19 }
 0x57d   :  { %564 = vrot.lane.b32.xlu0 %v562_v27, %s3403_s0 }
 0x5ed   :  { %v653_v29 = vpop.permute.xlu1 %652 }
 0x5ee   :  { %2886 = vmatmul.mubr.msk.bf16.vlgmr.msra.gmra.mrb[16].mxu1 %vm274_vm2, %v653_v29 }
 0x5ef   :  { %v565_v31 = vpop.permute.xlu0 %564  ;;  %2898 = vmatpush3.bf16.msra.mxu1 %v3556_v8  ;;  %2901 = vmatprep.mubr.msk.bf16.mxu1 %vm3402_vm0, %v3400_v1 }
 0x5f0   :  { %v3682_v32 = vadd.f32 %v565_v31, %v557_v30  ;;  %2899 = vmatprep.subr.bf16.mxu1 %v3400_v1 }
 0x5f2   :  { %3128 = vtanh.f32 %v3682_v32 }
 0x5f3   :  { %2900 = vmatpush3.bf16.msra.mxu1 %v3563_v10 }
 0x5f4   :  { %2913 = vmatprep.subr.bf16.mxu1 %v3400_v1 }
 0x5fc   :  { %v3129_v35 = vpop.eup %3128 }
 0x5fd   :  { %581 = vrot.lane.b32.xlu0 %v3129_v35, %s3403_s0 }
 0x66f   :  { %v582_v24 = vpop.permute.xlu0 %581 }
 0x670   :  { %v3689_v37 = vmul.f32 %v3127_v22, %v582_v24 }
 0x672   :  { %v603_v40 = vpack.c.bf16 %v3689_v37, %v3689_v37 }
 0x674   :  { %605 = vrot.lane.b32.xlu0 %v603_v40, %s3395_s19 }
 0x6c1   :  { %v691_v42 = vpop.f32.mrb[16].mxu1 }
 0x6c2   :  { %v706_v43 = vadd.f32 %v691_v42, %v3625_v53  ;;  %v2887_v44 = vpop.f32.mrb[17].mxu1 }
 0x6c3   :  { %v694_v45 = vpop.f32.mrb[18].mxu1 }
 0x6c4   :  { %3130 = vtanh.f32 %v706_v43  ;;  %v2888_v46 = vpop.f32.mrb[19].mxu1  ;;  %v2696_v53 = vmul.f32 -1.442695, %v706_v43 }
 0x6c6   :  { %3132 = vpow2.f32 %v2696_v53 }
 0x6ce   :  { %v3131_v48 = vpop.eup %3130 }
 0x6cf   :  { %734 = vrot.lane.b32.xlu1 %v3131_v48, %s3403_s0 }
 0x6d0   :  { %v3133_v52 = vpop.eup %3132 }
 0x6d1   :  { %v717_v54 = vadd.f32 1.0, %v3133_v52 }
 0x6d3   :  { %3134 = vrcp.f32 %v717_v54 }
 0x6dd   :  { %v3135_v56 = vpop.eup %3134 }
 0x6de   :  { %v732_v61 = vmul.f32 %v3135_v56, %v578_v57 }
 0x6e6   :  { %v606_v50 = vpop.permute.xlu0 %605 }
 0x6e7   :  { %2878 = vmatmul.mubr.msk.bf16.vlgmr.msra.gmra.mrb[16].mxu0 %vm274_vm2, %v606_v50 }
 0x6e8   :  { %2890 = vmatpush3.bf16.msra.mxu0 %v3541_v4  ;;  %2893 = vmatprep.mubr.msk.bf16.mxu0 %vm3402_vm0, %v3400_v1 }
 0x6e9   :  { %2891 = vmatprep.subr.bf16.mxu0 %v3400_v1 }
 0x6ec   :  { %2892 = vmatpush3.bf16.msra.mxu0 %v3551_v7 }
 0x6ed   :  { %2905 = vmatprep.subr.bf16.mxu0 %v3400_v1 }
 0x741   :  { %v735_v58 = vpop.permute.xlu1 %734 }
 0x742   :  { %v737_v60 = vmul.f32 %v3135_v56, %v735_v58 }
 0x744   :  { %739 = vrot.lane.b32.xlu1 %v737_v60, %s3403_s0 }
 0x7b6   :  { %v740_v62 = vpop.permute.xlu1 %739 }
 0x7b7   :  { %v3704_v63 = vadd.f32 %v740_v62, %v732_v61 }
 0x7b9   :  { %3136 = vtanh.f32 %v3704_v63 }
 0x7ba   :  { %v644_v0 = vpop.f32.mrb[16].mxu0 }
 0x7bb   :  { %v701_v3 = vadd.f32 %v644_v0, %v3610_v34  ;;  %v2879_v25 = vpop.f32.mrb[17].mxu0 }
 0x7bc   :  { %v647_v5 = vpop.f32.mrb[18].mxu0 }
 0x7bd   :  { %3138 = vtanh.f32 %v701_v3  ;;  %v2880_v6 = vpop.f32.mrb[19].mxu0  ;;  %v2695_v12 = vmul.f32 -1.442695, %v701_v3 }
 0x7bf   :  { %3140 = vpow2.f32 %v2695_v12 }
 0x7c3   :  { %v3137_v9 = vpop.eup %3136 }
 0x7c4   :  { %751 = vrot.lane.b32.xlu1 %v3137_v9, %s3403_s0 }
 0x7c7   :  { %v3139_v11 = vpop.eup %3138 }
 0x7c8   :  { %723 = vrot.lane.b32.xlu0 %v3139_v11, %s3403_s0 }
 0x7c9   :  { %v3141_v57 = vpop.eup %3140 }
 0x7ca   :  { %v710_v13 = vadd.f32 1.0, %v3141_v57 }
 0x7cc   :  { %3142 = vrcp.f32 %v710_v13 }
 0x7d6   :  { %v3143_v19 = vpop.eup %3142 }
 0x7d7   :  { %v721_v27 = vmul.f32 %v3143_v19, %v3682_v32 }
 0x836   :  { %v752_v16 = vpop.permute.xlu1 %751 }
 0x837   :  { %v3710_v18 = vmul.f32 %v3135_v56, %v752_v16 }
 0x839   :  { %v814_v34 = vpack.c.bf16 %v3710_v18, %v3710_v18 }
 0x83a   :  { %v724_v21 = vpop.permute.xlu0 %723 }
 0x83b   :  { %v726_v22 = vmul.f32 %v3143_v19, %v724_v21  ;;  %816 = vrot.lane.b32.xlu1 %v814_v34, %s3395_s19 }
 0x83d   :  { %728 = vrot.lane.b32.xlu0 %v726_v22, %s3403_s0 }
 0x8ad   :  { %v817_v26 = vpop.permute.xlu1 %816 }
 0x8ae   :  { %2902 = vmatmul.mubr.msk.bf16.vlgmr.msra.gmra.mrb[20].mxu1 %vm274_vm2, %v817_v26 }
 0x8af   :  { %v729_v29 = vpop.permute.xlu0 %728  ;;  %2914 = vmatpush3.bf16.msra.mxu1 %v3556_v8  ;;  %2917 = vmatprep.mubr.msk.bf16.mxu1 %vm3402_vm0, %v3400_v1 }
 0x8b0   :  { %v3721_v30 = vadd.f32 %v729_v29, %v721_v27  ;;  %2915 = vmatprep.subr.bf16.mxu1 %v3400_v1 }
 0x8b2   :  { %3144 = vtanh.f32 %v3721_v30 }
 0x8b3   :  { %2916 = vmatpush3.bf16.msra.mxu1 %v3563_v10 }
 0x8b4   :  { %2929 = vmatprep.subr.bf16.mxu1 %v3400_v1 }
 0x8bc   :  { %v3145_v31 = vpop.eup %3144 }
 0x8bd   :  { %745 = vrot.lane.b32.xlu0 %v3145_v31, %s3403_s0 }
 0x92f   :  { %v746_v32 = vpop.permute.xlu0 %745 }
 0x930   :  { %v3728_v35 = vmul.f32 %v3143_v19, %v746_v32 }
 0x932   :  { %v767_v24 = vpack.c.bf16 %v3728_v35, %v3728_v35 }
 0x934   :  { %769 = vrot.lane.b32.xlu0 %v767_v24, %s3395_s19 }
 0x981   :  { %v855_v40 = vpop.f32.mrb[20].mxu1 }
 0x982   :  { %v870_v42 = vadd.f32 %v855_v40, %v3621_v49  ;;  %v2903_v43 = vpop.f32.mrb[21].mxu1 }
 0x983   :  { %v858_v44 = vpop.f32.mrb[22].mxu1 }
 0x984   :  { %3146 = vtanh.f32 %v870_v42  ;;  %v2904_v45 = vpop.f32.mrb[23].mxu1  ;;  %v2700_v49 = vmul.f32 -1.442695, %v870_v42 }
 0x986   :  { %3148 = vpow2.f32 %v2700_v49 }
 0x98e   :  { %v3147_v46 = vpop.eup %3146 }
 0x98f   :  { %898 = vrot.lane.b32.xlu1 %v3147_v46, %s3403_s0 }
 0x990   :  { %v3149_v50 = vpop.eup %3148 }
 0x991   :  { %v881_v53 = vadd.f32 1.0, %v3149_v50 }
 0x993   :  { %3150 = vrcp.f32 %v881_v53 }
 0x99d   :  { %v3151_v52 = vpop.eup %3150 }
 0x99e   :  { %v896_v58 = vmul.f32 %v3151_v52, %v3704_v63 }
 0x9a6   :  { %v770_v48 = vpop.permute.xlu0 %769 }
 0x9a7   :  { %2894 = vmatmul.mubr.msk.bf16.vlgmr.msra.gmra.mrb[20].mxu0 %vm274_vm2, %v770_v48 }
 0x9a8   :  { %2906 = vmatpush3.bf16.msra.mxu0 %v3541_v4  ;;  %2909 = vmatprep.mubr.msk.bf16.mxu0 %vm3402_vm0, %v3400_v1 }
 0x9a9   :  { %2907 = vmatprep.subr.bf16.mxu0 %v3400_v1 }
 0x9ac   :  { %2908 = vmatpush3.bf16.msra.mxu0 %v3551_v7 }
 0x9ad   :  { %2921 = vmatprep.subr.bf16.mxu0 %v3400_v1 }
 0xa01   :  { %v899_v54 = vpop.permute.xlu1 %898 }
 0xa02   :  { %v901_v56 = vmul.f32 %v3151_v52, %v899_v54 }
 0xa04   :  { %903 = vrot.lane.b32.xlu1 %v901_v56, %s3403_s0 }
 0xa76   :  { %v904_v60 = vpop.permute.xlu1 %903 }
 0xa77   :  { %v3744_v61 = vadd.f32 %v904_v60, %v896_v58 }
 0xa79   :  { %3152 = vtanh.f32 %v3744_v61 }
 0xa7a   :  { %v808_v62 = vpop.f32.mrb[20].mxu0 }
 0xa7b   :  { %v865_v0 = vadd.f32 %v808_v62, %v3614_v38  ;;  %v2895_v3 = vpop.f32.mrb[21].mxu0 }
 0xa7c   :  { %v811_v25 = vpop.f32.mrb[22].mxu0 }
 0xa7d   :  { %3154 = vtanh.f32 %v865_v0  ;;  %v2896_v5 = vpop.f32.mrb[23].mxu0  ;;  %v2699_v11 = vmul.f32 -1.442695, %v865_v0 }
 0xa7f   :  { %3156 = vpow2.f32 %v2699_v11 }
 0xa83   :  { %v3153_v6 = vpop.eup %3152 }
 0xa84   :  { %915 = vrot.lane.b32.xlu1 %v3153_v6, %s3403_s0 }
 0xa87   :  { %v3155_v9 = vpop.eup %3154 }
 0xa88   :  { %887 = vrot.lane.b32.xlu0 %v3155_v9, %s3403_s0 }
 0xa89   :  { %v3157_v63 = vpop.eup %3156 }
 0xa8a   :  { %v874_v12 = vadd.f32 1.0, %v3157_v63 }
 0xa8c   :  { %3158 = vrcp.f32 %v874_v12 }
 0xa96   :  { %v3159_v16 = vpop.eup %3158 }
 0xa97   :  { %v885_v22 = vmul.f32 %v3159_v16, %v3721_v30 }
 0xaf6   :  { %v916_v57 = vpop.permute.xlu1 %915 }
 0xaf7   :  { %v3750_v13 = vmul.f32 %v3151_v52, %v916_v57 }
 0xaf9   :  { %v978_v38 = vpack.c.bf16 %v3750_v13, %v3750_v13 }
 0xafa   :  { %v888_v34 = vpop.permute.xlu0 %887 }
 0xafb   :  { %v890_v19 = vmul.f32 %v3159_v16, %v888_v34  ;;  %980 = vrot.lane.b32.xlu1 %v978_v38, %s3395_s19 }
 0xafd   :  { %892 = vrot.lane.b32.xlu0 %v890_v19, %s3403_s0 }
 0xb6d   :  { %v981_v21 = vpop.permute.xlu1 %980 }
 0xb6e   :  { %2918 = vmatmul.mubr.msk.bf16.vlgmr.msra.gmra.mrb[24].mxu1 %vm274_vm2, %v981_v21 }
 0xb6f   :  { %v893_v26 = vpop.permute.xlu0 %892  ;;  %2930 = vmatpush3.bf16.msra.mxu1 %v3556_v8  ;;  %2933 = vmatprep.mubr.msk.bf16.mxu1 %vm3402_vm0, %v3400_v1 }
 0xb70   :  { %v3761_v27 = vadd.f32 %v893_v26, %v885_v22  ;;  %2931 = vmatprep.subr.bf16.mxu1 %v3400_v1 }
 0xb72   :  { %3160 = vtanh.f32 %v3761_v27 }
 0xb73   :  { %2932 = vmatpush3.bf16.msra.mxu1 %v3563_v10 }
 0xb74   :  { %2945 = vmatprep.subr.bf16.mxu1 %v3400_v1 }
 0xb7c   :  { %v3161_v29 = vpop.eup %3160 }
 0xb7d   :  { %909 = vrot.lane.b32.xlu0 %v3161_v29, %s3403_s0 }
 0xbef   :  { %v910_v30 = vpop.permute.xlu0 %909 }
 0xbf0   :  { %v3768_v31 = vmul.f32 %v3159_v16, %v910_v30 }
 0xbf2   :  { %v931_v32 = vpack.c.bf16 %v3768_v31, %v3768_v31 }
 0xbf4   :  { %933 = vrot.lane.b32.xlu0 %v931_v32, %s3395_s19 }
 0xc41   :  { %v1019_v24 = vpop.f32.mrb[24].mxu1 }
 0xc42   :  { %v1028_v40 = vadd.f32 %v1019_v24, %v3616_v41  ;;  %v2919_v42 = vpop.f32.mrb[25].mxu1 }
 0xc43   :  { %v1022_v43 = vpop.f32.mrb[26].mxu1 }
 0xc44   :  { %3162 = vtanh.f32 %v1028_v40  ;;  %v2920_v44 = vpop.f32.mrb[27].mxu1  ;;  %v2704_v41 = vmul.f32 -1.442695, %v1028_v40 }
 0xc46   :  { %3164 = vpow2.f32 %v2704_v41 }
 0xc4e   :  { %v3163_v45 = vpop.eup %3162 }
 0xc4f   :  { %1056 = vrot.lane.b32.xlu1 %v3163_v45, %s3403_s0 }
 0xc50   :  { %v3165_v48 = vpop.eup %3164 }
 0xc51   :  { %v1039_v49 = vadd.f32 1.0, %v3165_v48 }
 0xc53   :  { %3166 = vrcp.f32 %v1039_v49 }
 0xc5d   :  { %v3167_v50 = vpop.eup %3166 }
 0xc5e   :  { %v1054_v54 = vmul.f32 %v3167_v50, %v3744_v61 }
 0xc66   :  { %v934_v46 = vpop.permute.xlu0 %933 }
 0xc67   :  { %2910 = vmatmul.mubr.msk.bf16.vlgmr.msra.gmra.mrb[24].mxu0 %vm274_vm2, %v934_v46 }
 0xc68   :  { %2922 = vmatpush3.bf16.msra.mxu0 %v3541_v4  ;;  %2925 = vmatprep.mubr.msk.bf16.mxu0 %vm3402_vm0, %v3400_v1 }
 0xc69   :  { %2923 = vmatprep.subr.bf16.mxu0 %v3400_v1 }
 0xc6c   :  { %2924 = vmatpush3.bf16.msra.mxu0 %v3551_v7 }
 0xc6d   :  { %2937 = vmatprep.subr.bf16.mxu0 %v3400_v1 }
 0xcc1   :  { %v1057_v53 = vpop.permute.xlu1 %1056 }
 0xcc2   :  { %v1059_v52 = vmul.f32 %v3167_v50, %v1057_v53 }
 0xcc4   :  { %1061 = vrot.lane.b32.xlu1 %v1059_v52, %s3403_s0 }
 0xd36   :  { %v1062_v56 = vpop.permute.xlu1 %1061 }
 0xd37   :  { %v3784_v58 = vadd.f32 %v1062_v56, %v1054_v54 }
 0xd39   :  { %3168 = vtanh.f32 %v3784_v58 }
 0xd3a   :  { %v972_v60 = vpop.f32.mrb[24].mxu0 }
 0xd3b   :  { %v1026_v62 = vadd.f32 %v972_v60, %v3618_v47  ;;  %v2911_v0 = vpop.f32.mrb[25].mxu0 }
 0xd3c   :  { %v975_v3 = vpop.f32.mrb[26].mxu0 }
 0xd3d   :  { %3170 = vtanh.f32 %v1026_v62  ;;  %v2912_v25 = vpop.f32.mrb[27].mxu0  ;;  %v2703_v9 = vmul.f32 -1.442695, %v1026_v62 }
 0xd3f   :  { %3172 = vpow2.f32 %v2703_v9 }
 0xd43   :  { %v3169_v5 = vpop.eup %3168 }
 0xd44   :  { %1073 = vrot.lane.b32.xlu1 %v3169_v5, %s3403_s0 }
 0xd47   :  { %v3171_v6 = vpop.eup %3170 }
 0xd48   :  { %1045 = vrot.lane.b32.xlu0 %v3171_v6, %s3403_s0 }
 0xd49   :  { %v3173_v61 = vpop.eup %3172 }
 0xd4a   :  { %v1032_v11 = vadd.f32 1.0, %v3173_v61 }
 0xd4c   :  { %3174 = vrcp.f32 %v1032_v11 }
 0xd56   :  { %v3175_v57 = vpop.eup %3174 }
 0xd57   :  { %v1043_v19 = vmul.f32 %v3175_v57, %v3761_v27 }
 0xdb6   :  { %v1074_v63 = vpop.permute.xlu1 %1073 }
 0xdb7   :  { %v3790_v12 = vmul.f32 %v3167_v50, %v1074_v63 }
 0xdb9   :  { %v1136_v47 = vpack.c.bf16 %v3790_v12, %v3790_v12 }
 0xdba   :  { %v1046_v38 = vpop.permute.xlu0 %1045 }
 0xdbb   :  { %v1048_v16 = vmul.f32 %v3175_v57, %v1046_v38  ;;  %1138 = vrot.lane.b32.xlu1 %v1136_v47, %s3395_s19 }
 0xdbd   :  { %1050 = vrot.lane.b32.xlu0 %v1048_v16, %s3403_s0 }
 0xe2d   :  { %v1139_v34 = vpop.permute.xlu1 %1138 }
 0xe2e   :  { %2934 = vmatmul.mubr.msk.bf16.vlgmr.msra.gmra.mrb[28].mxu1 %vm274_vm2, %v1139_v34 }
 0xe2f   :  { %v1051_v21 = vpop.permute.xlu0 %1050  ;;  %2946 = vmatpush3.bf16.msra.mxu1 %v3556_v8  ;;  %2949 = vmatprep.mubr.msk.bf16.mxu1 %vm3402_vm0, %v3400_v1 }
 0xe30   :  { %v3801_v22 = vadd.f32 %v1051_v21, %v1043_v19  ;;  %2947 = vmatprep.subr.bf16.mxu1 %v3400_v1 }
 0xe32   :  { %3176 = vtanh.f32 %v3801_v22 }
 0xe33   :  { %2948 = vmatpush3.bf16.msra.mxu1 %v3563_v10 }
 0xe34   :  { %2961 = vmatprep.subr.bf16.mxu1 %v3400_v1 }
 0xe3c   :  { %v3177_v26 = vpop.eup %3176 }
 0xe3d   :  { %1067 = vrot.lane.b32.xlu0 %v3177_v26, %s3403_s0 }
 0xeaf   :  { %v1068_v27 = vpop.permute.xlu0 %1067 }
 0xeb0   :  { %v3808_v29 = vmul.f32 %v3175_v57, %v1068_v27 }
 0xeb2   :  { %v1089_v30 = vpack.c.bf16 %v3808_v29, %v3808_v29 }
 0xeb4   :  { %1091 = vrot.lane.b32.xlu0 %v1089_v30, %s3395_s19 }
 0xf01   :  { %v1177_v32 = vpop.f32.mrb[28].mxu1 }
 0xf02   :  { %v1186_v24 = vadd.f32 %v1177_v32, %v3612_v36  ;;  %v2935_v40 = vpop.f32.mrb[29].mxu1 }
 0xf03   :  { %v1180_v42 = vpop.f32.mrb[30].mxu1  ;;  %v3298_v40 = vld [vmem:[#allocation8] sm:$0xff]  }
 0xf04   :  { %3178 = vtanh.f32 %v1186_v24  ;;  %v2936_v43 = vpop.f32.mrb[31].mxu1  ;;  %v2708_v36 = vmul.f32 -1.442695, %v1186_v24  ;;  %v3299_v42 = vld [vmem:[#allocation8 + $0x8] sm:$0xff]  }
 0xf06   :  { %3180 = vpow2.f32 %v2708_v36 }
 0xf0e   :  { %v3179_v44 = vpop.eup %3178 }
 0xf0f   :  { %1214 = vrot.lane.b32.xlu1 %v3179_v44, %s3403_s0 }
 0xf10   :  { %v3181_v46 = vpop.eup %3180 }
 0xf11   :  { %v1197_v41 = vadd.f32 1.0, %v3181_v46 }
 0xf13   :  { %3182 = vrcp.f32 %v1197_v41 }
 0xf1d   :  { %v3183_v48 = vpop.eup %3182 }
 0xf26   :  { %v1092_v45 = vpop.permute.xlu0 %1091 }
 0xf27   :  { %2926 = vmatmul.mubr.msk.bf16.vlgmr.msra.gmra.mrb[28].mxu0 %vm274_vm2, %v1092_v45 }
 0xf28   :  { %2938 = vmatpush3.bf16.msra.mxu0 %v3541_v4  ;;  %2941 = vmatprep.mubr.msk.bf16.mxu0 %vm3402_vm0, %v3400_v1  ;;  %v1212_v4 = vmul.f32 %v3183_v48, %v3784_v58 }
 0xf29   :  { %2939 = vmatprep.subr.bf16.mxu0 %v3400_v1 }
 0xf2c   :  { %2940 = vmatpush3.bf16.msra.mxu0 %v3551_v7 }
 0xf2d   :  { %2953 = vmatprep.subr.bf16.mxu0 %v3400_v1 }
 0xf81   :  { %v1215_v49 = vpop.permute.xlu1 %1214 }
 0xf82   :  { %v1217_v50 = vmul.f32 %v3183_v48, %v1215_v49 }
 0xf84   :  { %1219 = vrot.lane.b32.xlu1 %v1217_v50, %s3403_s0 }
 0xff6   :  { %v1220_v53 = vpop.permute.xlu1 %1219 }
 0xff7   :  { %v3824_v52 = vadd.f32 %v1220_v53, %v1212_v4 }
 0xff9   :  { %3184 = vtanh.f32 %v3824_v52 }
 0xffa   :  { %v1130_v7 = vpop.f32.mrb[28].mxu0 }
 0xffb   :  { %v1184_v54 = vadd.f32 %v1130_v7, %v3623_v51  ;;  %v2927_v56 = vpop.f32.mrb[29].mxu0 }
 0xffc   :  { %v1133_v60 = vpop.f32.mrb[30].mxu0 }
 0xffd   :  { %3186 = vtanh.f32 %v1184_v54  ;;  %v2928_v62 = vpop.f32.mrb[31].mxu0  ;;  %v2707_v25 = vmul.f32 -1.442695, %v1184_v54 }
 0xfff   :  { %3188 = vpow2.f32 %v2707_v25 }
0x1003   :  { %v3185_v0 = vpop.eup %3184 }
0x1004   :  { %1231 = vrot.lane.b32.xlu1 %v3185_v0, %s3403_s0 }
0x1007   :  { %v3187_v3 = vpop.eup %3186 }
0x1008   :  { %1203 = vrot.lane.b32.xlu0 %v3187_v3, %s3403_s0 }
0x1009   :  { %v3189_v58 = vpop.eup %3188 }
0x100a   :  { %v1190_v5 = vadd.f32 1.0, %v3189_v58 }
0x100c   :  { %3190 = vrcp.f32 %v1190_v5 }
0x1016   :  { %v3191_v61 = vpop.eup %3190 }
0x1017   :  { %v1201_v57 = vmul.f32 %v3191_v61, %v3801_v22 }
0x1076   :  { %v1232_v6 = vpop.permute.xlu1 %1231 }
0x1077   :  { %v3830_v9 = vmul.f32 %v3183_v48, %v1232_v6 }
0x1079   :  { %v1294_v51 = vpack.c.bf16 %v3830_v9, %v3830_v9 }
0x107a   :  { %v1204_v11 = vpop.permute.xlu0 %1203 }
0x107b   :  { %v1206_v63 = vmul.f32 %v3191_v61, %v1204_v11  ;;  %1296 = vrot.lane.b32.xlu1 %v1294_v51, %s3395_s19 }
0x107d   :  { %1208 = vrot.lane.b32.xlu0 %v1206_v63, %s3403_s0 }
0x10ed   :  { %v1297_v47 = vpop.permute.xlu1 %1296 }
0x10ee   :  { %2950 = vmatmul.mubr.msk.bf16.vlgmr.msra.gmra.mrb[32].mxu1 %vm274_vm2, %v1297_v47 }
0x10ef   :  { %v1209_v38 = vpop.permute.xlu0 %1208  ;;  %2962 = vmatpush3.bf16.msra.mxu1 %v3556_v8  ;;  %2965 = vmatprep.mubr.msk.bf16.mxu1 %vm3402_vm0, %v3400_v1 }
0x10f0   :  { %v3841_v16 = vadd.f32 %v1209_v38, %v1201_v57  ;;  %2963 = vmatprep.subr.bf16.mxu1 %v3400_v1 }
0x10f2   :  { %3192 = vtanh.f32 %v3841_v16 }
0x10f3   :  { %2964 = vmatpush3.bf16.msra.mxu1 %v3563_v10 }
0x10fc   :  { %v3193_v34 = vpop.eup %3192 }
0x10fd   :  { %1225 = vrot.lane.b32.xlu0 %v3193_v34, %s3403_s0 }
0x116f   :  { %v1226_v19 = vpop.permute.xlu0 %1225 }
0x1170   :  { %v3847_v21 = vmul.f32 %v3191_v61, %v1226_v19 }
0x1172   :  { %v1247_v8 = vpack.c.bf16 %v3847_v21, %v3847_v21 }
0x1174   :  { %1249 = vrot.lane.b32.xlu0 %v1247_v8, %s3395_s19 }
0x11c1   :  { %v1335_v22 = vpop.f32.mrb[32].mxu1 }
0x11c2   :  { %v1344_v26 = vadd.f32 %v1335_v22, %v3608_v28  ;;  %v2951_v27 = vpop.f32.mrb[33].mxu1 }
0x11c3   :  { %v1338_v30 = vpop.f32.mrb[34].mxu1 }
0x11c4   :  { %3194 = vtanh.f32 %v1344_v26  ;;  %v2952_v32 = vpop.f32.mrb[35].mxu1  ;;  %v2712_v28 = vmul.f32 -1.442695, %v1344_v26 }
0x11c6   :  { %3196 = vpow2.f32 %v2712_v28 }
0x11ce   :  { %v3195_v24 = vpop.eup %3194 }
0x11cf   :  { %1372 = vrot.lane.b32.xlu1 %v3195_v24, %s3403_s0 }
0x11d0   :  { %v3197_v43 = vpop.eup %3196 }
0x11d1   :  { %v1355_v44 = vadd.f32 1.0, %v3197_v43 }
0x11d3   :  { %3198 = vrcp.f32 %v1355_v44 }
0x11dd   :  { %v3199_v45 = vpop.eup %3198 }
0x11de   :  { %v1370_v41 = vmul.f32 %v3199_v45, %v3824_v52 }
0x11e6   :  { %v1250_v10 = vpop.permute.xlu0 %1249 }
0x11e7   :  { %2942 = vmatmul.mubr.msk.bf16.vlgmr.msra.gmra.mrb[32].mxu0 %vm274_vm2, %v1250_v10 }
0x11e8   :  { %2954 = vmatpush3.bf16.msra.mxu0 %v3298_v40  ;;  %2957 = vmatprep.mubr.msk.bf16.mxu0 %vm3402_vm0, %v3400_v1 }
0x11e9   :  { %2955 = vmatprep.subr.bf16.mxu0 %v3400_v1 }
0x11ec   :  { %2956 = vmatpush3.bf16.msra.mxu0 %v3299_v42 }
0x1241   :  { %v1373_v36 = vpop.permute.xlu1 %1372 }
0x1242   :  { %v1375_v46 = vmul.f32 %v3199_v45, %v1373_v36 }
0x1244   :  { %1377 = vrot.lane.b32.xlu1 %v1375_v46, %s3403_s0 }
0x12b6   :  { %v1378_v48 = vpop.permute.xlu1 %1377 }
0x12b7   :  { %v3860_v49 = vadd.f32 %v1378_v48, %v1370_v41 }
0x12b9   :  { %3200 = vtanh.f32 %v3860_v49 }
0x12ba   :  { %v1288_v50 = vpop.f32.mrb[32].mxu0 }
0x12bb   :  { %v1342_v4 = vadd.f32 %v1288_v50, %v3627_v55  ;;  %v2943_v53 = vpop.f32.mrb[33].mxu0 }
0x12bc   :  { %v1291_v7 = vpop.f32.mrb[34].mxu0  ;;  %v3078_v53 = vld [vmem:[%s4182_s6] ss:$8 sps:$4 sm:$0xff]  }
0x12bd   :  { %3202 = vtanh.f32 %v1342_v4  ;;  %v2944_v54 = vpop.f32.mrb[35].mxu0  ;;  %v2711_v62 = vmul.f32 -1.442695, %v1342_v4  ;;  %v3083_v7 = vld [vmem:[%s4182_s6 + $0x14] ss:$8 sps:$4 sm:$0xff]  }
0x12bf   :  { %3204 = vpow2.f32 %v2711_v62  ;;  %v3085_v62 = vld [vmem:[%s4181_s5] ss:$8 sps:$4 sm:$0xff]  }
0x12c3   :  { %v3201_v56 = vpop.eup %3200 }
0x12c4   :  { %1389 = vrot.lane.b32.xlu1 %v3201_v56, %s3403_s0 }
0x12c7   :  { %v3203_v60 = vpop.eup %3202 }
0x12c8   :  { %1361 = vrot.lane.b32.xlu0 %v3203_v60, %s3403_s0  ;;  %v3087_v60 = vld [vmem:[%s4181_s5 + $0x4] ss:$8 sps:$4 sm:$0xff]  }
0x12c9   :  { %v3205_v52 = vpop.eup %3204  ;;  %1731 = vmatprep.subr.bf16.mxu1 %v3087_v60 }
0x12ca   :  { %v1348_v0 = vadd.f32 1.0, %v3205_v52  ;;  %v3090_v52 = vld [vmem:[%s4181_s5 + $0x14] ss:$8 sps:$4 sm:$0xff]  }
0x12cc   :  { %3206 = vrcp.f32 %v1348_v0  ;;  %v3088_v0 = vld [vmem:[%s4181_s5 + $0x10] ss:$8 sps:$4 sm:$0xff]  }
0x12d6   :  { %v3207_v5 = vpop.eup %3206 }
0x12d7   :  { %v1359_v61 = vmul.f32 %v3207_v5, %v3841_v16 }
0x1336   :  { %v1390_v3 = vpop.permute.xlu1 %1389 }
0x1337   :  { %v1392_v25 = vmul.f32 %v3199_v45, %v1390_v3 }
0x1339   :  { %v1452_v58 = vpack.c.bf16 %v1392_v25, %v1392_v25 }
0x133a   :  { %v1362_v55 = vpop.permute.xlu0 %1361 }
0x133b   :  { %v1364_v6 = vmul.f32 %v3207_v5, %v1362_v55  ;;  %1454 = vrot.lane.b32.xlu1 %v1452_v58, %s3395_s19  ;;  %v3953_v55 = vld [vmem:[%s4184_s8 + $0x8] sm:$0xff]  }
0x133d   :  { %1366 = vrot.lane.b32.xlu0 %v1364_v6, %s3403_s0 }
0x13ad   :  { %v1455_v51 = vpop.permute.xlu1 %1454 }
0x13ae   :  { %2966 = vmatmul.mubr.msk.bf16.vlgmr.msra.gmra.mrb[36].mxu1 %vm274_vm2, %v1455_v51 }
0x13af   :  { %v1367_v11 = vpop.permute.xlu0 %1366  ;;  %1763 = vmatprep.mubr.bf16.mxu1 %v3401_v2  ;;  %1732 = vmatpush1.bf16.msra.mxu1 %v3085_v62 }
0x13b0   :  { %v3871_v63 = vadd.f32 %v1367_v11, %v1359_v61  ;;  %1733 = vmatprep.subr.bf16.mxu1 %v3090_v52 }
0x13b2   :  { %3208 = vtanh.f32 %v3871_v63 }
0x13b3   :  { %1734 = vmatpush1.bf16.msra.mxu1 %v3088_v0 }
0x13b4   :  { %2977 = vmatprep.subr.bf16.mxu1 %v3400_v1 }
0x13bc   :  { %v3209_v47 = vpop.eup %3208 }
0x13bd   :  { %1383 = vrot.lane.b32.xlu0 %v3209_v47, %s3403_s0 }
0x13c1   :  { %1400 = vrot.lane.b32.xlu0 %v1392_v25, %s3395_s19 }
0x142f   :  { %v1384_v57 = vpop.permute.xlu0 %1383 }
0x1430   :  { %v3876_v38 = vmul.f32 %v3207_v5, %v1384_v57 }
0x1432   :  { %v1405_v34 = vpack.c.bf16 %v3876_v38, %v3876_v38 }
0x1433   :  { %v1401_v19 = vpop.permute.xlu0 %1400 }
0x1434   :  { %1404 = vst.msk [vmem:[#allocation4 + $0x8] sm:$0xff] %vm274_vm2, %v1401_v19  ;;  %1407 = vrot.lane.b32.xlu0 %v1405_v34, %s3395_s19 }
0x1438   :  { %1242 = vrot.lane.b32.xlu0 %v3830_v9, %s3395_s19 }
0x143b   :  { %v1579_v5 = vld [vmem:[#allocation4 + $0x8] sm:$0xff] }
0x143c   :  { %926 = vrot.lane.b32.xlu0 %v3750_v13, %s3395_s19 }
0x1440   :  { %598 = vrot.lane.b32.xlu0 %v3671_v20, %s3395_s19 }
0x1444   :  { %592 = vrot.lane.b32.xlu0 %v3689_v37, %s3395_s19 }
0x1481   :  { %v1493_v16 = vpop.f32.mrb[36].mxu1 }
0x1482   :  { %v1502_v8 = vadd.f32 %v1493_v16, %v3604_v23  ;;  %v2967_v22 = vpop.f32.mrb[37].mxu1 }
0x1483   :  { %v1496_v26 = vpop.f32.mrb[38].mxu1 }
0x1484   :  { %3210 = vtanh.f32 %v1502_v8  ;;  %v2968_v27 = vpop.f32.mrb[39].mxu1  ;;  %v2716_v32 = vmul.f32 -1.442695, %v1502_v8 }
0x1486   :  { %3212 = vpow2.f32 %v2716_v32 }
0x148e   :  { %v3211_v30 = vpop.eup %3210 }
0x148f   :  { %1530 = vrot.lane.b32.xlu1 %v3211_v30, %s3403_s0 }
0x1490   :  { %v3213_v24 = vpop.eup %3212 }
0x1491   :  { %v1513_v10 = vadd.f32 1.0, %v3213_v24 }
0x1493   :  { %3214 = vrcp.f32 %v1513_v10 }
0x149d   :  { %v3215_v40 = vpop.eup %3214 }
0x149e   :  { %v1528_v43 = vmul.f32 %v3215_v40, %v3860_v49  ;;  %v3080_v49 = vld [vmem:[%s4182_s6 + $0x4] ss:$8 sps:$4 sm:$0xff]  }
0x149f   :  { %1626 = vmatprep.subr.bf16.mxu0 %v3080_v49 }
0x14a6   :  { %v1408_v9 = vpop.permute.xlu0 %1407 }
0x14a7   :  { %2958 = vmatmul.mubr.msk.bf16.vlgmr.msra.gmra.mrb[36].mxu0 %vm274_vm2, %v1408_v9 }
0x14a8   :  { %1658 = vmatprep.mubr.bf16.mxu0 %v3401_v2  ;;  %1627 = vmatpush1.bf16.msra.mxu0 %v3078_v53 }
0x14a9   :  { %1628 = vmatprep.subr.bf16.mxu0 %v3083_v7 }
0x14aa   :  { %v1243_v13 = vpop.permute.xlu0 %1242 }
0x14ab   :  { %1246 = vst.msk [vmem:[#allocation4 + $0x10] sm:$0xff] %vm274_vm2, %v1243_v13 }
0x14ae   :  { %v927_v20 = vpop.permute.xlu0 %926 }
0x14af   :  { %930 = vst.msk [vmem:[#allocation4 + $0x20] sm:$0xff] %vm274_vm2, %v927_v20 }
0x14b2   :  { %v599_v37 = vpop.permute.xlu0 %598  ;;  %v1580_v61 = vld [vmem:[#allocation4 + $0x10] sm:$0xff] }
0x14b3   :  { %602 = vst.msk [vmem:[#allocation4 + $0x30] sm:$0xff] %vm274_vm2, %v599_v37 }
0x14b6   :  { %v593_v23 = vpop.permute.xlu0 %592  ;;  %v1582_v57 = vld [vmem:[#allocation4 + $0x20] sm:$0xff] }
0x14b7   :  { %596 = vst.msk [vmem:[#allocation3 + $0x8] sm:$0xff] %vm274_vm2, %v593_v23 }
0x14ba   :  { %v1584_v26 = vld [vmem:[#allocation4 + $0x30] sm:$0xff] }
0x14be   :  { %v1563_v19 = vld [vmem:[#allocation3 + $0x8] sm:$0xff] }
0x1501   :  { %v1531_v42 = vpop.permute.xlu1 %1530 }
0x1502   :  { %v1533_v28 = vmul.f32 %v3215_v40, %v1531_v42 }
0x1504   :  { %1535 = vrot.lane.b32.xlu1 %v1533_v28, %s3403_s0 }
0x1576   :  { %v1536_v44 = vpop.permute.xlu1 %1535 }
0x1577   :  { %v1538_v45 = vadd.f32 %v1536_v44, %v1528_v43 }
0x1579   :  { %3216 = vtanh.f32 %v1538_v45 }
0x157a   :  { %v1446_v36 = vpop.f32.mrb[36].mxu0 }
0x157b   :  { %v3901_v46 = vadd.f32 %v1446_v36, %v3631_v59  ;;  %v2959_v41 = vpop.f32.mrb[37].mxu0  ;;  %v3081_v59 = vld [vmem:[%s4182_s6 + $0x10] ss:$8 sps:$4 sm:$0xff]  }
0x157c   :  { %v1449_v48 = vpop.f32.mrb[38].mxu0  ;;  %1629 = vmatpush1.bf16.msra.mxu0 %v3081_v59 }
0x157d   :  { %v2960_v50 = vpop.f32.mrb[39].mxu0  ;;  %2969 = vmatprep.subr.bf16.mxu0 %v3400_v1 }
0x1583   :  { %v3217_v4 = vpop.eup %3216 }
0x1584   :  { %1547 = vrot.lane.b32.xlu1 %v3217_v4, %s3403_s0  ;;  %v3991_v4 = vld [vmem:[%s4183_s7] sm:$0x3] }
0x1585   :  { %v4000_v7 = vrot.slane %v3991_v4, %v114_v15 }
0x15f6   :  { %v1548_v54 = vpop.permute.xlu1 %1547 }
0x15f7   :  { %v1550_v56 = vmul.f32 %v3215_v40, %v1548_v54 }
0x15f9   :  { %1558 = vrot.lane.b32.xlu1 %v1550_v56, %s3395_s19 }
0x15fd   :  { %1084 = vrot.lane.b32.xlu1 %v3790_v12, %s3395_s19 }
0x1601   :  { %762 = vrot.lane.b32.xlu1 %v3710_v18, %s3395_s19  ;;  %v3944_v18 = vld [vmem:[%s4184_s8] sm:$0xff]  }
0x1605   :  { %434 = vrot.lane.b32.xlu1 %v3646_v39, %s3395_s19 }
0x1609   :  { %429 = vrot.lane.b32.xlu1 %v3641_v33, %s3395_s19 }
0x166b   :  { %v1559_v12 = vpop.permute.xlu1 %1558 }
0x166c   :  { %1561 = vst.msk [vmem:[#allocation4] sm:$0xff] %vm274_vm2, %v1559_v12 }
0x166f   :  { %v1085_v3 = vpop.permute.xlu1 %1084 }
0x1670   :  { %1088 = vst.msk [vmem:[#allocation4 + $0x18] sm:$0xff] %vm274_vm2, %v1085_v3 }
0x1673   :  { %v763_v25 = vpop.permute.xlu1 %762  ;;  %v1578_v58 = vld [vmem:[#allocation4] sm:$0xff] }
0x1674   :  { %766 = vst.msk [vmem:[#allocation4 + $0x28] sm:$0xff] %vm274_vm2, %v763_v25  ;;  %v1586_v39 = vpack.c.bf16 %v1579_v5, %v1578_v58 }
0x1676   :  { %2721 = vmatmul.mubr.msk.bf16.vlgmr.msra.gmra.mrb[40].mxu0 %vm274_vm2, %v1586_v39 }
0x1677   :  { %2970 = vmatpush3.bf16.msra.mxu0 %v3944_v18  ;;  %v435_v33 = vpop.permute.xlu1 %434  ;;  %1668 = vmatprep.mubr.bf16.mxu0 %v3401_v2  ;;  %v1581_v6 = vld [vmem:[#allocation4 + $0x18] sm:$0xff] }
0x1678   :  { %438 = vst.msk [vmem:[#allocation4 + $0x38] sm:$0xff] %vm274_vm2, %v435_v33  ;;  %2971 = vmatprep.subr.bf16.mxu0 %v3400_v1  ;;  %v1587_v11 = vpack.c.bf16 %v1581_v6, %v1580_v61 }
0x167b   :  { %v430_v51 = vpop.permute.xlu1 %429  ;;  %2972 = vmatpush3.bf16.msra.mxu0 %v3953_v55  ;;  %v1583_v47 = vld [vmem:[#allocation4 + $0x28] sm:$0xff] }
0x167c   :  { %432 = vst.msk [vmem:[#allocation3] sm:$0xff] %vm274_vm2, %v430_v51  ;;  %2985 = vmatprep.subr.bf16.mxu0 %v3400_v1  ;;  %v1588_v16 = vpack.c.bf16 %v1583_v47, %v1582_v57  ;;  %v2715_v47 = vmul.f32 -1.442695, %v3901_v46 }
0x167e   :  { %2722 = vmatmul.mubr.msk.bf16.gmra.mrb[44].mxu0 %vm274_vm2, %v1587_v11 }
0x167f   :  { %1678 = vmatprep.mubr.bf16.mxu0 %v3401_v2  ;;  %v1585_v22 = vld [vmem:[#allocation4 + $0x38] sm:$0xff] }
0x1680   :  { %v1589_v27 = vpack.c.bf16 %v1585_v22, %v1584_v26 }
0x1683   :  { %v1562_v34 = vld [vmem:[#allocation3] sm:$0xff] }
0x1684   :  { %v1570_v8 = vpack.c.bf16 %v1563_v19, %v1562_v34 }
0x1686   :  { %2723 = vmatmul.mubr.msk.bf16.gmra.mrb[48].mxu0 %vm274_vm2, %v1588_v16  ;;  %2729 = vmatmul.mubr.msk.bf16.vlgmr.msra.gmra.mrb[40].mxu1 %vm274_vm2, %v1570_v8 }
0x1687   :  { %1688 = vmatprep.mubr.bf16.mxu0 %v3401_v2  ;;  %1773 = vmatprep.mubr.bf16.mxu1 %v3401_v2 }
0x168e   :  { %2724 = vmatmul.mubr.msk.bf16.gmra.mrb[52].mxu0 %vm274_vm2, %v1589_v27 }
0x168f   :  { %2973 = vmatprep.mubr.msk.bf16.mxu0 %vm3402_vm0, %v3400_v1 }
0x1696   :  { %2974 = vmatmul.mubr.bf16.vlgmr.msra.gmra.mrb[56].mxu0 %v3401_v2 }
0x1697   :  { %2986 = vmatpush3.bf16.msra.mxu0 %v3944_v18  ;;  %2989 = vmatprep.mubr.msk.bf16.mxu0 %vm3402_vm0, %v3400_v1 }
0x1698   :  { %2987 = vmatprep.subr.bf16.mxu0 %v3400_v1 }
0x169b   :  { %2988 = vmatpush3.bf16.msra.mxu0 %v3953_v55 }
0x169c   :  { %3001 = vmatprep.subr.bf16.mxu0 %v3400_v1 }
0x1749   :  { %v1660_v30 = vpop.f32.mrb[40].mxu0 }
0x174a   :  { %v1662_v9 = vpop.f32.mrb[41].mxu0 }
0x174b   :  { %v1664_v13 = vpop.f32.mrb[42].mxu0 }
0x174c   :  { %v1666_v20 = vpop.f32.mrb[43].mxu0 }
0x1751   :  { %v3976_v37 = vpop.f32.mrb[44].mxu0 }
0x1752   :  { %v1672_v23 = vpop.f32.mrb[45].mxu0 }
0x1753   :  { %v3978_v32 = vpop.f32.mrb[46].mxu0 }
0x1754   :  { %v1676_v24 = vpop.f32.mrb[47].mxu0 }
0x1759   :  { %v3980_v10 = vpop.f32.mrb[48].mxu0  ;;  %v1765_v40 = vpop.f32.mrb[40].mxu1 }
0x175a   :  { %v1766_v42 = vadd.f32 %v1765_v40, %v1660_v30  ;;  %v1682_v28 = vpop.f32.mrb[49].mxu0  ;;  %v1767_v43 = vpop.f32.mrb[41].mxu1 }
0x175b   :  { %v3982_v44 = vpop.f32.mrb[50].mxu0  ;;  %v1769_v45 = vpop.f32.mrb[42].mxu1 }
0x175c   :  { %v3984_v36 = vadd.f32 %v1769_v45, %v1664_v13  ;;  %v1686_v41 = vpop.f32.mrb[51].mxu0  ;;  %v1771_v48 = vpop.f32.mrb[43].mxu1  ;;  %v1816_v54 = vadd.f32 %v4000_v7, %v1766_v42 }
0x175e   :  { %v1818_v42 = vadd.f32 %v4000_v7, %v3984_v36 }
0x1761   :  { %v3986_v50 = vpop.f32.mrb[52].mxu0 }
0x1762   :  { %v1692_v53 = vpop.f32.mrb[53].mxu0 }
0x1763   :  { %v3993_v49 = vpop.f32.mrb[54].mxu0 }
0x1764   :  { %v3995_v59 = vpop.f32.mrb[55].mxu0 }
0x1769   :  { %v1902_v56 = vpop.f32.mrb[56].mxu0 }
0x176a   :  { %v1961_v60 = vadd.f32 %v1902_v56, %v1816_v54  ;;  %v2975_v62 = vpop.f32.mrb[57].mxu0 }
0x176b   :  { %v1905_v52 = vpop.f32.mrb[58].mxu0 }
0x176c   :  { %3218 = vtanh.f32 %v1961_v60  ;;  %v2976_v0 = vpop.f32.mrb[59].mxu0  ;;  %v2737_v3 = vmul.f32 -1.442695, %v1961_v60 }
0x176e   :  { %3220 = vpow2.f32 %v2737_v3  ;;  %v3092_v3 = vld [vmem:[#allocation11] sm:$0xff]  }
0x176f   :  { %2978 = vmatpush3.bf16.msra.mxu1 %v3092_v3 }
0x1770   :  { %2979 = vmatprep.subr.bf16.mxu1 %v3400_v1 }
0x1776   :  { %v3219_v12 = vpop.eup %3218 }
0x1777   :  { %1980 = vrot.lane.b32.xlu1 %v3219_v12, %s3403_s0 }
0x1778   :  { %v3221_v25 = vpop.eup %3220 }
0x1779   :  { %v1967_v58 = vadd.f32 1.0, %v3221_v25  ;;  %v3093_v25 = vld [vmem:[#allocation11 + $0x8] sm:$0xff]  }
0x177a   :  { %2980 = vmatpush3.bf16.msra.mxu1 %v3093_v25 }
0x177b   :  { %3222 = vrcp.f32 %v1967_v58  ;;  %2993 = vmatprep.subr.bf16.mxu1 %v3400_v1 }
0x1785   :  { %v3223_v5 = vpop.eup %3222 }
0x1786   :  { %v1978_v33 = vmul.f32 0.0, %v3223_v5 }
0x17e9   :  { %v1981_v39 = vpop.permute.xlu1 %1980 }
0x17ea   :  { %v1983_v15 = vmul.f32 %v3223_v5, %v1981_v39 }
0x17ec   :  { %1985 = vrot.lane.b32.xlu0 %v1983_v15, %s3403_s0 }
0x185e   :  { %v1986_v6 = vpop.permute.xlu0 %1985 }
0x185f   :  { %v1988_v51 = vadd.f32 %v1986_v6, %v1978_v33 }
0x1861   :  { %3224 = vtanh.f32 %v1988_v51 }
0x1862   :  { %3226 = vtanh.f32 %v3901_v46 }
0x1863   :  { %3228 = vpow2.f32 %v2715_v47 }
0x186b   :  { %v3225_v61 = vpop.eup %3224 }
0x186c   :  { %2002 = vrot.lane.b32.xlu1 %v3225_v61, %s3403_s0  ;;  %v3227_v11 = vpop.eup %3226 }
0x186d   :  { %v3229_v57 = vpop.eup %3228 }
0x186e   :  { %v1506_v34 = vadd.f32 1.0, %v3229_v57 }
0x1870   :  { %1519 = vrot.lane.b32.xlu1 %v3227_v11, %s3403_s0  ;;  %3230 = vrcp.f32 %v1506_v34 }
0x187a   :  { %v3231_v22 = vpop.eup %3230 }
0x187b   :  { %v1517_v9 = vmul.f32 %v3231_v22, %v3871_v63 }
0x18de   :  { %v2003_v19 = vpop.permute.xlu1 %2002 }
0x18df   :  { %v2005_v16 = vmul.f32 %v3223_v5, %v2003_v19 }
0x18e1   :  { %v2012_v8 = vpack.c.bf16 %v2005_v16, %v2005_v16 }
0x18e2   :  { %v1520_v26 = vpop.permute.xlu1 %1519 }
0x18e3   :  { %v1522_v27 = vmul.f32 %v3231_v22, %v1520_v26  ;;  %2014 = vrot.lane.b32.xlu0 %v2012_v8, %s3395_s19 }
0x18e5   :  { %1524 = vrot.lane.b32.xlu1 %v1522_v27, %s3403_s0 }
0x1955   :  { %v2015_v30 = vpop.permute.xlu0 %2014 }
0x1956   :  { %2990 = vmatmul.mubr.msk.bf16.vlgmr.msra.gmra.mrb[60].mxu0 %vm274_vm2, %v2015_v30 }
0x1957   :  { %v1525_v46 = vpop.permute.xlu1 %1524  ;;  %3002 = vmatpush3.bf16.msra.mxu0 %v3944_v18  ;;  %3005 = vmatprep.mubr.msk.bf16.mxu0 %vm3402_vm0, %v3400_v1 }
0x1958   :  { %v1527_v13 = vadd.f32 %v1525_v46, %v1517_v9  ;;  %3003 = vmatprep.subr.bf16.mxu0 %v3400_v1 }
0x195a   :  { %3232 = vtanh.f32 %v1527_v13 }
0x195b   :  { %3004 = vmatpush3.bf16.msra.mxu0 %v3953_v55 }
0x195c   :  { %3017 = vmatprep.subr.bf16.mxu0 %v3400_v1 }
0x1964   :  { %v3233_v20 = vpop.eup %3232 }
0x1965   :  { %1541 = vrot.lane.b32.xlu1 %v3233_v20, %s3403_s0 }
0x1969   :  { %756 = vrot.lane.b32.xlu1 %v3728_v35, %s3395_s19 }
0x196d   :  { %1078 = vrot.lane.b32.xlu1 %v3808_v29, %s3395_s19 }
0x1971   :  { %1394 = vrot.lane.b32.xlu1 %v3876_v38, %s3395_s19 }
0x19d7   :  { %v1542_v63 = vpop.permute.xlu1 %1541 }
0x19d8   :  { %v1544_v12 = vmul.f32 %v3231_v22, %v1542_v63 }
0x19db   :  { %v757_v23 = vpop.permute.xlu1 %756 }
0x19dc   :  { %760 = vst.msk [vmem:[#allocation3 + $0x10] sm:$0xff] %vm274_vm2, %v757_v23 }
0x19df   :  { %v1079_v24 = vpop.permute.xlu1 %1078 }
0x19e0   :  { %1082 = vst.msk [vmem:[#allocation3 + $0x20] sm:$0xff] %vm274_vm2, %v1079_v24 }
0x19e3   :  { %v1395_v40 = vpop.permute.xlu1 %1394  ;;  %v1564_v33 = vld [vmem:[#allocation3 + $0x10] sm:$0xff] }
0x19e4   :  { %1398 = vst.msk [vmem:[#allocation3 + $0x30] sm:$0xff] %vm274_vm2, %v1395_v40 }
0x19e7   :  { %v1566_v11 = vld [vmem:[#allocation3 + $0x20] sm:$0xff] }
0x19eb   :  { %v1568_v34 = vld [vmem:[#allocation3 + $0x30] sm:$0xff] }
0x1a29   :  { %v2053_v35 = vpop.f32.mrb[60].mxu0 }
0x1a2a   :  { %v2060_v28 = vadd.f32 %v2053_v35, %v1818_v42  ;;  %v2991_v43 = vpop.f32.mrb[61].mxu0 }
0x1a2b   :  { %v2056_v29 = vpop.f32.mrb[62].mxu0 }
0x1a2c   :  { %3234 = vtanh.f32 %v2060_v28  ;;  %v2992_v45 = vpop.f32.mrb[63].mxu0  ;;  %v2740_v41 = vmul.f32 -1.442695, %v2060_v28 }
0x1a2e   :  { %3236 = vpow2.f32 %v2740_v41 }
0x1a36   :  { %v3235_v38 = vpop.eup %3234 }
0x1a37   :  { %2070 = vrot.lane.b32.xlu0 %v3235_v38, %s3403_s0 }
0x1a38   :  { %v3237_v48 = vpop.eup %3236 }
0x1a39   :  { %v2064_v53 = vadd.f32 1.0, %v3237_v48 }
0x1a3b   :  { %3238 = vrcp.f32 %v2064_v53 }
0x1a45   :  { %v3239_v54 = vpop.eup %3238 }
0x1a46   :  { %v2068_v36 = vmul.f32 %v3239_v54, %v1988_v51 }
0x1aa9   :  { %v2071_v56 = vpop.permute.xlu0 %2070 }
0x1aaa   :  { %v2073_v60 = vmul.f32 %v3239_v54, %v2071_v56 }
0x1aac   :  { %2075 = vrot.lane.b32.xlu0 %v2073_v60, %s3403_s0 }
0x1b1e   :  { %v2076_v62 = vpop.permute.xlu0 %2075 }
0x1b1f   :  { %v4033_v52 = vadd.f32 %v2076_v62, %v2068_v36 }
0x1b21   :  { %3240 = vtanh.f32 %v4033_v52 }
0x1b2b   :  { %v3241_v0 = vpop.eup %3240 }
0x1b2c   :  { %2081 = vrot.lane.b32.xlu0 %v3241_v0, %s3403_s0 }
0x1b30   :  { %920 = vrot.lane.b32.xlu0 %v3768_v31, %s3395_s19 }
0x1b34   :  { %1236 = vrot.lane.b32.xlu0 %v3847_v21, %s3395_s19 }
0x1b38   :  { %1552 = vrot.lane.b32.xlu0 %v1544_v12, %s3395_s19 }
0x1b9e   :  { %v2082_v58 = vpop.permute.xlu0 %2081 }
0x1b9f   :  { %v2084_v5 = vmul.f32 %v3239_v54, %v2082_v58 }
0x1ba1   :  { %v2085_v39 = vpack.c.bf16 %v2084_v5, %v2084_v5 }
0x1ba2   :  { %v921_v15 = vpop.permute.xlu0 %920 }
0x1ba3   :  { %924 = vst.msk [vmem:[#allocation3 + $0x18] sm:$0xff] %vm274_vm2, %v921_v15  ;;  %2087 = vrot.lane.b32.xlu1 %v2085_v39, %s3395_s19 }
0x1ba6   :  { %v1237_v31 = vpop.permute.xlu0 %1236 }
0x1ba7   :  { %1240 = vst.msk [vmem:[#allocation3 + $0x28] sm:$0xff] %vm274_vm2, %v1237_v31 }
0x1baa   :  { %v1553_v21 = vpop.permute.xlu0 %1552  ;;  %v1565_v6 = vld [vmem:[#allocation3 + $0x18] sm:$0xff] }
0x1bab   :  { %1556 = vst.msk [vmem:[#allocation3 + $0x38] sm:$0xff] %vm274_vm2, %v1553_v21  ;;  %v1571_v51 = vpack.c.bf16 %v1565_v6, %v1564_v33 }
0x1bad   :  { %2730 = vmatmul.mubr.msk.bf16.gmra.mrb[44].mxu1 %vm274_vm2, %v1571_v51 }
0x1bae   :  { %1783 = vmatprep.mubr.bf16.mxu1 %v3401_v2  ;;  %v1567_v61 = vld [vmem:[#allocation3 + $0x28] sm:$0xff] }
0x1baf   :  { %v1572_v47 = vpack.c.bf16 %v1567_v61, %v1566_v11 }
0x1bb2   :  { %v1569_v57 = vld [vmem:[#allocation3 + $0x38] sm:$0xff] }
0x1bb3   :  { %v1573_v19 = vpack.c.bf16 %v1569_v57, %v1568_v34 }
0x1bb5   :  { %2731 = vmatmul.mubr.msk.bf16.gmra.mrb[48].mxu1 %vm274_vm2, %v1572_v47 }
0x1bb6   :  { %1793 = vmatprep.mubr.bf16.mxu1 %v3401_v2 }
0x1bbd   :  { %2732 = vmatmul.mubr.msk.bf16.gmra.mrb[52].mxu1 %vm274_vm2, %v1573_v19 }
0x1bbe   :  { %2981 = vmatprep.mubr.msk.bf16.mxu1 %vm3402_vm0, %v3400_v1 }
0x1bc5   :  { %2982 = vmatmul.mubr.bf16.vlgmr.msra.gmra.mrb[56].mxu1 %v3401_v2 }
0x1bc6   :  { %2994 = vmatpush3.bf16.msra.mxu1 %v3944_v18  ;;  %2997 = vmatprep.mubr.msk.bf16.mxu1 %vm3402_vm0, %v3400_v1 }
0x1bc7   :  { %2995 = vmatprep.subr.bf16.mxu1 %v3400_v1 }
0x1bca   :  { %2996 = vmatpush3.bf16.msra.mxu1 %v3953_v55 }
0x1bcb   :  { %3009 = vmatprep.subr.bf16.mxu1 %v3400_v1 }
0x1c15   :  { %v2088_v16 = vpop.permute.xlu1 %2087 }
0x1c16   :  { %2998 = vmatmul.mubr.msk.bf16.vlgmr.msra.gmra.mrb[60].mxu1 %vm274_vm2, %v2088_v16 }
0x1c17   :  { %3010 = vmatpush3.bf16.msra.mxu1 %v3944_v18  ;;  %3013 = vmatprep.mubr.msk.bf16.mxu1 %vm3402_vm0, %v3400_v1 }
0x1c18   :  { %3011 = vmatprep.subr.bf16.mxu1 %v3400_v1 }
0x1c1b   :  { %3012 = vmatpush3.bf16.msra.mxu1 %v3953_v55 }
0x1c1c   :  { %3025 = vmatprep.subr.bf16.mxu1 %v3400_v1 }
0x1c80   :  { %v1775_v2 = vpop.f32.mrb[44].mxu1 }
0x1c81   :  { %v1776_v8 = vadd.f32 %v1775_v2, %v3976_v37  ;;  %v1777_v22 = vpop.f32.mrb[45].mxu1 }
0x1c82   :  { %v1779_v26 = vpop.f32.mrb[46].mxu1 }
0x1c83   :  { %v1780_v27 = vadd.f32 %v1779_v26, %v3978_v32  ;;  %v1781_v30 = vpop.f32.mrb[47].mxu1  ;;  %v1813_v32 = vrot.slane %v3991_v4, %v118_v17  ;;  %v1820_v41 = vadd.f32 %v4000_v7, %v1776_v8 }
0x1c88   :  { %v1785_v9 = vpop.f32.mrb[48].mxu1 }
0x1c89   :  { %v4072_v46 = vadd.f32 %v1785_v9, %v3980_v10  ;;  %v1787_v13 = vpop.f32.mrb[49].mxu1 }
0x1c8a   :  { %v1789_v20 = vpop.f32.mrb[50].mxu1 }
0x1c8b   :  { %v4075_v63 = vadd.f32 %v1789_v20, %v3982_v44  ;;  %v1791_v23 = vpop.f32.mrb[51].mxu1  ;;  %v1824_v20 = vadd.f32 %v4000_v7, %v4072_v46 }
0x1c90   :  { %v1795_v24 = vpop.f32.mrb[52].mxu1 }
0x1c91   :  { %v4078_v40 = vadd.f32 %v1795_v24, %v3986_v50  ;;  %v1797_v37 = vpop.f32.mrb[53].mxu1 }
0x1c92   :  { %v1799_v42 = vpop.f32.mrb[54].mxu1 }
0x1c93   :  { %v4084_v35 = vadd.f32 %v1799_v42, %v3993_v49  ;;  %v1801_v10 = vpop.f32.mrb[55].mxu1 }
0x1c94   :  { %v1802_v28 = vadd.f32 %v1801_v10, %v3995_v59 }
0x1c96   :  { %v1831_v43 = vadd.f32 %v1813_v32, %v1802_v28 }
0x1c98   :  { %v1954_v44 = vpop.f32.mrb[56].mxu1 }
0x1c99   :  { %v4087_v29 = vadd.f32 %v1954_v44, %v1831_v43  ;;  %v2983_v45 = vpop.f32.mrb[57].mxu1 }
0x1c9a   :  { %v1957_v38 = vpop.f32.mrb[58].mxu1 }
0x1c9b   :  { %v2984_v50 = vpop.f32.mrb[59].mxu1 }
0x1ce9   :  { %v2126_v48 = vpop.f32.mrb[60].mxu1 }
0x1cea   :  { %v2133_v53 = vadd.f32 %v2126_v48, %v1820_v41  ;;  %v2999_v14 = vpop.f32.mrb[61].mxu1 }
0x1ceb   :  { %v2129_v54 = vpop.f32.mrb[62].mxu1 }
0x1cec   :  { %3242 = vtanh.f32 %v2133_v53  ;;  %v3000_v17 = vpop.f32.mrb[63].mxu1  ;;  %v2742_v49 = vmul.f32 -1.442695, %v2133_v53 }
0x1cee   :  { %3244 = vpow2.f32 %v2742_v49  ;;  %v1826_v49 = vadd.f32 %v4000_v7, %v4075_v63 }
0x1cf6   :  { %v3243_v4 = vpop.eup %3242 }
0x1cf7   :  { %2143 = vrot.lane.b32.xlu0 %v3243_v4, %s3403_s0 }
0x1cf8   :  { %v3245_v59 = vpop.eup %3244 }
0x1cf9   :  { %v2137_v56 = vadd.f32 1.0, %v3245_v59 }
0x1cfb   :  { %3246 = vrcp.f32 %v2137_v56 }
0x1d05   :  { %v3247_v60 = vpop.eup %3246 }
0x1d06   :  { %v2141_v0 = vmul.f32 %v3247_v60, %v4033_v52  ;;  %v1822_v52 = vadd.f32 %v4000_v7, %v1780_v27 }
0x1d69   :  { %v2144_v36 = vpop.permute.xlu0 %2143 }
0x1d6a   :  { %v2146_v62 = vmul.f32 %v3247_v60, %v2144_v36 }
0x1d6c   :  { %2148 = vrot.lane.b32.xlu1 %v2146_v62, %s3403_s0 }
0x1dde   :  { %v2149_v12 = vpop.permute.xlu1 %2148 }
0x1ddf   :  { %v2151_v3 = vadd.f32 %v2149_v12, %v2141_v0 }
0x1de1   :  { %3248 = vtanh.f32 %v2151_v3 }
0x1deb   :  { %v3249_v25 = vpop.eup %3248 }
0x1dec   :  { %2154 = vrot.lane.b32.xlu0 %v3249_v25, %s3403_s0 }
0x1e5e   :  { %v2155_v58 = vpop.permute.xlu0 %2154 }
0x1e5f   :  { %v2157_v5 = vmul.f32 %v3247_v60, %v2155_v58 }
0x1e61   :  { %v2158_v39 = vpack.c.bf16 %v2157_v5, %v2157_v5 }
0x1e63   :  { %2160 = vrot.lane.b32.xlu1 %v2158_v39, %s3395_s19 }
0x1ed5   :  { %v2161_v15 = vpop.permute.xlu1 %2160 }
0x1ed6   :  { %3006 = vmatmul.mubr.msk.bf16.vlgmr.msra.gmra.mrb[64].mxu0 %vm274_vm2, %v2161_v15 }
0x1ed7   :  { %3018 = vmatpush3.bf16.msra.mxu0 %v3944_v18  ;;  %3021 = vmatprep.mubr.msk.bf16.mxu0 %vm3402_vm0, %v3400_v1 }
0x1ed8   :  { %3019 = vmatprep.subr.bf16.mxu0 %v3400_v1 }
0x1edb   :  { %3020 = vmatpush3.bf16.msra.mxu0 %v3953_v55 }
0x1edc   :  { %3033 = vmatprep.subr.bf16.mxu0 %v3400_v1 }
0x1fa9   :  { %v2199_v31 = vpop.f32.mrb[64].mxu0 }
0x1faa   :  { %v2206_v21 = vadd.f32 %v2199_v31, %v1822_v52  ;;  %v3007_v33 = vpop.f32.mrb[65].mxu0 }
0x1fab   :  { %v2202_v6 = vpop.f32.mrb[66].mxu0 }
0x1fac   :  { %3250 = vtanh.f32 %v2206_v21  ;;  %v3008_v51 = vpop.f32.mrb[67].mxu0  ;;  %v2744_v11 = vmul.f32 -1.442695, %v2206_v21  ;;  %v1828_v6 = vadd.f32 %v4000_v7, %v4078_v40 }
0x1fae   :  { %3252 = vpow2.f32 %v2744_v11 }
0x1fb6   :  { %v3251_v61 = vpop.eup %3250 }
0x1fb7   :  { %2216 = vrot.lane.b32.xlu0 %v3251_v61, %s3403_s0 }
0x1fb8   :  { %v3253_v47 = vpop.eup %3252 }
0x1fb9   :  { %v2210_v57 = vadd.f32 1.0, %v3253_v47 }
0x1fbb   :  { %3254 = vrcp.f32 %v2210_v57 }
0x1fc5   :  { %v3255_v34 = vpop.eup %3254 }
0x1fc6   :  { %v2214_v2 = vmul.f32 %v3255_v34, %v2151_v3 }
0x2029   :  { %v2217_v19 = vpop.permute.xlu0 %2216 }
0x202a   :  { %v2219_v16 = vmul.f32 %v3255_v34, %v2217_v19 }
0x202c   :  { %2221 = vrot.lane.b32.xlu1 %v2219_v16, %s3403_s0 }
0x209e   :  { %v2222_v8 = vpop.permute.xlu1 %2221 }
0x209f   :  { %v2224_v22 = vadd.f32 %v2222_v8, %v2214_v2 }
0x20a1   :  { %3256 = vtanh.f32 %v2224_v22 }
0x20ab   :  { %v3257_v26 = vpop.eup %3256 }
0x20ac   :  { %2227 = vrot.lane.b32.xlu0 %v3257_v26, %s3403_s0 }
0x211e   :  { %v2228_v27 = vpop.permute.xlu0 %2227 }
0x211f   :  { %v2230_v30 = vmul.f32 %v3255_v34, %v2228_v27 }
0x2121   :  { %v2231_v9 = vpack.c.bf16 %v2230_v30, %v2230_v30 }
0x2123   :  { %2233 = vrot.lane.b32.xlu1 %v2231_v9, %s3395_s19 }
0x2195   :  { %v2234_v13 = vpop.permute.xlu1 %2233 }
0x2196   :  { %3014 = vmatmul.mubr.msk.bf16.vlgmr.msra.gmra.mrb[64].mxu1 %vm274_vm2, %v2234_v13 }
0x2197   :  { %3026 = vmatpush3.bf16.msra.mxu1 %v3944_v18  ;;  %3029 = vmatprep.mubr.msk.bf16.mxu1 %vm3402_vm0, %v3400_v1 }
0x2198   :  { %3027 = vmatprep.subr.bf16.mxu1 %v3400_v1 }
0x219b   :  { %3028 = vmatpush3.bf16.msra.mxu1 %v3953_v55 }
0x219c   :  { %3041 = vmatprep.subr.bf16.mxu1 %v3400_v1 }
0x2269   :  { %v2272_v23 = vpop.f32.mrb[64].mxu1 }
0x226a   :  { %v2279_v24 = vadd.f32 %v2272_v23, %v1824_v20  ;;  %v3015_v37 = vpop.f32.mrb[65].mxu1  ;;  %v2738_v20 = vmul.f32 -1.442695, %v4087_v29 }
0x226b   :  { %v2275_v42 = vpop.f32.mrb[66].mxu1 }
0x226c   :  { %3258 = vtanh.f32 %v2279_v24  ;;  %v3016_v32 = vpop.f32.mrb[67].mxu1  ;;  %v2746_v28 = vmul.f32 -1.442695, %v2279_v24 }
0x226e   :  { %3260 = vpow2.f32 %v2746_v28 }
0x2276   :  { %v3259_v10 = vpop.eup %3258 }
0x2277   :  { %2289 = vrot.lane.b32.xlu0 %v3259_v10, %s3403_s0 }
0x2278   :  { %v3261_v43 = vpop.eup %3260 }
0x2279   :  { %v2283_v44 = vadd.f32 1.0, %v3261_v43 }
0x227b   :  { %3262 = vrcp.f32 %v2283_v44 }
0x2285   :  { %v3263_v45 = vpop.eup %3262 }
0x2286   :  { %v2287_v46 = vmul.f32 %v3263_v45, %v2224_v22 }
0x22e9   :  { %v2290_v38 = vpop.permute.xlu0 %2289 }
0x22ea   :  { %v2292_v50 = vmul.f32 %v3263_v45, %v2290_v38 }
0x22ec   :  { %2294 = vrot.lane.b32.xlu1 %v2292_v50, %s3403_s0 }
0x235e   :  { %v2295_v41 = vpop.permute.xlu1 %2294 }
0x235f   :  { %v2297_v48 = vadd.f32 %v2295_v41, %v2287_v46  ;;  %v3094_v46 = vld [vmem:[%s4187_s11] sm:$0xff]   ;;  %v3095_v41 = vld [vmem:[%s4187_s11 + $0x8] sm:$0xff]  }
0x2361   :  { %3264 = vtanh.f32 %v2297_v48 }
0x236b   :  { %v3265_v53 = vpop.eup %3264 }
0x236c   :  { %2300 = vrot.lane.b32.xlu0 %v3265_v53, %s3403_s0 }
0x23de   :  { %v2301_v14 = vpop.permute.xlu0 %2300 }
0x23df   :  { %v2303_v54 = vmul.f32 %v3263_v45, %v2301_v14 }
0x23e1   :  { %v2304_v17 = vpack.c.bf16 %v2303_v54, %v2303_v54  ;;  %v1830_v54 = vadd.f32 %v4000_v7, %v4084_v35 }
0x23e3   :  { %2306 = vrot.lane.b32.xlu1 %v2304_v17, %s3395_s19 }
0x2455   :  { %v2307_v4 = vpop.permute.xlu1 %2306 }
0x2456   :  { %3022 = vmatmul.mubr.msk.bf16.vlgmr.msra.gmra.mrb[68].mxu0 %vm274_vm2, %v2307_v4 }
0x2457   :  { %3034 = vmatpush3.bf16.msra.mxu0 %v3944_v18  ;;  %3037 = vmatprep.mubr.msk.bf16.mxu0 %vm3402_vm0, %v3400_v1 }
0x2458   :  { %3035 = vmatprep.subr.bf16.mxu0 %v3400_v1 }
0x245b   :  { %3036 = vmatpush3.bf16.msra.mxu0 %v3953_v55 }
0x245c   :  { %3049 = vmatprep.subr.bf16.mxu0 %v3400_v1 }
0x2529   :  { %v2345_v59 = vpop.f32.mrb[68].mxu0 }
0x252a   :  { %v2352_v56 = vadd.f32 %v2345_v59, %v1826_v49  ;;  %v3023_v60 = vpop.f32.mrb[69].mxu0 }
0x252b   :  { %v2348_v36 = vpop.f32.mrb[70].mxu0 }
0x252c   :  { %3266 = vtanh.f32 %v2352_v56  ;;  %v3024_v62 = vpop.f32.mrb[71].mxu0  ;;  %v2748_v18 = vmul.f32 -1.442695, %v2352_v56 }
0x252e   :  { %3268 = vpow2.f32 %v2748_v18 }
0x2536   :  { %v3267_v0 = vpop.eup %3266 }
0x2537   :  { %2362 = vrot.lane.b32.xlu0 %v3267_v0, %s3403_s0 }
0x2538   :  { %v3269_v12 = vpop.eup %3268 }
0x2539   :  { %v2356_v3 = vadd.f32 1.0, %v3269_v12 }
0x253b   :  { %3270 = vrcp.f32 %v2356_v3 }
0x2545   :  { %v3271_v55 = vpop.eup %3270 }
0x2546   :  { %v2360_v63 = vmul.f32 %v3271_v55, %v2297_v48 }
0x25a9   :  { %v2363_v25 = vpop.permute.xlu0 %2362 }
0x25aa   :  { %v2365_v58 = vmul.f32 %v3271_v55, %v2363_v25 }
0x25ac   :  { %2367 = vrot.lane.b32.xlu1 %v2365_v58, %s3403_s0 }
0x261e   :  { %v2368_v5 = vpop.permute.xlu1 %2367 }
0x261f   :  { %v2370_v39 = vadd.f32 %v2368_v5, %v2360_v63  ;;  %v3096_v5 = vld [vmem:[%s4186_s10] sm:$0xff]  }
0x2621   :  { %3272 = vtanh.f32 %v2370_v39 }
0x262b   :  { %v3273_v15 = vpop.eup %3272 }
0x262c   :  { %2373 = vrot.lane.b32.xlu0 %v3273_v15, %s3403_s0 }
0x269e   :  { %v2374_v52 = vpop.permute.xlu0 %2373 }
0x269f   :  { %v2376_v31 = vmul.f32 %v3271_v55, %v2374_v52  ;;  %v3097_v52 = vld [vmem:[%s4186_s10 + $0x8] sm:$0xff]  }
0x26a1   :  { %v2377_v21 = vpack.c.bf16 %v2376_v31, %v2376_v31 }
0x26a3   :  { %2379 = vrot.lane.b32.xlu1 %v2377_v21, %s3395_s19 }
0x2715   :  { %v2380_v33 = vpop.permute.xlu1 %2379 }
0x2716   :  { %3030 = vmatmul.mubr.msk.bf16.vlgmr.msra.gmra.mrb[68].mxu1 %vm274_vm2, %v2380_v33 }
0x2717   :  { %3045 = vmatprep.mubr.msk.bf16.mxu1 %vm3402_vm0, %v3400_v1  ;;  %3042 = vmatpush3.bf16.msra.mxu1 %v3094_v46 }
0x2718   :  { %3043 = vmatprep.subr.bf16.mxu1 %v3400_v1 }
0x271b   :  { %3044 = vmatpush3.bf16.msra.mxu1 %v3095_v41 }
0x27e9   :  { %v2418_v51 = vpop.f32.mrb[68].mxu1 }
0x27ea   :  { %v2425_v61 = vadd.f32 %v2418_v51, %v1828_v6  ;;  %v3031_v11 = vpop.f32.mrb[69].mxu1 }
0x27eb   :  { %v2421_v47 = vpop.f32.mrb[70].mxu1  ;;  %v2759_v11 = vld [vmem:[#allocation5] ss:$0 sm:$0xff] }
0x27ec   :  { %3274 = vtanh.f32 %v2425_v61  ;;  %v3032_v57 = vpop.f32.mrb[71].mxu1  ;;  %v2750_v19 = vmul.f32 -1.442695, %v2425_v61 }
0x27ee   :  { %3276 = vpow2.f32 %v2750_v19 }
0x27f6   :  { %v3275_v34 = vpop.eup %3274 }
0x27f7   :  { %2435 = vrot.lane.b32.xlu0 %v3275_v34, %s3403_s0 }
0x27f8   :  { %v3277_v16 = vpop.eup %3276 }
0x27f9   :  { %v2429_v2 = vadd.f32 1.0, %v3277_v16 }
0x27fb   :  { %3278 = vrcp.f32 %v2429_v2 }
0x2805   :  { %v3279_v8 = vpop.eup %3278 }
0x2806   :  { %v2433_v40 = vmul.f32 %v3279_v8, %v2370_v39 }
0x2869   :  { %v2436_v22 = vpop.permute.xlu0 %2435 }
0x286a   :  { %v2438_v26 = vmul.f32 %v3279_v8, %v2436_v22 }
0x286c   :  { %2440 = vrot.lane.b32.xlu1 %v2438_v26, %s3403_s0 }
0x28de   :  { %v2441_v27 = vpop.permute.xlu1 %2440 }
0x28df   :  { %v2443_v30 = vadd.f32 %v2441_v27, %v2433_v40 }
0x28e1   :  { %3280 = vtanh.f32 %v2443_v30 }
0x28e2   :  { %3282 = vtanh.f32 %v4087_v29 }
0x28e3   :  { %3284 = vpow2.f32 %v2738_v20 }
0x28eb   :  { %v3281_v9 = vpop.eup %3280 }
0x28ec   :  { %2446 = vrot.lane.b32.xlu0 %v3281_v9, %s3403_s0  ;;  %v3283_v13 = vpop.eup %3282 }
0x28ed   :  { %v3285_v23 = vpop.eup %3284 }
0x28ee   :  { %v1974_v24 = vadd.f32 1.0, %v3285_v23 }
0x28f0   :  { %1991 = vrot.lane.b32.xlu0 %v3283_v13, %s3403_s0  ;;  %3286 = vrcp.f32 %v1974_v24 }
0x28fa   :  { %v3287_v10 = vpop.eup %3286 }
0x28fb   :  { %v1989_v45 = vmul.f32 0.0, %v3287_v10 }
0x295e   :  { %v2447_v37 = vpop.permute.xlu0 %2446 }
0x295f   :  { %v2449_v42 = vmul.f32 %v3279_v8, %v2447_v37 }
0x2961   :  { %v2450_v32 = vpack.c.bf16 %v2449_v42, %v2449_v42 }
0x2962   :  { %v1992_v28 = vpop.permute.xlu0 %1991 }
0x2963   :  { %v1994_v43 = vmul.f32 %v3287_v10, %v1992_v28  ;;  %2452 = vrot.lane.b32.xlu1 %v2450_v32, %s3395_s19 }
0x2965   :  { %1996 = vrot.lane.b32.xlu0 %v1994_v43, %s3403_s0 }
0x29d5   :  { %v2453_v44 = vpop.permute.xlu1 %2452 }
0x29d6   :  { %3038 = vmatmul.mubr.msk.bf16.vlgmr.msra.gmra.mrb[72].mxu0 %vm274_vm2, %v2453_v44 }
0x29d7   :  { %v1997_v38 = vpop.permute.xlu0 %1996  ;;  %3053 = vmatprep.mubr.msk.bf16.mxu0 %vm3402_vm0, %v3400_v1  ;;  %3050 = vmatpush3.bf16.msra.mxu0 %v3096_v5 }
0x29d8   :  { %v1999_v29 = vadd.f32 %v1997_v38, %v1989_v45  ;;  %3051 = vmatprep.subr.bf16.mxu0 %v3400_v1 }
0x29da   :  { %3288 = vtanh.f32 %v1999_v29 }
0x29db   :  { %3052 = vmatpush3.bf16.msra.mxu0 %v3097_v52 }
0x29e4   :  { %v3289_v50 = vpop.eup %3288 }
0x29e5   :  { %2008 = vrot.lane.b32.xlu0 %v3289_v50, %s3403_s0 }
0x2a57   :  { %v2009_v48 = vpop.permute.xlu0 %2008 }
0x2a58   :  { %v2011_v53 = vmul.f32 %v3287_v10, %v2009_v48 }
0x2a5a   :  { %v2528_v14 = vpack.c.bf16 %v2011_v53, %v2011_v53 }
0x2a5c   :  { %2534 = vrot.lane.b32.xlu0 %v2528_v14, %s3395_s19 }
0x2aa9   :  { %v2491_v17 = vpop.f32.mrb[72].mxu0 }
0x2aaa   :  { %v2498_v4 = vadd.f32 %v2491_v17, %v1830_v54  ;;  %v3039_v49 = vpop.f32.mrb[73].mxu0 }
0x2aab   :  { %v2494_v59 = vpop.f32.mrb[74].mxu0 }
0x2aac   :  { %3290 = vtanh.f32 %v2498_v4  ;;  %v3040_v56 = vpop.f32.mrb[75].mxu0  ;;  %v2752_v62 = vmul.f32 -1.442695, %v2498_v4 }
0x2aae   :  { %3292 = vpow2.f32 %v2752_v62 }
0x2ab6   :  { %v3291_v60 = vpop.eup %3290 }
0x2ab7   :  { %2508 = vrot.lane.b32.xlu1 %v3291_v60, %s3403_s0 }
0x2ab8   :  { %v3293_v0 = vpop.eup %3292 }
0x2ab9   :  { %v2502_v18 = vadd.f32 1.0, %v3293_v0 }
0x2abb   :  { %3294 = vrcp.f32 %v2502_v18 }
0x2ac5   :  { %v3295_v12 = vpop.eup %3294 }
0x2ac6   :  { %v2506_v35 = vmul.f32 %v3295_v12, %v2443_v30 }
0x2ace   :  { %v2535_v36 = vpop.permute.xlu0 %2534 }
0x2acf   :  { %3046 = vmatmul.mubr.msk.bf16.vlgmr.msra.gmra.mrb[72].mxu1 %vm274_vm2, %v2535_v36 }
0x2b29   :  { %v2509_v3 = vpop.permute.xlu1 %2508 }
0x2b2a   :  { %v2511_v7 = vmul.f32 %v3295_v12, %v2509_v3 }
0x2b2c   :  { %2513 = vrot.lane.b32.xlu1 %v2511_v7, %s3403_s0 }
0x2b9e   :  { %v2514_v55 = vpop.permute.xlu1 %2513 }
0x2b9f   :  { %v2516_v25 = vadd.f32 %v2514_v55, %v2506_v35 }
0x2ba1   :  { %3296 = vtanh.f32 %v2516_v25 }
0x2ba2   :  { %v2585_v58 = vpop.f32.mrb[72].mxu1 }
0x2ba3   :  { %v3047_v63 = vpop.f32.mrb[73].mxu1 }
0x2ba4   :  { %v2588_v39 = vpop.f32.mrb[74].mxu1 }
0x2ba5   :  { %v3048_v15 = vpop.f32.mrb[75].mxu1 }
0x2bab   :  { %v3297_v31 = vpop.eup %3296 }
0x2bac   :  { %2519 = vrot.lane.b32.xlu1 %v3297_v31, %s3403_s0 }
0x2c1e   :  { %v2520_v21 = vpop.permute.xlu1 %2519 }
0x2c1f   :  { %v2522_v33 = vmul.f32 %v3295_v12, %v2520_v21 }
0x2c21   :  { %v2523_v6 = vpack.c.bf16 %v2522_v33, %v2522_v33 }
0x2c23   :  { %2592 = vrot.lane.b32.xlu1 %v2523_v6, %s3395_s19 }
0x2c95   :  { %v2593_v51 = vpop.permute.xlu1 %2592 }
0x2c96   :  { %3054 = vmatmul.mubr.msk.bf16.vlgmr.msra.gmra.mrb[76].mxu0 %vm274_vm2, %v2593_v51 }
0x2d69   :  { %v2643_v61 = vpop.f32.mrb[76].mxu0 }
0x2d6a   :  { %v2644_v47 = vadd.f32 %v2643_v61, %v2585_v58  ;;  %v3055_v57 = vpop.f32.mrb[77].mxu0 }
0x2d6b   :  { %v2646_v34 = vpop.f32.mrb[78].mxu0 }
0x2d6c   :  { %v2656_v19 = vadd.f32 %v2759_v11, %v2644_v47  ;;  %v3056_v1 = vpop.f32.mrb[79].mxu0 }
0x2d6e   :  { %2658 = vst.msk [vmem:[%s4189_s13] sm:$0xff] %vm2657_vm3, %v2656_v19 }
0x2d6f   :  { %2663 = vsyncpa [#allocation7], 1 }
0x2d70   :  { %2664 = vsyncpa [#allocation9], 1 }
0x2d71   :  { %2665 = vsyncpa [#allocation12], 1 }

</bundles_post_ra>
